<compile_context>
chip_gen: v7x
topology: tpu7x:2x2x1
jax: 0.10.0
libtpu: 0.0.40
codegen_flags: <defaults>
</compile_context>

<pallas_src>
import functools

import jax
import jax.numpy as jnp
from jax.experimental import pallas as pl


# ------------------------------------------------------------------ fused kernel

def _fused_passt_kernel(
    xp_ref, bns_ref, pw_ref, tokb_ref, mask_ref,
    ln1g_ref, ln1b_ref, qw_ref, qb_ref, kw_ref, kb_ref, vw_ref, vb_ref,
    pjw_ref, pjb_ref,
    ln2g_ref, ln2b_ref, f1w_ref, f1b_ref, f2w_ref, f2b_ref,
    ng_ref, nb_ref, fcw_ref, fcb_ref,
    o_ref,
    *, depth, heads, batch, seq, eps, mm_dtype):
    f32 = jnp.float32

    def mm(a, w):  # matmul; bf16 (or f32) operands, f32 accumulation
        return jnp.dot(a.astype(mm_dtype), w.astype(mm_dtype),
                       preferred_element_type=f32)

    def mm_t(a, b):  # a @ b.T (contraction on last dims) — flash-attention pattern
        return jax.lax.dot_general(
            a.astype(mm_dtype), b.astype(mm_dtype),
            (((1,), (1,)), ((), ())), preferred_element_type=f32)

    def ln(x, g, b):  # LayerNorm; statistics kept in f32
        mu = jnp.mean(x, axis=-1, keepdims=True)
        xc = x - mu
        var = jnp.mean(xc * xc, axis=-1, keepdims=True)
        return xc * jax.lax.rsqrt(var + eps) * g + b

    # ---- eval-mode BN scale (shift pre-folded into tokb) + patch-embed + tokens/pos ----
    xb = xp_ref[...] * bns_ref[...]                       # (R, Kp_pad)
    h = mm(xb, pw_ref[...]) + tokb_ref[...]               # (R, D), R = batch*seq

    R, D = h.shape
    dh = D // heads
    scale = float(dh) ** -0.5
    mask = mask_ref[...]                                  # (R, R): 0 in-batch, -1e30 cross

    for d in range(depth):                                # DEPTH is tiny -> fully unrolled
        # -------- multi-head self-attention (pre-LN), batch folded into rows --------
        hn = ln(h, ln1g_ref[d:d + 1, :], ln1b_ref[d:d + 1, :])
        q = (mm(hn, qw_ref[d]) + qb_ref[d:d + 1, :]) * scale    # (R, D)
        k = mm(hn, kw_ref[d]) + kb_ref[d:d + 1, :]
        v = mm(hn, vw_ref[d]) + vb_ref[d:d + 1, :]
        outs = []
        for hd in range(heads):                           # heads stay in-register
            lo, hi = hd * dh, (hd + 1) * dh
            s = mm_t(q[:, lo:hi], k[:, lo:hi]) + mask     # (R, R)
            s = s - jnp.max(s, axis=-1, keepdims=True)
            p = jnp.exp(s)
            p = p / jnp.sum(p, axis=-1, keepdims=True)    # exact divide (negligible cost)
            outs.append(mm(p, v[:, lo:hi]))               # (R, dh)
        o_cat = jnp.concatenate(outs, axis=-1)            # (R, D)
        h = h + mm(o_cat, pjw_ref[d]) + pjb_ref[d:d + 1, :]   # single (R,D)@(D,D) proj
        # ------------------------------- MLP (pre-LN) -------------------------------
        hn = ln(h, ln2g_ref[d:d + 1, :], ln2b_ref[d:d + 1, :])
        z = jax.nn.gelu(mm(hn, f1w_ref[d]) + f1b_ref[d:d + 1, :], approximate=True)
        h = h + mm(z, f2w_ref[d]) + f2b_ref[d:d + 1, :]

    # ------ final LN on cls/dist rows only, (cls+dist)/2 feature, fc + tanh ------
    cls_rows = jnp.concatenate([h[b * seq:b * seq + 1, :] for b in range(batch)], axis=0)
    dst_rows = jnp.concatenate([h[b * seq + 1:b * seq + 2, :] for b in range(batch)], axis=0)
    feat = (ln(cls_rows, ng_ref[...], nb_ref[...])
            + ln(dst_rows, ng_ref[...], nb_ref[...])) * 0.5                  # (B, D)
    out = jnp.tanh(mm(feat, fcw_ref[...]) + fcb_ref[...])                    # (B, OUT)
    o_ref[...] = out.astype(o_ref.dtype)


# ------------------------------------------------------------------ model

class Config:
    B = 2            # batch
    C = 7            # in_channels
    T = 32           # time frames
    M = 16           # mel bins
    PT, PF = 8, 8    # patch size (time, freq)
    D = 64           # embed_dim == encoder.num_features
    H = 4            # attention heads
    DEPTH = 2        # transformer blocks
    MLP = 256        # mlp hidden dim (ratio 4)
    NUM_CLASSES = 3  # -> fc out = 9
    # HBM storage dtype of the big matmul weights and the MXU operand dtype.
    # Accumulation is always f32; LN/softmax/GELU stay f32 (v5e-safe).
    WEIGHT_DTYPE = jnp.bfloat16
    MATMUL_DTYPE = jnp.bfloat16


def init_params(key, cfg):
    ks = iter(jax.random.split(key, 64))

    def nrm(shape, s=0.02, dtype=jnp.float32):
        return (s * jax.random.normal(next(ks), shape, jnp.float32)).astype(dtype)

    C, M, D, DEPTH, MLP = cfg.C, cfg.M, cfg.D, cfg.DEPTH, cfg.MLP
    Tp, Mp = cfg.T // cfg.PT, cfg.M // cfg.PF
    Kp = C * cfg.PT * cfg.PF
    wdt = cfg.WEIGHT_DTYPE

    p = {
        # per-input-channel BatchNorm2d(mel_bins) — eval-mode running stats + affine
        "bn_gamma": 1.0 + nrm((C, M), 0.1),
        "bn_beta": nrm((C, M), 0.1),
        "bn_mean": nrm((C, M), 0.1),
        "bn_var": 0.5 + jax.random.uniform(next(ks), (C, M), jnp.float32),
        # patch embed conv(D, C, PT, PF) stored flattened as (C*PT*PF, D)
        # (== torch conv weight.reshape(D, -1).T), bf16 in HBM
        "patch_w": nrm((Kp, D), dtype=wdt),
        "patch_b": nrm((D,)),
        "time_pos": nrm((Tp, D)),
        "freq_pos": nrm((Mp, D)),
        "cls_token": nrm((D,)),
        "dist_token": nrm((D,)),
        "new_pos": nrm((2, D)),
        "norm_g": jnp.ones((D,), jnp.float32),
        "norm_b": jnp.zeros((D,), jnp.float32),
        "fc_w": nrm((D, cfg.NUM_CLASSES * 3)),
        "fc_b": nrm((cfg.NUM_CLASSES * 3,)),
        # transformer block weights stacked along a leading DEPTH axis; matmul weights
        # are stored bf16 so the kernel's weight DMA is halved.
        "blocks": {
            "ln1_g": jnp.ones((DEPTH, D), jnp.float32),
            "ln1_b": jnp.zeros((DEPTH, D), jnp.float32),
            "qkv_w": nrm((DEPTH, D, 3 * D), dtype=wdt),
            "qkv_b": nrm((DEPTH, 3 * D)),
            "proj_w": nrm((DEPTH, D, D), dtype=wdt),
            "proj_b": nrm((DEPTH, D)),
            "ln2_g": jnp.ones((DEPTH, D), jnp.float32),
            "ln2_b": jnp.zeros((DEPTH, D), jnp.float32),
            "fc1_w": nrm((DEPTH, D, MLP), dtype=wdt),
            "fc1_b": nrm((DEPTH, MLP)),
            "fc2_w": nrm((DEPTH, MLP, D), dtype=wdt),
            "fc2_b": nrm((DEPTH, D)),
        },
    }
    return p


def passt_forward(x, params, cfg):
    f32 = jnp.float32
    B, C, T, M = x.shape
    D, H, DEPTH, MLP = cfg.D, cfg.H, cfg.DEPTH, cfg.MLP
    pt, pf = cfg.PT, cfg.PF
    Tp, Mp = T // pt, M // pf
    N = Tp * Mp
    Kp = C * pt * pf
    Kp_pad = ((Kp + 127) // 128) * 128        # lane-align the patch contraction (448 -> 512)
    S = N + 2
    R = B * S                                  # batch folded into rows
    OUT = cfg.NUM_CLASSES * 3

    def unfold(a):
        # (b, C, T, M) -> (b, N, Kp); patch order (t', m') row-major,
        # feature order (c, dt, df) == torch conv-weight flattening.
        b = a.shape[0]
        return (a.reshape(b, C, Tp, pt, Mp, pf)
                 .transpose(0, 2, 4, 1, 3, 5)
                 .reshape(b, N, Kp))

    # ---- tiny JAX-side prep (unfold + param reshapes, all a few tens of KB) ----
    xp = unfold(x)                                           # (B, N, Kp)
    xp = jnp.pad(xp, ((0, 0), (2, 0), (0, Kp_pad - Kp)))     # cls/dist zero rows + lane pad
    xp = xp.reshape(R, Kp_pad)                               # (R, Kp_pad)

    # eval-mode BN per (channel, mel): scale applied in-kernel; shift folded through the
    # patch-embed matmul into the token/pos bias (removes one DMA + one VPU add).
    bscale = params["bn_gamma"] * jax.lax.rsqrt(params["bn_var"] + 1e-5)   # (C, M)
    bshift = params["bn_beta"] - params["bn_mean"] * bscale

    def bn_map(a):
        a_full = jnp.broadcast_to(a[None, :, None, :], (1, C, T, M))
        return unfold(a_full)[0]                             # (N, Kp)

    bn_s = jnp.concatenate([jnp.zeros((2, Kp), f32), bn_map(bscale)], axis=0)   # (S, Kp)
    bn_s = jnp.pad(bn_s, ((0, 0), (0, Kp_pad - Kp)))
    bn_s = jnp.tile(bn_s, (B, 1))                            # (R, Kp_pad)

    patch_w_f32 = params["patch_w"].astype(f32)
    bn_shift_bias = jnp.dot(bn_map(bshift), patch_w_f32)     # (N, D) == bn_t @ W folded
    pos = (params["time_pos"][:, None, :] + params["freq_pos"][None, :, :]).reshape(N, D)
    tokb = jnp.concatenate([
        (params["cls_token"] + params["new_pos"][0])[None, :],
        (params["dist_token"] + params["new_pos"][1])[None, :],
        pos + params["patch_b"][None, :] + bn_shift_bias,
    ], axis=0)                                               # (S, D)
    tokb = jnp.tile(tokb, (B, 1))                            # (R, D)

    patch_w = jnp.pad(params["patch_w"], ((0, Kp_pad - Kp), (0, 0)))   # (Kp_pad, D) bf16

    # block-diagonal attention mask: rows/cols of different batch elements get -1e30
    bid = jnp.repeat(jnp.arange(B), S)
    attn_mask = jnp.where(bid[:, None] == bid[None, :], 0.0, -1e30).astype(f32)   # (R, R)

    blk = params["blocks"]
    qw = blk["qkv_w"][:, :, 0 * D:1 * D]
    kw = blk["qkv_w"][:, :, 1 * D:2 * D]
    vw = blk["qkv_w"][:, :, 2 * D:3 * D]
    qb = blk["qkv_b"][:, 0 * D:1 * D]
    kb = blk["qkv_b"][:, 1 * D:2 * D]
    vb = blk["qkv_b"][:, 2 * D:3 * D]

    kernel = functools.partial(
        _fused_passt_kernel, depth=DEPTH, heads=H, batch=B, seq=S, eps=1e-6,
        mm_dtype=cfg.MATMUL_DTYPE)

    # No grid: the whole (batch-folded) forward is a single invocation; every operand is
    # placed once in VMEM (no double-buffering / pipeline bookkeeping at all).
    out = pl.pallas_call(
        kernel,
        out_shape=jax.ShapeDtypeStruct((B, OUT), f32),
    )(
        xp, bn_s, patch_w, tokb, attn_mask,
        blk["ln1_g"], blk["ln1_b"], qw, qb, kw, kb, vw, vb,
        blk["proj_w"], blk["proj_b"], blk["ln2_g"], blk["ln2_b"],
        blk["fc1_w"], blk["fc1_b"], blk["fc2_w"], blk["fc2_b"],
        params["norm_g"].reshape(1, D), params["norm_b"].reshape(1, D),
        params["fc_w"], params["fc_b"].reshape(1, OUT),
    )
    return {"accdoa": out}


# ------------------------------------------------------------------ main

if __name__ == "__main__":
    cfg = Config()
    key = jax.random.PRNGKey(0)
    k_param, k_x = jax.random.split(key)

    params = init_params(k_param, cfg)
    x = jax.random.normal(k_x, (cfg.B, cfg.C, cfg.T, cfg.M), jnp.float32)

    fwd = jax.jit(lambda xx, pp: passt_forward(xx, pp, cfg))
    out = fwd(x, params)
    acc = jax.block_until_ready(out["accdoa"])

    assert acc.shape == (cfg.B, cfg.NUM_CLASSES * 3), acc.shape
    assert bool(jnp.all(jnp.isfinite(acc)))
    assert bool(jnp.all(jnp.abs(acc) <= 1.0))  # tanh range
    print("KERNEL_OK")
</pallas_src>

<mosaic_0001>
module attributes {stable_mosaic.version = 11 : i64} {
  func.func @_fused_passt_kernel(%arg0: memref<20x512xf32, #tpu.memory_space<vmem>>, %arg1: memref<20x512xf32, #tpu.memory_space<vmem>>, %arg2: memref<512x64xbf16, #tpu.memory_space<vmem>>, %arg3: memref<20x64xf32, #tpu.memory_space<vmem>>, %arg4: memref<20x20xf32, #tpu.memory_space<vmem>>, %arg5: memref<2x64xf32, #tpu.memory_space<vmem>>, %arg6: memref<2x64xf32, #tpu.memory_space<vmem>>, %arg7: memref<2x64x64xbf16, #tpu.memory_space<vmem>>, %arg8: memref<2x64xf32, #tpu.memory_space<vmem>>, %arg9: memref<2x64x64xbf16, #tpu.memory_space<vmem>>, %arg10: memref<2x64xf32, #tpu.memory_space<vmem>>, %arg11: memref<2x64x64xbf16, #tpu.memory_space<vmem>>, %arg12: memref<2x64xf32, #tpu.memory_space<vmem>>, %arg13: memref<2x64x64xbf16, #tpu.memory_space<vmem>>, %arg14: memref<2x64xf32, #tpu.memory_space<vmem>>, %arg15: memref<2x64xf32, #tpu.memory_space<vmem>>, %arg16: memref<2x64xf32, #tpu.memory_space<vmem>>, %arg17: memref<2x64x256xbf16, #tpu.memory_space<vmem>>, %arg18: memref<2x256xf32, #tpu.memory_space<vmem>>, %arg19: memref<2x256x64xbf16, #tpu.memory_space<vmem>>, %arg20: memref<2x64xf32, #tpu.memory_space<vmem>>, %arg21: memref<1x64xf32, #tpu.memory_space<vmem>>, %arg22: memref<1x64xf32, #tpu.memory_space<vmem>>, %arg23: memref<64x9xf32, #tpu.memory_space<vmem>>, %arg24: memref<1x9xf32, #tpu.memory_space<vmem>>, %arg25: memref<2x9xf32, #tpu.memory_space<vmem>>) attributes {dimension_semantics = [], scalar_prefetch = 0 : i64, scratch_operands = 0 : i64, tpu.core_type = #tpu.core_type<tc>} {
    %c0 = arith.constant 0 : index
    %c0_0 = arith.constant 0 : index
    %0 = vector.load %arg0[%c0, %c0_0] : memref<20x512xf32, #tpu.memory_space<vmem>>, vector<20x512xf32>
    %c0_1 = arith.constant 0 : index
    %c0_2 = arith.constant 0 : index
    %1 = vector.load %arg1[%c0_1, %c0_2] : memref<20x512xf32, #tpu.memory_space<vmem>>, vector<20x512xf32>
    %2 = arith.mulf %0, %1 : vector<20x512xf32>
    %c0_3 = arith.constant 0 : index
    %c0_4 = arith.constant 0 : index
    %3 = vector.load %arg2[%c0_3, %c0_4] : memref<512x64xbf16, #tpu.memory_space<vmem>>, vector<512x64xbf16>
    %4 = arith.truncf %2 : vector<20x512xf32> to vector<20x512xbf16>
    %cst = arith.constant dense<0.000000e+00> : vector<20x64xf32>
    %5 = tpu.matmul %4, %3, %cst {dimension_numbers = #tpu.dot_dimension_numbers<[1], [0], [0], [1], [0, 0, 1, 1], [], []>} : vector<20x512xbf16>, vector<512x64xbf16>, vector<20x64xf32> -> vector<20x64xf32>
    %c0_5 = arith.constant 0 : index
    %c0_6 = arith.constant 0 : index
    %6 = vector.load %arg3[%c0_5, %c0_6] : memref<20x64xf32, #tpu.memory_space<vmem>>, vector<20x64xf32>
    %7 = arith.addf %5, %6 : vector<20x64xf32>
    %c0_7 = arith.constant 0 : index
    %c0_8 = arith.constant 0 : index
    %8 = vector.load %arg4[%c0_7, %c0_8] : memref<20x20xf32, #tpu.memory_space<vmem>>, vector<20x20xf32>
    %c0_9 = arith.constant 0 : index
    %c0_10 = arith.constant 0 : index
    %9 = vector.load %arg5[%c0_9, %c0_10] : memref<2x64xf32, #tpu.memory_space<vmem>>, vector<1x64xf32>
    %c0_11 = arith.constant 0 : index
    %c0_12 = arith.constant 0 : index
    %10 = vector.load %arg6[%c0_11, %c0_12] : memref<2x64xf32, #tpu.memory_space<vmem>>, vector<1x64xf32>
    %cst_13 = arith.constant dense<0.000000e+00> : vector<20xf32>
    %11 = vector.multi_reduction <add>, %7, %cst_13 [1] : vector<20x64xf32> to vector<20xf32>
    %12 = vector.shape_cast %11 : vector<20xf32> to vector<20x1xf32>
    %cst_14 = arith.constant 6.400000e+01 : f32
    %13 = vector.broadcast %cst_14 : f32 to vector<20x1xf32>
    %14 = arith.divf %12, %13 : vector<20x1xf32>
    %15 = vector.broadcast %14 : vector<20x1xf32> to vector<20x64xf32>
    %16 = arith.subf %7, %15 : vector<20x64xf32>
    %17 = arith.mulf %16, %16 : vector<20x64xf32>
    %cst_15 = arith.constant dense<0.000000e+00> : vector<20xf32>
    %18 = vector.multi_reduction <add>, %17, %cst_15 [1] : vector<20x64xf32> to vector<20xf32>
    %19 = vector.shape_cast %18 : vector<20xf32> to vector<20x1xf32>
    %cst_16 = arith.constant 6.400000e+01 : f32
    %20 = vector.broadcast %cst_16 : f32 to vector<20x1xf32>
    %21 = arith.divf %19, %20 : vector<20x1xf32>
    %cst_17 = arith.constant 9.99999997E-7 : f32
    %22 = vector.broadcast %cst_17 : f32 to vector<20x1xf32>
    %23 = arith.addf %21, %22 : vector<20x1xf32>
    %24 = math.rsqrt %23 : vector<20x1xf32>
    %25 = vector.broadcast %24 : vector<20x1xf32> to vector<20x64xf32>
    %26 = arith.mulf %16, %25 : vector<20x64xf32>
    %27 = vector.broadcast %9 : vector<1x64xf32> to vector<20x64xf32>
    %28 = arith.mulf %26, %27 : vector<20x64xf32>
    %29 = vector.broadcast %10 : vector<1x64xf32> to vector<20x64xf32>
    %30 = arith.addf %28, %29 : vector<20x64xf32>
    %c0_18 = arith.constant 0 : index
    %c0_19 = arith.constant 0 : index
    %c0_20 = arith.constant 0 : index
    %31 = vector.load %arg7[%c0_18, %c0_19, %c0_20] : memref<2x64x64xbf16, #tpu.memory_space<vmem>>, vector<1x64x64xbf16>
    %32 = vector.shape_cast %31 : vector<1x64x64xbf16> to vector<64x64xbf16>
    %33 = arith.truncf %30 : vector<20x64xf32> to vector<20x64xbf16>
    %cst_21 = arith.constant dense<0.000000e+00> : vector<20x64xf32>
    %34 = tpu.matmul %33, %32, %cst_21 {dimension_numbers = #tpu.dot_dimension_numbers<[1], [0], [0], [1], [0, 0, 1, 1], [], []>} : vector<20x64xbf16>, vector<64x64xbf16>, vector<20x64xf32> -> vector<20x64xf32>
    %c0_22 = arith.constant 0 : index
    %c0_23 = arith.constant 0 : index
    %35 = vector.load %arg8[%c0_22, %c0_23] : memref<2x64xf32, #tpu.memory_space<vmem>>, vector<1x64xf32>
    %36 = vector.broadcast %35 : vector<1x64xf32> to vector<20x64xf32>
    %37 = arith.addf %34, %36 : vector<20x64xf32>
    %cst_24 = arith.constant 2.500000e-01 : f32
    %38 = vector.broadcast %cst_24 : f32 to vector<20x64xf32>
    %39 = arith.mulf %37, %38 : vector<20x64xf32>
    %c0_25 = arith.constant 0 : index
    %c0_26 = arith.constant 0 : index
    %c0_27 = arith.constant 0 : index
    %40 = vector.load %arg9[%c0_25, %c0_26, %c0_27] : memref<2x64x64xbf16, #tpu.memory_space<vmem>>, vector<1x64x64xbf16>
    %41 = vector.shape_cast %40 : vector<1x64x64xbf16> to vector<64x64xbf16>
    %42 = arith.truncf %30 : vector<20x64xf32> to vector<20x64xbf16>
    %cst_28 = arith.constant dense<0.000000e+00> : vector<20x64xf32>
    %43 = tpu.matmul %42, %41, %cst_28 {dimension_numbers = #tpu.dot_dimension_numbers<[1], [0], [0], [1], [0, 0, 1, 1], [], []>} : vector<20x64xbf16>, vector<64x64xbf16>, vector<20x64xf32> -> vector<20x64xf32>
    %c0_29 = arith.constant 0 : index
    %c0_30 = arith.constant 0 : index
    %44 = vector.load %arg10[%c0_29, %c0_30] : memref<2x64xf32, #tpu.memory_space<vmem>>, vector<1x64xf32>
    %45 = vector.broadcast %44 : vector<1x64xf32> to vector<20x64xf32>
    %46 = arith.addf %43, %45 : vector<20x64xf32>
    %c0_31 = arith.constant 0 : index
    %c0_32 = arith.constant 0 : index
    %c0_33 = arith.constant 0 : index
    %47 = vector.load %arg11[%c0_31, %c0_32, %c0_33] : memref<2x64x64xbf16, #tpu.memory_space<vmem>>, vector<1x64x64xbf16>
    %48 = vector.shape_cast %47 : vector<1x64x64xbf16> to vector<64x64xbf16>
    %49 = arith.truncf %30 : vector<20x64xf32> to vector<20x64xbf16>
    %cst_34 = arith.constant dense<0.000000e+00> : vector<20x64xf32>
    %50 = tpu.matmul %49, %48, %cst_34 {dimension_numbers = #tpu.dot_dimension_numbers<[1], [0], [0], [1], [0, 0, 1, 1], [], []>} : vector<20x64xbf16>, vector<64x64xbf16>, vector<20x64xf32> -> vector<20x64xf32>
    %c0_35 = arith.constant 0 : index
    %c0_36 = arith.constant 0 : index
    %51 = vector.load %arg12[%c0_35, %c0_36] : memref<2x64xf32, #tpu.memory_space<vmem>>, vector<1x64xf32>
    %52 = vector.broadcast %51 : vector<1x64xf32> to vector<20x64xf32>
    %53 = arith.addf %50, %52 : vector<20x64xf32>
    %54 = vector.extract_strided_slice %39 {offsets = [0, 0], sizes = [20, 16], strides = [1, 1]} : vector<20x64xf32> to vector<20x16xf32>
    %55 = vector.extract_strided_slice %46 {offsets = [0, 0], sizes = [20, 16], strides = [1, 1]} : vector<20x64xf32> to vector<20x16xf32>
    %56 = arith.truncf %54 : vector<20x16xf32> to vector<20x16xbf16>
    %57 = arith.truncf %55 : vector<20x16xf32> to vector<20x16xbf16>
    %cst_37 = arith.constant dense<0.000000e+00> : vector<20x20xf32>
    %58 = tpu.matmul %56, %57, %cst_37 {dimension_numbers = #tpu.dot_dimension_numbers<[1], [1], [0], [0], [0, 0, 1, 0], [], []>} : vector<20x16xbf16>, vector<20x16xbf16>, vector<20x20xf32> -> vector<20x20xf32>
    %59 = arith.addf %58, %8 : vector<20x20xf32>
    %cst_38 = arith.constant dense<0xFF800000> : vector<20xf32>
    %60 = vector.multi_reduction <maximumf>, %59, %cst_38 [1] : vector<20x20xf32> to vector<20xf32>
    %61 = vector.shape_cast %60 : vector<20xf32> to vector<20x1xf32>
    %62 = vector.broadcast %61 : vector<20x1xf32> to vector<20x20xf32>
    %63 = arith.subf %59, %62 : vector<20x20xf32>
    %64 = math.exp %63 : vector<20x20xf32>
    %cst_39 = arith.constant dense<0.000000e+00> : vector<20xf32>
    %65 = vector.multi_reduction <add>, %64, %cst_39 [1] : vector<20x20xf32> to vector<20xf32>
    %66 = vector.shape_cast %65 : vector<20xf32> to vector<20x1xf32>
    %67 = vector.broadcast %66 : vector<20x1xf32> to vector<20x20xf32>
    %68 = arith.divf %64, %67 : vector<20x20xf32>
    %69 = vector.extract_strided_slice %53 {offsets = [0, 0], sizes = [20, 16], strides = [1, 1]} : vector<20x64xf32> to vector<20x16xf32>
    %70 = arith.truncf %68 : vector<20x20xf32> to vector<20x20xbf16>
    %71 = arith.truncf %69 : vector<20x16xf32> to vector<20x16xbf16>
    %cst_40 = arith.constant dense<0.000000e+00> : vector<20x16xf32>
    %72 = tpu.matmul %70, %71, %cst_40 {dimension_numbers = #tpu.dot_dimension_numbers<[1], [0], [0], [1], [0, 0, 1, 1], [], []>} : vector<20x20xbf16>, vector<20x16xbf16>, vector<20x16xf32> -> vector<20x16xf32>
    %73 = vector.extract_strided_slice %39 {offsets = [0, 16], sizes = [20, 16], strides = [1, 1]} : vector<20x64xf32> to vector<20x16xf32>
    %74 = vector.extract_strided_slice %46 {offsets = [0, 16], sizes = [20, 16], strides = [1, 1]} : vector<20x64xf32> to vector<20x16xf32>
    %75 = arith.truncf %73 : vector<20x16xf32> to vector<20x16xbf16>
    %76 = arith.truncf %74 : vector<20x16xf32> to vector<20x16xbf16>
    %cst_41 = arith.constant dense<0.000000e+00> : vector<20x20xf32>
    %77 = tpu.matmul %75, %76, %cst_41 {dimension_numbers = #tpu.dot_dimension_numbers<[1], [1], [0], [0], [0, 0, 1, 0], [], []>} : vector<20x16xbf16>, vector<20x16xbf16>, vector<20x20xf32> -> vector<20x20xf32>
    %78 = arith.addf %77, %8 : vector<20x20xf32>
    %cst_42 = arith.constant dense<0xFF800000> : vector<20xf32>
    %79 = vector.multi_reduction <maximumf>, %78, %cst_42 [1] : vector<20x20xf32> to vector<20xf32>
    %80 = vector.shape_cast %79 : vector<20xf32> to vector<20x1xf32>
    %81 = vector.broadcast %80 : vector<20x1xf32> to vector<20x20xf32>
    %82 = arith.subf %78, %81 : vector<20x20xf32>
    %83 = math.exp %82 : vector<20x20xf32>
    %cst_43 = arith.constant dense<0.000000e+00> : vector<20xf32>
    %84 = vector.multi_reduction <add>, %83, %cst_43 [1] : vector<20x20xf32> to vector<20xf32>
    %85 = vector.shape_cast %84 : vector<20xf32> to vector<20x1xf32>
    %86 = vector.broadcast %85 : vector<20x1xf32> to vector<20x20xf32>
    %87 = arith.divf %83, %86 : vector<20x20xf32>
    %88 = vector.extract_strided_slice %53 {offsets = [0, 16], sizes = [20, 16], strides = [1, 1]} : vector<20x64xf32> to vector<20x16xf32>
    %89 = arith.truncf %87 : vector<20x20xf32> to vector<20x20xbf16>
    %90 = arith.truncf %88 : vector<20x16xf32> to vector<20x16xbf16>
    %cst_44 = arith.constant dense<0.000000e+00> : vector<20x16xf32>
    %91 = tpu.matmul %89, %90, %cst_44 {dimension_numbers = #tpu.dot_dimension_numbers<[1], [0], [0], [1], [0, 0, 1, 1], [], []>} : vector<20x20xbf16>, vector<20x16xbf16>, vector<20x16xf32> -> vector<20x16xf32>
    %92 = vector.extract_strided_slice %39 {offsets = [0, 32], sizes = [20, 16], strides = [1, 1]} : vector<20x64xf32> to vector<20x16xf32>
    %93 = vector.extract_strided_slice %46 {offsets = [0, 32], sizes = [20, 16], strides = [1, 1]} : vector<20x64xf32> to vector<20x16xf32>
    %94 = arith.truncf %92 : vector<20x16xf32> to vector<20x16xbf16>
    %95 = arith.truncf %93 : vector<20x16xf32> to vector<20x16xbf16>
    %cst_45 = arith.constant dense<0.000000e+00> : vector<20x20xf32>
    %96 = tpu.matmul %94, %95, %cst_45 {dimension_numbers = #tpu.dot_dimension_numbers<[1], [1], [0], [0], [0, 0, 1, 0], [], []>} : vector<20x16xbf16>, vector<20x16xbf16>, vector<20x20xf32> -> vector<20x20xf32>
    %97 = arith.addf %96, %8 : vector<20x20xf32>
    %cst_46 = arith.constant dense<0xFF800000> : vector<20xf32>
    %98 = vector.multi_reduction <maximumf>, %97, %cst_46 [1] : vector<20x20xf32> to vector<20xf32>
    %99 = vector.shape_cast %98 : vector<20xf32> to vector<20x1xf32>
    %100 = vector.broadcast %99 : vector<20x1xf32> to vector<20x20xf32>
    %101 = arith.subf %97, %100 : vector<20x20xf32>
    %102 = math.exp %101 : vector<20x20xf32>
    %cst_47 = arith.constant dense<0.000000e+00> : vector<20xf32>
    %103 = vector.multi_reduction <add>, %102, %cst_47 [1] : vector<20x20xf32> to vector<20xf32>
    %104 = vector.shape_cast %103 : vector<20xf32> to vector<20x1xf32>
    %105 = vector.broadcast %104 : vector<20x1xf32> to vector<20x20xf32>
    %106 = arith.divf %102, %105 : vector<20x20xf32>
    %107 = vector.extract_strided_slice %53 {offsets = [0, 32], sizes = [20, 16], strides = [1, 1]} : vector<20x64xf32> to vector<20x16xf32>
    %108 = arith.truncf %106 : vector<20x20xf32> to vector<20x20xbf16>
    %109 = arith.truncf %107 : vector<20x16xf32> to vector<20x16xbf16>
    %cst_48 = arith.constant dense<0.000000e+00> : vector<20x16xf32>
    %110 = tpu.matmul %108, %109, %cst_48 {dimension_numbers = #tpu.dot_dimension_numbers<[1], [0], [0], [1], [0, 0, 1, 1], [], []>} : vector<20x20xbf16>, vector<20x16xbf16>, vector<20x16xf32> -> vector<20x16xf32>
    %111 = vector.extract_strided_slice %39 {offsets = [0, 48], sizes = [20, 16], strides = [1, 1]} : vector<20x64xf32> to vector<20x16xf32>
    %112 = vector.extract_strided_slice %46 {offsets = [0, 48], sizes = [20, 16], strides = [1, 1]} : vector<20x64xf32> to vector<20x16xf32>
    %113 = arith.truncf %111 : vector<20x16xf32> to vector<20x16xbf16>
    %114 = arith.truncf %112 : vector<20x16xf32> to vector<20x16xbf16>
    %cst_49 = arith.constant dense<0.000000e+00> : vector<20x20xf32>
    %115 = tpu.matmul %113, %114, %cst_49 {dimension_numbers = #tpu.dot_dimension_numbers<[1], [1], [0], [0], [0, 0, 1, 0], [], []>} : vector<20x16xbf16>, vector<20x16xbf16>, vector<20x20xf32> -> vector<20x20xf32>
    %116 = arith.addf %115, %8 : vector<20x20xf32>
    %cst_50 = arith.constant dense<0xFF800000> : vector<20xf32>
    %117 = vector.multi_reduction <maximumf>, %116, %cst_50 [1] : vector<20x20xf32> to vector<20xf32>
    %118 = vector.shape_cast %117 : vector<20xf32> to vector<20x1xf32>
    %119 = vector.broadcast %118 : vector<20x1xf32> to vector<20x20xf32>
    %120 = arith.subf %116, %119 : vector<20x20xf32>
    %121 = math.exp %120 : vector<20x20xf32>
    %cst_51 = arith.constant dense<0.000000e+00> : vector<20xf32>
    %122 = vector.multi_reduction <add>, %121, %cst_51 [1] : vector<20x20xf32> to vector<20xf32>
    %123 = vector.shape_cast %122 : vector<20xf32> to vector<20x1xf32>
    %124 = vector.broadcast %123 : vector<20x1xf32> to vector<20x20xf32>
    %125 = arith.divf %121, %124 : vector<20x20xf32>
    %126 = vector.extract_strided_slice %53 {offsets = [0, 48], sizes = [20, 16], strides = [1, 1]} : vector<20x64xf32> to vector<20x16xf32>
    %127 = arith.truncf %125 : vector<20x20xf32> to vector<20x20xbf16>
    %128 = arith.truncf %126 : vector<20x16xf32> to vector<20x16xbf16>
    %cst_52 = arith.constant dense<0.000000e+00> : vector<20x16xf32>
    %129 = tpu.matmul %127, %128, %cst_52 {dimension_numbers = #tpu.dot_dimension_numbers<[1], [0], [0], [1], [0, 0, 1, 1], [], []>} : vector<20x20xbf16>, vector<20x16xbf16>, vector<20x16xf32> -> vector<20x16xf32>
    %130 = tpu.concatenate %72, %91, %110, %129 in 1 : vector<20x16xf32>, vector<20x16xf32>, vector<20x16xf32>, vector<20x16xf32> -> vector<20x64xf32>
    %c0_53 = arith.constant 0 : index
    %c0_54 = arith.constant 0 : index
    %c0_55 = arith.constant 0 : index
    %131 = vector.load %arg13[%c0_53, %c0_54, %c0_55] : memref<2x64x64xbf16, #tpu.memory_space<vmem>>, vector<1x64x64xbf16>
    %132 = vector.shape_cast %131 : vector<1x64x64xbf16> to vector<64x64xbf16>
    %133 = arith.truncf %130 : vector<20x64xf32> to vector<20x64xbf16>
    %cst_56 = arith.constant dense<0.000000e+00> : vector<20x64xf32>
    %134 = tpu.matmul %133, %132, %cst_56 {dimension_numbers = #tpu.dot_dimension_numbers<[1], [0], [0], [1], [0, 0, 1, 1], [], []>} : vector<20x64xbf16>, vector<64x64xbf16>, vector<20x64xf32> -> vector<20x64xf32>
    %135 = arith.addf %7, %134 : vector<20x64xf32>
    %c0_57 = arith.constant 0 : index
    %c0_58 = arith.constant 0 : index
    %136 = vector.load %arg14[%c0_57, %c0_58] : memref<2x64xf32, #tpu.memory_space<vmem>>, vector<1x64xf32>
    %137 = vector.broadcast %136 : vector<1x64xf32> to vector<20x64xf32>
    %138 = arith.addf %135, %137 : vector<20x64xf32>
    %c0_59 = arith.constant 0 : index
    %c0_60 = arith.constant 0 : index
    %139 = vector.load %arg15[%c0_59, %c0_60] : memref<2x64xf32, #tpu.memory_space<vmem>>, vector<1x64xf32>
    %c0_61 = arith.constant 0 : index
    %c0_62 = arith.constant 0 : index
    %140 = vector.load %arg16[%c0_61, %c0_62] : memref<2x64xf32, #tpu.memory_space<vmem>>, vector<1x64xf32>
    %cst_63 = arith.constant dense<0.000000e+00> : vector<20xf32>
    %141 = vector.multi_reduction <add>, %138, %cst_63 [1] : vector<20x64xf32> to vector<20xf32>
    %142 = vector.shape_cast %141 : vector<20xf32> to vector<20x1xf32>
    %cst_64 = arith.constant 6.400000e+01 : f32
    %143 = vector.broadcast %cst_64 : f32 to vector<20x1xf32>
    %144 = arith.divf %142, %143 : vector<20x1xf32>
    %145 = vector.broadcast %144 : vector<20x1xf32> to vector<20x64xf32>
    %146 = arith.subf %138, %145 : vector<20x64xf32>
    %147 = arith.mulf %146, %146 : vector<20x64xf32>
    %cst_65 = arith.constant dense<0.000000e+00> : vector<20xf32>
    %148 = vector.multi_reduction <add>, %147, %cst_65 [1] : vector<20x64xf32> to vector<20xf32>
    %149 = vector.shape_cast %148 : vector<20xf32> to vector<20x1xf32>
    %cst_66 = arith.constant 6.400000e+01 : f32
    %150 = vector.broadcast %cst_66 : f32 to vector<20x1xf32>
    %151 = arith.divf %149, %150 : vector<20x1xf32>
    %cst_67 = arith.constant 9.99999997E-7 : f32
    %152 = vector.broadcast %cst_67 : f32 to vector<20x1xf32>
    %153 = arith.addf %151, %152 : vector<20x1xf32>
    %154 = math.rsqrt %153 : vector<20x1xf32>
    %155 = vector.broadcast %154 : vector<20x1xf32> to vector<20x64xf32>
    %156 = arith.mulf %146, %155 : vector<20x64xf32>
    %157 = vector.broadcast %139 : vector<1x64xf32> to vector<20x64xf32>
    %158 = arith.mulf %156, %157 : vector<20x64xf32>
    %159 = vector.broadcast %140 : vector<1x64xf32> to vector<20x64xf32>
    %160 = arith.addf %158, %159 : vector<20x64xf32>
    %c0_68 = arith.constant 0 : index
    %c0_69 = arith.constant 0 : index
    %c0_70 = arith.constant 0 : index
    %161 = vector.load %arg17[%c0_68, %c0_69, %c0_70] : memref<2x64x256xbf16, #tpu.memory_space<vmem>>, vector<1x64x256xbf16>
    %162 = vector.shape_cast %161 : vector<1x64x256xbf16> to vector<64x256xbf16>
    %163 = arith.truncf %160 : vector<20x64xf32> to vector<20x64xbf16>
    %cst_71 = arith.constant dense<0.000000e+00> : vector<20x256xf32>
    %164 = tpu.matmul %163, %162, %cst_71 {dimension_numbers = #tpu.dot_dimension_numbers<[1], [0], [0], [1], [0, 0, 1, 1], [], []>} : vector<20x64xbf16>, vector<64x256xbf16>, vector<20x256xf32> -> vector<20x256xf32>
    %c0_72 = arith.constant 0 : index
    %c0_73 = arith.constant 0 : index
    %165 = vector.load %arg18[%c0_72, %c0_73] : memref<2x256xf32, #tpu.memory_space<vmem>>, vector<1x256xf32>
    %166 = vector.broadcast %165 : vector<1x256xf32> to vector<20x256xf32>
    %167 = arith.addf %164, %166 : vector<20x256xf32>
    %168 = arith.mulf %167, %167 : vector<20x256xf32>
    %169 = arith.mulf %167, %168 : vector<20x256xf32>
    %cst_74 = arith.constant 4.471500e-02 : f32
    %170 = vector.broadcast %cst_74 : f32 to vector<20x256xf32>
    %171 = arith.mulf %170, %169 : vector<20x256xf32>
    %172 = arith.addf %167, %171 : vector<20x256xf32>
    %cst_75 = arith.constant 0.797884583 : f32
    %173 = vector.broadcast %cst_75 : f32 to vector<20x256xf32>
    %174 = arith.mulf %173, %172 : vector<20x256xf32>
    %175 = math.tanh %174 : vector<20x256xf32>
    %cst_76 = arith.constant 1.000000e+00 : f32
    %176 = vector.broadcast %cst_76 : f32 to vector<20x256xf32>
    %177 = arith.addf %176, %175 : vector<20x256xf32>
    %cst_77 = arith.constant 5.000000e-01 : f32
    %178 = vector.broadcast %cst_77 : f32 to vector<20x256xf32>
    %179 = arith.mulf %178, %177 : vector<20x256xf32>
    %180 = arith.mulf %167, %179 : vector<20x256xf32>
    %c0_78 = arith.constant 0 : index
    %c0_79 = arith.constant 0 : index
    %c0_80 = arith.constant 0 : index
    %181 = vector.load %arg19[%c0_78, %c0_79, %c0_80] : memref<2x256x64xbf16, #tpu.memory_space<vmem>>, vector<1x256x64xbf16>
    %182 = vector.shape_cast %181 : vector<1x256x64xbf16> to vector<256x64xbf16>
    %183 = arith.truncf %180 : vector<20x256xf32> to vector<20x256xbf16>
    %cst_81 = arith.constant dense<0.000000e+00> : vector<20x64xf32>
    %184 = tpu.matmul %183, %182, %cst_81 {dimension_numbers = #tpu.dot_dimension_numbers<[1], [0], [0], [1], [0, 0, 1, 1], [], []>} : vector<20x256xbf16>, vector<256x64xbf16>, vector<20x64xf32> -> vector<20x64xf32>
    %185 = arith.addf %138, %184 : vector<20x64xf32>
    %c0_82 = arith.constant 0 : index
    %c0_83 = arith.constant 0 : index
    %186 = vector.load %arg20[%c0_82, %c0_83] : memref<2x64xf32, #tpu.memory_space<vmem>>, vector<1x64xf32>
    %187 = vector.broadcast %186 : vector<1x64xf32> to vector<20x64xf32>
    %188 = arith.addf %185, %187 : vector<20x64xf32>
    %c1 = arith.constant 1 : index
    %c0_84 = arith.constant 0 : index
    %189 = vector.load %arg5[%c1, %c0_84] : memref<2x64xf32, #tpu.memory_space<vmem>>, vector<1x64xf32>
    %c1_85 = arith.constant 1 : index
    %c0_86 = arith.constant 0 : index
    %190 = vector.load %arg6[%c1_85, %c0_86] : memref<2x64xf32, #tpu.memory_space<vmem>>, vector<1x64xf32>
    %cst_87 = arith.constant dense<0.000000e+00> : vector<20xf32>
    %191 = vector.multi_reduction <add>, %188, %cst_87 [1] : vector<20x64xf32> to vector<20xf32>
    %192 = vector.shape_cast %191 : vector<20xf32> to vector<20x1xf32>
    %cst_88 = arith.constant 6.400000e+01 : f32
    %193 = vector.broadcast %cst_88 : f32 to vector<20x1xf32>
    %194 = arith.divf %192, %193 : vector<20x1xf32>
    %195 = vector.broadcast %194 : vector<20x1xf32> to vector<20x64xf32>
    %196 = arith.subf %188, %195 : vector<20x64xf32>
    %197 = arith.mulf %196, %196 : vector<20x64xf32>
    %cst_89 = arith.constant dense<0.000000e+00> : vector<20xf32>
    %198 = vector.multi_reduction <add>, %197, %cst_89 [1] : vector<20x64xf32> to vector<20xf32>
    %199 = vector.shape_cast %198 : vector<20xf32> to vector<20x1xf32>
    %cst_90 = arith.constant 6.400000e+01 : f32
    %200 = vector.broadcast %cst_90 : f32 to vector<20x1xf32>
    %201 = arith.divf %199, %200 : vector<20x1xf32>
    %cst_91 = arith.constant 9.99999997E-7 : f32
    %202 = vector.broadcast %cst_91 : f32 to vector<20x1xf32>
    %203 = arith.addf %201, %202 : vector<20x1xf32>
    %204 = math.rsqrt %203 : vector<20x1xf32>
    %205 = vector.broadcast %204 : vector<20x1xf32> to vector<20x64xf32>
    %206 = arith.mulf %196, %205 : vector<20x64xf32>
    %207 = vector.broadcast %189 : vector<1x64xf32> to vector<20x64xf32>
    %208 = arith.mulf %206, %207 : vector<20x64xf32>
    %209 = vector.broadcast %190 : vector<1x64xf32> to vector<20x64xf32>
    %210 = arith.addf %208, %209 : vector<20x64xf32>
    %c1_92 = arith.constant 1 : index
    %c0_93 = arith.constant 0 : index
    %c0_94 = arith.constant 0 : index
    %211 = vector.load %arg7[%c1_92, %c0_93, %c0_94] : memref<2x64x64xbf16, #tpu.memory_space<vmem>>, vector<1x64x64xbf16>
    %212 = vector.shape_cast %211 : vector<1x64x64xbf16> to vector<64x64xbf16>
    %213 = arith.truncf %210 : vector<20x64xf32> to vector<20x64xbf16>
    %cst_95 = arith.constant dense<0.000000e+00> : vector<20x64xf32>
    %214 = tpu.matmul %213, %212, %cst_95 {dimension_numbers = #tpu.dot_dimension_numbers<[1], [0], [0], [1], [0, 0, 1, 1], [], []>} : vector<20x64xbf16>, vector<64x64xbf16>, vector<20x64xf32> -> vector<20x64xf32>
    %c1_96 = arith.constant 1 : index
    %c0_97 = arith.constant 0 : index
    %215 = vector.load %arg8[%c1_96, %c0_97] : memref<2x64xf32, #tpu.memory_space<vmem>>, vector<1x64xf32>
    %216 = vector.broadcast %215 : vector<1x64xf32> to vector<20x64xf32>
    %217 = arith.addf %214, %216 : vector<20x64xf32>
    %cst_98 = arith.constant 2.500000e-01 : f32
    %218 = vector.broadcast %cst_98 : f32 to vector<20x64xf32>
    %219 = arith.mulf %217, %218 : vector<20x64xf32>
    %c1_99 = arith.constant 1 : index
    %c0_100 = arith.constant 0 : index
    %c0_101 = arith.constant 0 : index
    %220 = vector.load %arg9[%c1_99, %c0_100, %c0_101] : memref<2x64x64xbf16, #tpu.memory_space<vmem>>, vector<1x64x64xbf16>
    %221 = vector.shape_cast %220 : vector<1x64x64xbf16> to vector<64x64xbf16>
    %222 = arith.truncf %210 : vector<20x64xf32> to vector<20x64xbf16>
    %cst_102 = arith.constant dense<0.000000e+00> : vector<20x64xf32>
    %223 = tpu.matmul %222, %221, %cst_102 {dimension_numbers = #tpu.dot_dimension_numbers<[1], [0], [0], [1], [0, 0, 1, 1], [], []>} : vector<20x64xbf16>, vector<64x64xbf16>, vector<20x64xf32> -> vector<20x64xf32>
    %c1_103 = arith.constant 1 : index
    %c0_104 = arith.constant 0 : index
    %224 = vector.load %arg10[%c1_103, %c0_104] : memref<2x64xf32, #tpu.memory_space<vmem>>, vector<1x64xf32>
    %225 = vector.broadcast %224 : vector<1x64xf32> to vector<20x64xf32>
    %226 = arith.addf %223, %225 : vector<20x64xf32>
    %c1_105 = arith.constant 1 : index
    %c0_106 = arith.constant 0 : index
    %c0_107 = arith.constant 0 : index
    %227 = vector.load %arg11[%c1_105, %c0_106, %c0_107] : memref<2x64x64xbf16, #tpu.memory_space<vmem>>, vector<1x64x64xbf16>
    %228 = vector.shape_cast %227 : vector<1x64x64xbf16> to vector<64x64xbf16>
    %229 = arith.truncf %210 : vector<20x64xf32> to vector<20x64xbf16>
    %cst_108 = arith.constant dense<0.000000e+00> : vector<20x64xf32>
    %230 = tpu.matmul %229, %228, %cst_108 {dimension_numbers = #tpu.dot_dimension_numbers<[1], [0], [0], [1], [0, 0, 1, 1], [], []>} : vector<20x64xbf16>, vector<64x64xbf16>, vector<20x64xf32> -> vector<20x64xf32>
    %c1_109 = arith.constant 1 : index
    %c0_110 = arith.constant 0 : index
    %231 = vector.load %arg12[%c1_109, %c0_110] : memref<2x64xf32, #tpu.memory_space<vmem>>, vector<1x64xf32>
    %232 = vector.broadcast %231 : vector<1x64xf32> to vector<20x64xf32>
    %233 = arith.addf %230, %232 : vector<20x64xf32>
    %234 = vector.extract_strided_slice %219 {offsets = [0, 0], sizes = [20, 16], strides = [1, 1]} : vector<20x64xf32> to vector<20x16xf32>
    %235 = vector.extract_strided_slice %226 {offsets = [0, 0], sizes = [20, 16], strides = [1, 1]} : vector<20x64xf32> to vector<20x16xf32>
    %236 = arith.truncf %234 : vector<20x16xf32> to vector<20x16xbf16>
    %237 = arith.truncf %235 : vector<20x16xf32> to vector<20x16xbf16>
    %cst_111 = arith.constant dense<0.000000e+00> : vector<20x20xf32>
    %238 = tpu.matmul %236, %237, %cst_111 {dimension_numbers = #tpu.dot_dimension_numbers<[1], [1], [0], [0], [0, 0, 1, 0], [], []>} : vector<20x16xbf16>, vector<20x16xbf16>, vector<20x20xf32> -> vector<20x20xf32>
    %239 = arith.addf %238, %8 : vector<20x20xf32>
    %cst_112 = arith.constant dense<0xFF800000> : vector<20xf32>
    %240 = vector.multi_reduction <maximumf>, %239, %cst_112 [1] : vector<20x20xf32> to vector<20xf32>
    %241 = vector.shape_cast %240 : vector<20xf32> to vector<20x1xf32>
    %242 = vector.broadcast %241 : vector<20x1xf32> to vector<20x20xf32>
    %243 = arith.subf %239, %242 : vector<20x20xf32>
    %244 = math.exp %243 : vector<20x20xf32>
    %cst_113 = arith.constant dense<0.000000e+00> : vector<20xf32>
    %245 = vector.multi_reduction <add>, %244, %cst_113 [1] : vector<20x20xf32> to vector<20xf32>
    %246 = vector.shape_cast %245 : vector<20xf32> to vector<20x1xf32>
    %247 = vector.broadcast %246 : vector<20x1xf32> to vector<20x20xf32>
    %248 = arith.divf %244, %247 : vector<20x20xf32>
    %249 = vector.extract_strided_slice %233 {offsets = [0, 0], sizes = [20, 16], strides = [1, 1]} : vector<20x64xf32> to vector<20x16xf32>
    %250 = arith.truncf %248 : vector<20x20xf32> to vector<20x20xbf16>
    %251 = arith.truncf %249 : vector<20x16xf32> to vector<20x16xbf16>
    %cst_114 = arith.constant dense<0.000000e+00> : vector<20x16xf32>
    %252 = tpu.matmul %250, %251, %cst_114 {dimension_numbers = #tpu.dot_dimension_numbers<[1], [0], [0], [1], [0, 0, 1, 1], [], []>} : vector<20x20xbf16>, vector<20x16xbf16>, vector<20x16xf32> -> vector<20x16xf32>
    %253 = vector.extract_strided_slice %219 {offsets = [0, 16], sizes = [20, 16], strides = [1, 1]} : vector<20x64xf32> to vector<20x16xf32>
    %254 = vector.extract_strided_slice %226 {offsets = [0, 16], sizes = [20, 16], strides = [1, 1]} : vector<20x64xf32> to vector<20x16xf32>
    %255 = arith.truncf %253 : vector<20x16xf32> to vector<20x16xbf16>
    %256 = arith.truncf %254 : vector<20x16xf32> to vector<20x16xbf16>
    %cst_115 = arith.constant dense<0.000000e+00> : vector<20x20xf32>
    %257 = tpu.matmul %255, %256, %cst_115 {dimension_numbers = #tpu.dot_dimension_numbers<[1], [1], [0], [0], [0, 0, 1, 0], [], []>} : vector<20x16xbf16>, vector<20x16xbf16>, vector<20x20xf32> -> vector<20x20xf32>
    %258 = arith.addf %257, %8 : vector<20x20xf32>
    %cst_116 = arith.constant dense<0xFF800000> : vector<20xf32>
    %259 = vector.multi_reduction <maximumf>, %258, %cst_116 [1] : vector<20x20xf32> to vector<20xf32>
    %260 = vector.shape_cast %259 : vector<20xf32> to vector<20x1xf32>
    %261 = vector.broadcast %260 : vector<20x1xf32> to vector<20x20xf32>
    %262 = arith.subf %258, %261 : vector<20x20xf32>
    %263 = math.exp %262 : vector<20x20xf32>
    %cst_117 = arith.constant dense<0.000000e+00> : vector<20xf32>
    %264 = vector.multi_reduction <add>, %263, %cst_117 [1] : vector<20x20xf32> to vector<20xf32>
    %265 = vector.shape_cast %264 : vector<20xf32> to vector<20x1xf32>
    %266 = vector.broadcast %265 : vector<20x1xf32> to vector<20x20xf32>
    %267 = arith.divf %263, %266 : vector<20x20xf32>
    %268 = vector.extract_strided_slice %233 {offsets = [0, 16], sizes = [20, 16], strides = [1, 1]} : vector<20x64xf32> to vector<20x16xf32>
    %269 = arith.truncf %267 : vector<20x20xf32> to vector<20x20xbf16>
    %270 = arith.truncf %268 : vector<20x16xf32> to vector<20x16xbf16>
    %cst_118 = arith.constant dense<0.000000e+00> : vector<20x16xf32>
    %271 = tpu.matmul %269, %270, %cst_118 {dimension_numbers = #tpu.dot_dimension_numbers<[1], [0], [0], [1], [0, 0, 1, 1], [], []>} : vector<20x20xbf16>, vector<20x16xbf16>, vector<20x16xf32> -> vector<20x16xf32>
    %272 = vector.extract_strided_slice %219 {offsets = [0, 32], sizes = [20, 16], strides = [1, 1]} : vector<20x64xf32> to vector<20x16xf32>
    %273 = vector.extract_strided_slice %226 {offsets = [0, 32], sizes = [20, 16], strides = [1, 1]} : vector<20x64xf32> to vector<20x16xf32>
    %274 = arith.truncf %272 : vector<20x16xf32> to vector<20x16xbf16>
    %275 = arith.truncf %273 : vector<20x16xf32> to vector<20x16xbf16>
    %cst_119 = arith.constant dense<0.000000e+00> : vector<20x20xf32>
    %276 = tpu.matmul %274, %275, %cst_119 {dimension_numbers = #tpu.dot_dimension_numbers<[1], [1], [0], [0], [0, 0, 1, 0], [], []>} : vector<20x16xbf16>, vector<20x16xbf16>, vector<20x20xf32> -> vector<20x20xf32>
    %277 = arith.addf %276, %8 : vector<20x20xf32>
    %cst_120 = arith.constant dense<0xFF800000> : vector<20xf32>
    %278 = vector.multi_reduction <maximumf>, %277, %cst_120 [1] : vector<20x20xf32> to vector<20xf32>
    %279 = vector.shape_cast %278 : vector<20xf32> to vector<20x1xf32>
    %280 = vector.broadcast %279 : vector<20x1xf32> to vector<20x20xf32>
    %281 = arith.subf %277, %280 : vector<20x20xf32>
    %282 = math.exp %281 : vector<20x20xf32>
    %cst_121 = arith.constant dense<0.000000e+00> : vector<20xf32>
    %283 = vector.multi_reduction <add>, %282, %cst_121 [1] : vector<20x20xf32> to vector<20xf32>
    %284 = vector.shape_cast %283 : vector<20xf32> to vector<20x1xf32>
    %285 = vector.broadcast %284 : vector<20x1xf32> to vector<20x20xf32>
    %286 = arith.divf %282, %285 : vector<20x20xf32>
    %287 = vector.extract_strided_slice %233 {offsets = [0, 32], sizes = [20, 16], strides = [1, 1]} : vector<20x64xf32> to vector<20x16xf32>
    %288 = arith.truncf %286 : vector<20x20xf32> to vector<20x20xbf16>
    %289 = arith.truncf %287 : vector<20x16xf32> to vector<20x16xbf16>
    %cst_122 = arith.constant dense<0.000000e+00> : vector<20x16xf32>
    %290 = tpu.matmul %288, %289, %cst_122 {dimension_numbers = #tpu.dot_dimension_numbers<[1], [0], [0], [1], [0, 0, 1, 1], [], []>} : vector<20x20xbf16>, vector<20x16xbf16>, vector<20x16xf32> -> vector<20x16xf32>
    %291 = vector.extract_strided_slice %219 {offsets = [0, 48], sizes = [20, 16], strides = [1, 1]} : vector<20x64xf32> to vector<20x16xf32>
    %292 = vector.extract_strided_slice %226 {offsets = [0, 48], sizes = [20, 16], strides = [1, 1]} : vector<20x64xf32> to vector<20x16xf32>
    %293 = arith.truncf %291 : vector<20x16xf32> to vector<20x16xbf16>
    %294 = arith.truncf %292 : vector<20x16xf32> to vector<20x16xbf16>
    %cst_123 = arith.constant dense<0.000000e+00> : vector<20x20xf32>
    %295 = tpu.matmul %293, %294, %cst_123 {dimension_numbers = #tpu.dot_dimension_numbers<[1], [1], [0], [0], [0, 0, 1, 0], [], []>} : vector<20x16xbf16>, vector<20x16xbf16>, vector<20x20xf32> -> vector<20x20xf32>
    %296 = arith.addf %295, %8 : vector<20x20xf32>
    %cst_124 = arith.constant dense<0xFF800000> : vector<20xf32>
    %297 = vector.multi_reduction <maximumf>, %296, %cst_124 [1] : vector<20x20xf32> to vector<20xf32>
    %298 = vector.shape_cast %297 : vector<20xf32> to vector<20x1xf32>
    %299 = vector.broadcast %298 : vector<20x1xf32> to vector<20x20xf32>
    %300 = arith.subf %296, %299 : vector<20x20xf32>
    %301 = math.exp %300 : vector<20x20xf32>
    %cst_125 = arith.constant dense<0.000000e+00> : vector<20xf32>
    %302 = vector.multi_reduction <add>, %301, %cst_125 [1] : vector<20x20xf32> to vector<20xf32>
    %303 = vector.shape_cast %302 : vector<20xf32> to vector<20x1xf32>
    %304 = vector.broadcast %303 : vector<20x1xf32> to vector<20x20xf32>
    %305 = arith.divf %301, %304 : vector<20x20xf32>
    %306 = vector.extract_strided_slice %233 {offsets = [0, 48], sizes = [20, 16], strides = [1, 1]} : vector<20x64xf32> to vector<20x16xf32>
    %307 = arith.truncf %305 : vector<20x20xf32> to vector<20x20xbf16>
    %308 = arith.truncf %306 : vector<20x16xf32> to vector<20x16xbf16>
    %cst_126 = arith.constant dense<0.000000e+00> : vector<20x16xf32>
    %309 = tpu.matmul %307, %308, %cst_126 {dimension_numbers = #tpu.dot_dimension_numbers<[1], [0], [0], [1], [0, 0, 1, 1], [], []>} : vector<20x20xbf16>, vector<20x16xbf16>, vector<20x16xf32> -> vector<20x16xf32>
    %310 = tpu.concatenate %252, %271, %290, %309 in 1 : vector<20x16xf32>, vector<20x16xf32>, vector<20x16xf32>, vector<20x16xf32> -> vector<20x64xf32>
    %c1_127 = arith.constant 1 : index
    %c0_128 = arith.constant 0 : index
    %c0_129 = arith.constant 0 : index
    %311 = vector.load %arg13[%c1_127, %c0_128, %c0_129] : memref<2x64x64xbf16, #tpu.memory_space<vmem>>, vector<1x64x64xbf16>
    %312 = vector.shape_cast %311 : vector<1x64x64xbf16> to vector<64x64xbf16>
    %313 = arith.truncf %310 : vector<20x64xf32> to vector<20x64xbf16>
    %cst_130 = arith.constant dense<0.000000e+00> : vector<20x64xf32>
    %314 = tpu.matmul %313, %312, %cst_130 {dimension_numbers = #tpu.dot_dimension_numbers<[1], [0], [0], [1], [0, 0, 1, 1], [], []>} : vector<20x64xbf16>, vector<64x64xbf16>, vector<20x64xf32> -> vector<20x64xf32>
    %315 = arith.addf %188, %314 : vector<20x64xf32>
    %c1_131 = arith.constant 1 : index
    %c0_132 = arith.constant 0 : index
    %316 = vector.load %arg14[%c1_131, %c0_132] : memref<2x64xf32, #tpu.memory_space<vmem>>, vector<1x64xf32>
    %317 = vector.broadcast %316 : vector<1x64xf32> to vector<20x64xf32>
    %318 = arith.addf %315, %317 : vector<20x64xf32>
    %c1_133 = arith.constant 1 : index
    %c0_134 = arith.constant 0 : index
    %319 = vector.load %arg15[%c1_133, %c0_134] : memref<2x64xf32, #tpu.memory_space<vmem>>, vector<1x64xf32>
    %c1_135 = arith.constant 1 : index
    %c0_136 = arith.constant 0 : index
    %320 = vector.load %arg16[%c1_135, %c0_136] : memref<2x64xf32, #tpu.memory_space<vmem>>, vector<1x64xf32>
    %cst_137 = arith.constant dense<0.000000e+00> : vector<20xf32>
    %321 = vector.multi_reduction <add>, %318, %cst_137 [1] : vector<20x64xf32> to vector<20xf32>
    %322 = vector.shape_cast %321 : vector<20xf32> to vector<20x1xf32>
    %cst_138 = arith.constant 6.400000e+01 : f32
    %323 = vector.broadcast %cst_138 : f32 to vector<20x1xf32>
    %324 = arith.divf %322, %323 : vector<20x1xf32>
    %325 = vector.broadcast %324 : vector<20x1xf32> to vector<20x64xf32>
    %326 = arith.subf %318, %325 : vector<20x64xf32>
    %327 = arith.mulf %326, %326 : vector<20x64xf32>
    %cst_139 = arith.constant dense<0.000000e+00> : vector<20xf32>
    %328 = vector.multi_reduction <add>, %327, %cst_139 [1] : vector<20x64xf32> to vector<20xf32>
    %329 = vector.shape_cast %328 : vector<20xf32> to vector<20x1xf32>
    %cst_140 = arith.constant 6.400000e+01 : f32
    %330 = vector.broadcast %cst_140 : f32 to vector<20x1xf32>
    %331 = arith.divf %329, %330 : vector<20x1xf32>
    %cst_141 = arith.constant 9.99999997E-7 : f32
    %332 = vector.broadcast %cst_141 : f32 to vector<20x1xf32>
    %333 = arith.addf %331, %332 : vector<20x1xf32>
    %334 = math.rsqrt %333 : vector<20x1xf32>
    %335 = vector.broadcast %334 : vector<20x1xf32> to vector<20x64xf32>
    %336 = arith.mulf %326, %335 : vector<20x64xf32>
    %337 = vector.broadcast %319 : vector<1x64xf32> to vector<20x64xf32>
    %338 = arith.mulf %336, %337 : vector<20x64xf32>
    %339 = vector.broadcast %320 : vector<1x64xf32> to vector<20x64xf32>
    %340 = arith.addf %338, %339 : vector<20x64xf32>
    %c1_142 = arith.constant 1 : index
    %c0_143 = arith.constant 0 : index
    %c0_144 = arith.constant 0 : index
    %341 = vector.load %arg17[%c1_142, %c0_143, %c0_144] : memref<2x64x256xbf16, #tpu.memory_space<vmem>>, vector<1x64x256xbf16>
    %342 = vector.shape_cast %341 : vector<1x64x256xbf16> to vector<64x256xbf16>
    %343 = arith.truncf %340 : vector<20x64xf32> to vector<20x64xbf16>
    %cst_145 = arith.constant dense<0.000000e+00> : vector<20x256xf32>
    %344 = tpu.matmul %343, %342, %cst_145 {dimension_numbers = #tpu.dot_dimension_numbers<[1], [0], [0], [1], [0, 0, 1, 1], [], []>} : vector<20x64xbf16>, vector<64x256xbf16>, vector<20x256xf32> -> vector<20x256xf32>
    %c1_146 = arith.constant 1 : index
    %c0_147 = arith.constant 0 : index
    %345 = vector.load %arg18[%c1_146, %c0_147] : memref<2x256xf32, #tpu.memory_space<vmem>>, vector<1x256xf32>
    %346 = vector.broadcast %345 : vector<1x256xf32> to vector<20x256xf32>
    %347 = arith.addf %344, %346 : vector<20x256xf32>
    %348 = arith.mulf %347, %347 : vector<20x256xf32>
    %349 = arith.mulf %347, %348 : vector<20x256xf32>
    %cst_148 = arith.constant 4.471500e-02 : f32
    %350 = vector.broadcast %cst_148 : f32 to vector<20x256xf32>
    %351 = arith.mulf %350, %349 : vector<20x256xf32>
    %352 = arith.addf %347, %351 : vector<20x256xf32>
    %cst_149 = arith.constant 0.797884583 : f32
    %353 = vector.broadcast %cst_149 : f32 to vector<20x256xf32>
    %354 = arith.mulf %353, %352 : vector<20x256xf32>
    %355 = math.tanh %354 : vector<20x256xf32>
    %cst_150 = arith.constant 1.000000e+00 : f32
    %356 = vector.broadcast %cst_150 : f32 to vector<20x256xf32>
    %357 = arith.addf %356, %355 : vector<20x256xf32>
    %cst_151 = arith.constant 5.000000e-01 : f32
    %358 = vector.broadcast %cst_151 : f32 to vector<20x256xf32>
    %359 = arith.mulf %358, %357 : vector<20x256xf32>
    %360 = arith.mulf %347, %359 : vector<20x256xf32>
    %c1_152 = arith.constant 1 : index
    %c0_153 = arith.constant 0 : index
    %c0_154 = arith.constant 0 : index
    %361 = vector.load %arg19[%c1_152, %c0_153, %c0_154] : memref<2x256x64xbf16, #tpu.memory_space<vmem>>, vector<1x256x64xbf16>
    %362 = vector.shape_cast %361 : vector<1x256x64xbf16> to vector<256x64xbf16>
    %363 = arith.truncf %360 : vector<20x256xf32> to vector<20x256xbf16>
    %cst_155 = arith.constant dense<0.000000e+00> : vector<20x64xf32>
    %364 = tpu.matmul %363, %362, %cst_155 {dimension_numbers = #tpu.dot_dimension_numbers<[1], [0], [0], [1], [0, 0, 1, 1], [], []>} : vector<20x256xbf16>, vector<256x64xbf16>, vector<20x64xf32> -> vector<20x64xf32>
    %365 = arith.addf %318, %364 : vector<20x64xf32>
    %c1_156 = arith.constant 1 : index
    %c0_157 = arith.constant 0 : index
    %366 = vector.load %arg20[%c1_156, %c0_157] : memref<2x64xf32, #tpu.memory_space<vmem>>, vector<1x64xf32>
    %367 = vector.broadcast %366 : vector<1x64xf32> to vector<20x64xf32>
    %368 = arith.addf %365, %367 : vector<20x64xf32>
    %369 = vector.extract_strided_slice %368 {offsets = [0, 0], sizes = [1, 64], strides = [1, 1]} : vector<20x64xf32> to vector<1x64xf32>
    %370 = vector.extract_strided_slice %368 {offsets = [10, 0], sizes = [1, 64], strides = [1, 1]} : vector<20x64xf32> to vector<1x64xf32>
    %371 = tpu.concatenate %369, %370 in 0 : vector<1x64xf32>, vector<1x64xf32> -> vector<2x64xf32>
    %372 = vector.extract_strided_slice %368 {offsets = [1, 0], sizes = [1, 64], strides = [1, 1]} : vector<20x64xf32> to vector<1x64xf32>
    %373 = vector.extract_strided_slice %368 {offsets = [11, 0], sizes = [1, 64], strides = [1, 1]} : vector<20x64xf32> to vector<1x64xf32>
    %374 = tpu.concatenate %372, %373 in 0 : vector<1x64xf32>, vector<1x64xf32> -> vector<2x64xf32>
    %c0_158 = arith.constant 0 : index
    %c0_159 = arith.constant 0 : index
    %375 = vector.load %arg21[%c0_158, %c0_159] : memref<1x64xf32, #tpu.memory_space<vmem>>, vector<1x64xf32>
    %c0_160 = arith.constant 0 : index
    %c0_161 = arith.constant 0 : index
    %376 = vector.load %arg22[%c0_160, %c0_161] : memref<1x64xf32, #tpu.memory_space<vmem>>, vector<1x64xf32>
    %cst_162 = arith.constant dense<0.000000e+00> : vector<2xf32>
    %377 = vector.multi_reduction <add>, %371, %cst_162 [1] : vector<2x64xf32> to vector<2xf32>
    %378 = vector.shape_cast %377 : vector<2xf32> to vector<2x1xf32>
    %cst_163 = arith.constant 6.400000e+01 : f32
    %379 = vector.broadcast %cst_163 : f32 to vector<2x1xf32>
    %380 = arith.divf %378, %379 : vector<2x1xf32>
    %381 = vector.broadcast %380 : vector<2x1xf32> to vector<2x64xf32>
    %382 = arith.subf %371, %381 : vector<2x64xf32>
    %383 = arith.mulf %382, %382 : vector<2x64xf32>
    %cst_164 = arith.constant dense<0.000000e+00> : vector<2xf32>
    %384 = vector.multi_reduction <add>, %383, %cst_164 [1] : vector<2x64xf32> to vector<2xf32>
    %385 = vector.shape_cast %384 : vector<2xf32> to vector<2x1xf32>
    %cst_165 = arith.constant 6.400000e+01 : f32
    %386 = vector.broadcast %cst_165 : f32 to vector<2x1xf32>
    %387 = arith.divf %385, %386 : vector<2x1xf32>
    %cst_166 = arith.constant 9.99999997E-7 : f32
    %388 = vector.broadcast %cst_166 : f32 to vector<2x1xf32>
    %389 = arith.addf %387, %388 : vector<2x1xf32>
    %390 = math.rsqrt %389 : vector<2x1xf32>
    %391 = vector.broadcast %390 : vector<2x1xf32> to vector<2x64xf32>
    %392 = arith.mulf %382, %391 : vector<2x64xf32>
    %393 = vector.broadcast %375 : vector<1x64xf32> to vector<2x64xf32>
    %394 = arith.mulf %392, %393 : vector<2x64xf32>
    %395 = vector.broadcast %376 : vector<1x64xf32> to vector<2x64xf32>
    %396 = arith.addf %394, %395 : vector<2x64xf32>
    %c0_167 = arith.constant 0 : index
    %c0_168 = arith.constant 0 : index
    %397 = vector.load %arg21[%c0_167, %c0_168] : memref<1x64xf32, #tpu.memory_space<vmem>>, vector<1x64xf32>
    %c0_169 = arith.constant 0 : index
    %c0_170 = arith.constant 0 : index
    %398 = vector.load %arg22[%c0_169, %c0_170] : memref<1x64xf32, #tpu.memory_space<vmem>>, vector<1x64xf32>
    %cst_171 = arith.constant dense<0.000000e+00> : vector<2xf32>
    %399 = vector.multi_reduction <add>, %374, %cst_171 [1] : vector<2x64xf32> to vector<2xf32>
    %400 = vector.shape_cast %399 : vector<2xf32> to vector<2x1xf32>
    %cst_172 = arith.constant 6.400000e+01 : f32
    %401 = vector.broadcast %cst_172 : f32 to vector<2x1xf32>
    %402 = arith.divf %400, %401 : vector<2x1xf32>
    %403 = vector.broadcast %402 : vector<2x1xf32> to vector<2x64xf32>
    %404 = arith.subf %374, %403 : vector<2x64xf32>
    %405 = arith.mulf %404, %404 : vector<2x64xf32>
    %cst_173 = arith.constant dense<0.000000e+00> : vector<2xf32>
    %406 = vector.multi_reduction <add>, %405, %cst_173 [1] : vector<2x64xf32> to vector<2xf32>
    %407 = vector.shape_cast %406 : vector<2xf32> to vector<2x1xf32>
    %cst_174 = arith.constant 6.400000e+01 : f32
    %408 = vector.broadcast %cst_174 : f32 to vector<2x1xf32>
    %409 = arith.divf %407, %408 : vector<2x1xf32>
    %cst_175 = arith.constant 9.99999997E-7 : f32
    %410 = vector.broadcast %cst_175 : f32 to vector<2x1xf32>
    %411 = arith.addf %409, %410 : vector<2x1xf32>
    %412 = math.rsqrt %411 : vector<2x1xf32>
    %413 = vector.broadcast %412 : vector<2x1xf32> to vector<2x64xf32>
    %414 = arith.mulf %404, %413 : vector<2x64xf32>
    %415 = vector.broadcast %397 : vector<1x64xf32> to vector<2x64xf32>
    %416 = arith.mulf %414, %415 : vector<2x64xf32>
    %417 = vector.broadcast %398 : vector<1x64xf32> to vector<2x64xf32>
    %418 = arith.addf %416, %417 : vector<2x64xf32>
    %419 = arith.addf %396, %418 : vector<2x64xf32>
    %cst_176 = arith.constant 5.000000e-01 : f32
    %420 = vector.broadcast %cst_176 : f32 to vector<2x64xf32>
    %421 = arith.mulf %419, %420 : vector<2x64xf32>
    %c0_177 = arith.constant 0 : index
    %c0_178 = arith.constant 0 : index
    %422 = vector.load %arg23[%c0_177, %c0_178] : memref<64x9xf32, #tpu.memory_space<vmem>>, vector<64x9xf32>
    %423 = arith.truncf %421 : vector<2x64xf32> to vector<2x64xbf16>
    %424 = arith.truncf %422 : vector<64x9xf32> to vector<64x9xbf16>
    %cst_179 = arith.constant dense<0.000000e+00> : vector<2x9xf32>
    %425 = tpu.matmul %423, %424, %cst_179 {dimension_numbers = #tpu.dot_dimension_numbers<[1], [0], [0], [1], [0, 0, 1, 1], [], []>} : vector<2x64xbf16>, vector<64x9xbf16>, vector<2x9xf32> -> vector<2x9xf32>
    %c0_180 = arith.constant 0 : index
    %c0_181 = arith.constant 0 : index
    %426 = vector.load %arg24[%c0_180, %c0_181] : memref<1x9xf32, #tpu.memory_space<vmem>>, vector<1x9xf32>
    %427 = vector.broadcast %426 : vector<1x9xf32> to vector<2x9xf32>
    %428 = arith.addf %425, %427 : vector<2x9xf32>
    %429 = math.tanh %428 : vector<2x9xf32>
    %c0_182 = arith.constant 0 : index
    %c0_183 = arith.constant 0 : index
    %430 = vector.load %arg25[%c0_182, %c0_183] : memref<2x9xf32, #tpu.memory_space<vmem>>, vector<2x9xf32>
    tpu.vector_store %arg25[%c0_182, %c0_183], %429 {strides = array<i32>} : memref<2x9xf32, #tpu.memory_space<vmem>>, vector<2x9xf32>,
    return
  }
}

</mosaic_0001>

<bundles_post_ra>
// kernel: tile.19
= control target key start
LH: loop header
LB: loop body
LE: loop exit
PB: predicated region body
PF: predicated region fallthrough
CT: control target
= control target key end

     0   :  { %vm3_vm0 = vcmask 523264   ;;  %s60_s0 = inlined_call_operand.vmem [shape: f32[2,10,64], index: 0, kind: input, shape index: {}]   ;;  %s61_s1 = inlined_call_operand.vmem [shape: f32[20,64], index: 1, kind: output, shape index: {}]  }
   0x1   :  { %v2_v0 = vld [vmem:[%s60_s0] sm:$0xff]   ;;  %v20_v1 = vld [vmem:[%s60_s0 + $0x8] sm:$0x3]   ;;  %v22_v2 = vld [vmem:[%s60_s0 + $0x10] sm:$0xff]  }
   0x2   :  { %4 = vst.msk [vmem:[%s61_s1] sm:$0xff] %vm3_vm0, %v2_v0   ;;  %21 = vst.msk [vmem:[%s61_s1 + $0x8] sm:$0x3] %vm3_vm0, %v20_v1   ;;  %v24_v3 = vld [vmem:[%s60_s0 + $0x18] sm:$0x3]  }
   0x3   :  { %23 = vst.msk [vmem:[%s61_s1 + $0xa] sm:$0xff] %vm3_vm0, %v22_v2   ;;  %25 = vst.msk [vmem:[%s61_s1 + $0x12] sm:$0x3] %vm3_vm0, %v24_v3  }

// kernel: eq.8
= control target key start
LH: loop header
LB: loop body
LE: loop exit
PB: predicated region body
PF: predicated region fallthrough
CT: control target
= control target key end

     0   :  { %vm7_vm0 = vcmask 80896   ;;  %vm13_vm1 = vcmask 162896   ;;  %s39_s0 = inlined_call_operand.vmem [shape: s32[2,10], index: 0, kind: input, shape index: {}]   ;;  %s40_s1 = inlined_call_operand.vmem [shape: s32[20], index: 1, kind: output, shape index: {}]  }
   0x1   :  { %v4_v0 = vld [vmem:[%s39_s0] sm:$0x3]  ;;  %s22_s0 = smov 10  }
   0x2   :  { %5 = vst [vmem:[#allocation1] sm:$0x3] %v4_v0 }
   0x9   :  { %v10_v1 = vld [vmem:[#allocation1 + $0x1] sm:$0x1]   ;;  %v6_v2 = vld [vmem:[#allocation1] sm:$0x1]  }
   0xa   :  { %11 = vrot.lane.b32.xlu0 %v10_v1, %s22_s0  ;;  %8 = vst.msk [vmem:[#allocation0] sm:$0x1] %vm7_vm0, %v6_v2  }
  0x7c   :  { %v12_v3 = vpop.permute.xlu0 %11  }
  0x7d   :  { %14 = vst.msk [vmem:[#allocation0] sm:$0x1] %vm13_vm1, %v12_v3  }
  0x84   :  { %v18_v4 = vld [vmem:[#allocation0] sm:$0x1] }
  0x85   :  { %20 = vst [vmem:[%s40_s1] sm:$0x1] %v18_v4 }

// kernel: _lambda_.1
= control target key start
LH: loop header
LB: loop body
LE: loop exit
PB: predicated region body
PF: predicated region fallthrough
CT: control target
= control target key end

     0   :  { %s5958_s0 = inlined_call_operand.vmem [shape: f32[20,512], index: 0, kind: input, shape index: {}]   ;;  %s5959_s1 = inlined_call_operand.vmem [shape: f32[20,512], index: 1, kind: input, shape index: {}]   ;;  %s5960_s2 = inlined_call_operand.vmem [shape: bf16[512,64], index: 2, kind: input, shape index: {}]   ;;  %s5961_s3 = inlined_call_operand.vmem [shape: f32[20,64], index: 3, kind: input, shape index: {}]   ;;  %s5962_s4 = inlined_call_operand.vmem [shape: f32[20,20], index: 4, kind: input, shape index: {}]   ;;  %s5963_s5 = inlined_call_operand.vmem [shape: f32[2,64], index: 5, kind: input, shape index: {}]   ;;  %s5964_s6 = inlined_call_operand.vmem [shape: f32[2,64], index: 6, kind: input, shape index: {}]   ;;  %s5965_s7 = inlined_call_operand.vmem [shape: bf16[2,64,64], index: 7, kind: input, shape index: {}]   ;;  %s5966_s8 = inlined_call_operand.vmem [shape: f32[2,64], index: 8, kind: input, shape index: {}]   ;;  %s5967_s9 = inlined_call_operand.vmem [shape: bf16[2,64,64], index: 9, kind: input, shape index: {}]   ;;  %s5968_s10 = inlined_call_operand.vmem [shape: f32[2,64], index: 10, kind: input, shape index: {}]   ;;  %s5969_s11 = inlined_call_operand.vmem [shape: bf16[2,64,64], index: 11, kind: input, shape index: {}]   ;;  %s5970_s12 = inlined_call_operand.vmem [shape: f32[2,64], index: 12, kind: input, shape index: {}]   ;;  %s5971_s13 = inlined_call_operand.vmem [shape: bf16[2,64,64], index: 13, kind: input, shape index: {}]   ;;  %s5972_s14 = inlined_call_operand.vmem [shape: f32[2,64], index: 14, kind: input, shape index: {}]   ;;  %s5973_s15 = inlined_call_operand.vmem [shape: f32[2,64], index: 15, kind: input, shape index: {}]   ;;  %s5974_s16 = inlined_call_operand.vmem [shape: f32[2,64], index: 16, kind: input, shape index: {}]   ;;  %s5975_s17 = inlined_call_operand.vmem [shape: bf16[2,64,256], index: 17, kind: input, shape index: {}]   ;;  %s5976_s18 = inlined_call_operand.vmem [shape: f32[2,256], index: 18, kind: input, shape index: {}]   ;;  %s5977_s19 = inlined_call_operand.vmem [shape: bf16[2,256,64], index: 19, kind: input, shape index: {}]   ;;  %s5978_s20 = inlined_call_operand.vmem [shape: f32[2,64], index: 20, kind: input, shape index: {}]   ;;  %s5979_s21 = inlined_call_operand.vmem [shape: f32[1,64], index: 21, kind: input, shape index: {}]   ;;  %s5980_s22 = inlined_call_operand.vmem [shape: f32[1,64], index: 22, kind: input, shape index: {}]   ;;  %s5981_s23 = inlined_call_operand.vmem [shape: f32[64,9], index: 23, kind: input, shape index: {}]   ;;  %s5982_s24 = inlined_call_operand.vmem [shape: f32[1,9], index: 24, kind: input, shape index: {}]   ;;  %s5983_s25 = inlined_call_operand.hbm [shape: f32[2,9], index: 25, kind: output, shape index: {}]  }
   0x1   :  { %6007 = sst [smem:[#allocation5_spill]] %s5958_s0 }
   0x2   :  { %6008 = sst [smem:[#allocation6_spill]] %s5959_s1 }
   0x3   :  { %6009 = sst [smem:[#allocation7_spill]] %s5960_s2 }
   0x4   :  { %6010 = sst [smem:[#allocation8_spill]] %s5961_s3 }
   0x5   :  { %6011 = sst [smem:[#allocation9_spill]] %s5962_s4 }
   0x6   :  { %6012 = sst [smem:[#allocation10_spill]] %s5963_s5 }
   0x7   :  { %6013 = sst [smem:[#allocation11_spill]] %s5964_s6 }
   0x8   :  { %6014 = sst [smem:[#allocation12_spill]] %s5965_s7 }
   0x9   :  { %6015 = sst [smem:[#allocation13_spill]] %s5966_s8 }
   0xa   :  { %6016 = sst [smem:[#allocation14_spill]] %s5967_s9 }
   0xb   :  { %6017 = sst [smem:[#allocation15_spill]] %s5983_s25 }
   0xc   :  { %s6018_s6 = sld [smem:[#allocation7_spill]]  ;;  %s6019_s28 = sld [smem:[#allocation5_spill]] }
   0xd   :  { %s6020_s2 = sld [smem:[#allocation6_spill]] }
  0x12   :  { %v4509_v0 = vld [vmem:[%s6018_s6 + $0x40] sm:$0xff]   ;;  %v4513_v4 = vld [vmem:[%s6018_s6 + $0x48] sm:$0xff]   ;;  %v4517_v8 = vld [vmem:[%s6018_s6 + $0x50] sm:$0xff]  }
  0x13   :  { %v4510_v1 = vld [vmem:[%s6018_s6 + $0xc0] sm:$0xff]   ;;  %3980 = vmatprep.subr.bf16.mxu0 %v4509_v0  ;;  %v4514_v5 = vld [vmem:[%s6018_s6 + $0xc8] sm:$0xff]   ;;  %v4518_v9 = vld [vmem:[%s6018_s6 + $0xd0] sm:$0xff]  }
  0x14   :  { %v4511_v2 = vld [vmem:[%s6018_s6] sm:$0xff]   ;;  %4008 = vmatprep.subr.bf16.mxu1 %v4510_v1  ;;  %v4515_v6 = vld [vmem:[%s6018_s6 + $0x8] sm:$0xff]   ;;  %v4519_v10 = vld [vmem:[%s6018_s6 + $0x10] sm:$0xff]  }
  0x15   :  { %v4512_v3 = vld [vmem:[%s6018_s6 + $0x80] sm:$0xff]   ;;  %3981 = vmatpush3.bf16.msra.mxu0 %v4511_v2  ;;  %v4516_v7 = vld [vmem:[%s6018_s6 + $0x88] sm:$0xff]   ;;  %v4520_v11 = vld [vmem:[%s6018_s6 + $0x90] sm:$0xff]  }
  0x16   :  { %4009 = vmatpush3.bf16.msra.mxu1 %v4512_v3  ;;  %3982 = vmatprep.subr.bf16.mxu0 %v4513_v4  ;;  %v4521_v12 = vld [vmem:[%s6018_s6 + $0x58] sm:$0xff]   ;;  %v4525_v16 = vld [vmem:[%s6018_s6 + $0x60] sm:$0xff]   ;;  %v4529_v20 = vld [vmem:[%s6018_s6 + $0x68] sm:$0xff]  }
  0x17   :  { %4010 = vmatprep.subr.bf16.mxu1 %v4514_v5  ;;  %v4522_v13 = vld [vmem:[%s6018_s6 + $0xd8] sm:$0xff]   ;;  %v4526_v17 = vld [vmem:[%s6018_s6 + $0xe0] sm:$0xff]   ;;  %v4530_v21 = vld [vmem:[%s6018_s6 + $0xe8] sm:$0xff]  }
  0x18   :  { %v4523_v14 = vld [vmem:[%s6018_s6 + $0x18] sm:$0xff]   ;;  %v4527_v18 = vld [vmem:[%s6018_s6 + $0x20] sm:$0xff]   ;;  %v4531_v22 = vld [vmem:[%s6018_s6 + $0x28] sm:$0xff]  }
  0x19   :  { %3983 = vmatpush3.bf16.msra.mxu0 %v4515_v6  ;;  %v4524_v15 = vld [vmem:[%s6018_s6 + $0x98] sm:$0xff]   ;;  %v4528_v19 = vld [vmem:[%s6018_s6 + $0xa0] sm:$0xff]   ;;  %v4532_v23 = vld [vmem:[%s6018_s6 + $0xa8] sm:$0xff]  }
  0x1a   :  { %4011 = vmatpush3.bf16.msra.mxu1 %v4516_v7  ;;  %3984 = vmatprep.subr.bf16.mxu0 %v4517_v8  ;;  %v4533_v24 = vld [vmem:[%s6018_s6 + $0x70] sm:$0xff]   ;;  %v4537_v28 = vld [vmem:[%s6018_s6 + $0x78] sm:$0xff]   ;;  %v83_v32 = vld [vmem:[%s6019_s28 + $0x8] sm:$0xff] }
  0x1b   :  { %4012 = vmatprep.subr.bf16.mxu1 %v4518_v9  ;;  %v4534_v25 = vld [vmem:[%s6018_s6 + $0xf0] sm:$0xff]   ;;  %v4538_v29 = vld [vmem:[%s6018_s6 + $0xf8] sm:$0xff]   ;;  %v87_v33 = vld [vmem:[%s6019_s28 + $0x28] sm:$0xff] }
  0x1c   :  { %v4535_v26 = vld [vmem:[%s6018_s6 + $0x30] sm:$0xff]   ;;  %v4539_v30 = vld [vmem:[%s6018_s6 + $0x38] sm:$0xff]   ;;  %v95_v34 = vld [vmem:[%s6020_s2 + $0x8] sm:$0xff] }
  0x1d   :  { %3985 = vmatpush3.bf16.msra.mxu0 %v4519_v10  ;;  %v4536_v27 = vld [vmem:[%s6018_s6 + $0xb0] sm:$0xff]   ;;  %v4540_v31 = vld [vmem:[%s6018_s6 + $0xb8] sm:$0xff]   ;;  %v99_v35 = vld [vmem:[%s6020_s2 + $0x28] sm:$0xff]  ;;  %v107_v36 = vmul.f32 %v95_v34, %v83_v32 }
  0x1e   :  { %4013 = vmatpush3.bf16.msra.mxu1 %v4520_v11  ;;  %3986 = vmatprep.subr.bf16.mxu0 %v4521_v12  ;;  %v85_v37 = vld [vmem:[%s6019_s28 + $0x18] sm:$0xff]  ;;  %v111_v39 = vmul.f32 %v99_v35, %v87_v33  ;;  %v82_v42 = vld [vmem:[%s6019_s28] sm:$0xff]  ;;  %v84_v51 = vld [vmem:[%s6019_s28 + $0x10] sm:$0xff] }
  0x1f   :  { %4014 = vmatprep.subr.bf16.mxu1 %v4522_v13  ;;  %v89_v38 = vld [vmem:[%s6019_s28 + $0x38] sm:$0xff]  ;;  %v86_v45 = vld [vmem:[%s6019_s28 + $0x20] sm:$0xff]  ;;  %v88_v52 = vld [vmem:[%s6019_s28 + $0x30] sm:$0xff] }
  0x20   :  { %v97_v40 = vld [vmem:[%s6020_s2 + $0x18] sm:$0xff]  ;;  %v94_v46 = vld [vmem:[%s6020_s2] sm:$0xff]  ;;  %v183_v48 = vpack.c.bf16 %v111_v39, %v107_v36  ;;  %v96_v53 = vld [vmem:[%s6020_s2 + $0x10] sm:$0xff] }
  0x21   :  { %3987 = vmatpush3.bf16.msra.mxu0 %v4523_v14  ;;  %v101_v41 = vld [vmem:[%s6020_s2 + $0x38] sm:$0xff]  ;;  %v109_v43 = vmul.f32 %v97_v40, %v85_v37  ;;  %v98_v47 = vld [vmem:[%s6020_s2 + $0x20] sm:$0xff]  ;;  %v106_v49 = vmul.f32 %v94_v46, %v82_v42  ;;  %v100_v55 = vld [vmem:[%s6020_s2 + $0x30] sm:$0xff]  ;;  %v108_v56 = vmul.f32 %v96_v53, %v84_v51 }
  0x22   :  { %4015 = vmatpush3.bf16.msra.mxu1 %v4524_v15  ;;  %3988 = vmatprep.subr.bf16.mxu0 %v4525_v16  ;;  %v113_v44 = vmul.f32 %v101_v41, %v89_v38  ;;  %v110_v50 = vmul.f32 %v98_v47, %v86_v45  ;;  %v91_v57 = vld [vmem:[%s6019_s28 + $0x48] sm:$0xf]  ;;  %v112_v60 = vmul.f32 %v100_v55, %v88_v52  ;;  %v93_v62 = vld [vmem:[%s6019_s28 + $0x58] sm:$0xf]  ;;  %v90_v0 = vld [vmem:[%s6019_s28 + $0x40] sm:$0xf] }
  0x23   :  { %4016 = vmatprep.subr.bf16.mxu1 %v4526_v17  ;;  %v103_v58 = vld [vmem:[%s6020_s2 + $0x48] sm:$0xf]  ;;  %417 = vmatprep.mubr.bf16.mxu0 %v183_v48  ;;  %v105_v63 = vld [vmem:[%s6020_s2 + $0x58] sm:$0xf]  ;;  %v102_v2 = vld [vmem:[%s6020_s2 + $0x40] sm:$0xf] }
  0x24   :  { %v185_v54 = vpack.c.bf16 %v113_v44, %v109_v43  ;;  %v182_v59 = vpack.c.bf16 %v110_v50, %v106_v49  ;;  %v115_v61 = vmul.f32 %v103_v58, %v91_v57  ;;  %v117_v1 = vmul.f32 %v105_v63, %v93_v62  ;;  %v92_v3 = vld [vmem:[%s6019_s28 + $0x50] sm:$0xf] }
  0x25   :  { %3989 = vmatpush3.bf16.msra.mxu0 %v4527_v18  ;;  %v104_v4 = vld [vmem:[%s6020_s2 + $0x50] sm:$0xf]  ;;  %v184_v5 = vpack.c.bf16 %v112_v60, %v108_v56  ;;  %v114_v7 = vmul.f32 %v102_v2, %v90_v0 }
  0x26   :  { %4017 = vmatpush3.bf16.msra.mxu1 %v4528_v19  ;;  %3990 = vmatprep.subr.bf16.mxu0 %v4529_v20  ;;  %v187_v6 = vpack.c.bf16 %v115_v61, %v115_v61  ;;  %v189_v8 = vpack.c.bf16 %v117_v1, %v117_v1  ;;  %v116_v9 = vmul.f32 %v104_v4, %v92_v3 }
  0x27   :  { %4018 = vmatprep.subr.bf16.mxu1 %v4530_v21  ;;  %465 = vmatprep.mubr.bf16.mxu1 %v185_v54  ;;  %v186_v10 = vpack.c.bf16 %v114_v7, %v114_v7 }
  0x28   :  { %v188_v11 = vpack.c.bf16 %v116_v9, %v116_v9 }
  0x29   :  { %3991 = vmatpush3.bf16.msra.mxu0 %v4531_v22 }
  0x2a   :  { %4019 = vmatpush3.bf16.msra.mxu1 %v4532_v23  ;;  %3992 = vmatprep.subr.bf16.mxu0 %v4533_v24 }
  0x2b   :  { %4020 = vmatprep.subr.bf16.mxu1 %v4534_v25 }
  0x2d   :  { %3993 = vmatpush3.bf16.msra.mxu0 %v4535_v26 }
  0x2e   :  { %4021 = vmatpush3.bf16.msra.mxu1 %v4536_v27  ;;  %3994 = vmatprep.subr.bf16.mxu0 %v4537_v28 }
  0x2f   :  { %4022 = vmatprep.subr.bf16.mxu1 %v4538_v29 }
  0x31   :  { %3995 = vmatpush3.bf16.msra.mxu0 %v4539_v30 }
  0x32   :  { %4023 = vmatpush3.bf16.msra.mxu1 %v4540_v31 }
  0x34   :  { %418 = vmatmul.mubr.bf16.vlgmr.msra.gmra.mrb[0].mxu0 %v182_v59 }
  0x35   :  { %466 = vmatmul.mubr.bf16.vlgmr.msra.gmra.mrb[0].mxu1 %v184_v5  ;;  %425 = vmatprep.mubr.bf16.mxu0 %v187_v6 }
  0x36   :  { %473 = vmatprep.mubr.bf16.mxu1 %v189_v8 }
  0x3c   :  { %426 = vmatmul.mubr.bf16.gmra.mrb[4].mxu0 %v186_v10 }
  0x3d   :  { %474 = vmatmul.mubr.bf16.gmra.mrb[4].mxu1 %v188_v11 }
  0x3e   :  { %30 = vsyncpa [#allocation3], 0  ;;  %s6021_s26 = sld [smem:[#allocation8_spill]]  ;;  %vm486_vm0 = vcmask 523264   ;;  %vm493_vm1 = vcmask 519168   ;;  %s6022_s5 = sld [smem:[#allocation12_spill]] }
  0x3f   :  { %v4542_v62 = vld [vmem:[%s5969_s11] sm:$0xff]   ;;  %v4544_v0 = vld [vmem:[%s5969_s11 + $0x8] sm:$0xff]   ;;  %v4546_v2 = vld [vmem:[%s5969_s11 + $0x10] sm:$0xff]   ;;  %s6023_s30 = sld [smem:[#allocation14_spill]]  ;;  %s6024_s28 = sld [smem:[#allocation10_spill]]  ;;  %vm812_vm2 = vcmask 130048  }
  0x40   :  { %4233 = vmatprep.subr.bf16.mxu0 %v4542_v62  ;;  %v4548_v4 = vld [vmem:[%s5969_s11 + $0x18] sm:$0xff]   ;;  %s6025_s2 = sld [smem:[#allocation11_spill]]  ;;  %s6026_s6 = sld [smem:[#allocation13_spill]]  ;;  %vm918_vm3 = vcmask 1041408   ;;  %vm873_vm4 = vcmask 162816   ;;  %vm880_vm5 = vcmask 158720  }
  0x41   :  { %4234 = vmatpush3.bf16.msra.mxu0 %v4542_v62  ;;  %s6004_s27 = smov 112   ;;  %s6027_s0 = sld [smem:[#allocation9_spill]]  ;;  %vm1510_vm6 = vcmask 261120   ;;  %vm1514_vm7 = vcmask 392192   ;;  %vm3586_vm8 = vcmask 1040384   ;;  %vm3596_vm9 = vcmask 517120  }
  0x42   :  { %4235 = vmatprep.subr.bf16.mxu0 %v4544_v0  ;;  %s6000_s1 = smov 96   ;;  %s5998_s8 = smov 80   ;;  %vm4814_vm10 = vmmov 0   ;;  %vm3705_vm11 = vcmask 66560  }
  0x43   :  { %s5996_s4 = smov 16   ;;  %s5994_s9 = smov 32  }
  0x44   :  { %v190_v13 = vld [vmem:[%s6021_s26] sm:$0xff]  ;;  %v191_v19 = vld [vmem:[%s6021_s26 + $0x8] sm:$0xff]  ;;  %v192_v32 = vld [vmem:[%s6021_s26 + $0x10] sm:$0xf]  ;;  %s6002_s29 = smov 48   ;;  %s6030_s25 = smov 80  }
  0x45   :  { %v4541_v61 = vld [vmem:[%s6022_s5] sm:$0xff]   ;;  %v4543_v63 = vld [vmem:[%s6022_s5 + $0x8] sm:$0xff]   ;;  %4236 = vmatpush3.bf16.msra.mxu0 %v4544_v0  ;;  %v4545_v1 = vld [vmem:[%s6022_s5 + $0x10] sm:$0xff]  }
  0x46   :  { %4209 = vmatprep.subr.bf16.mxu1 %v4541_v61  ;;  %v4547_v3 = vld [vmem:[%s6022_s5 + $0x18] sm:$0xff]   ;;  %4237 = vmatprep.subr.bf16.mxu0 %v4546_v2  ;;  %v4549_v5 = vld [vmem:[%s6023_s30] sm:$0xff]  }
  0x47   :  { %4210 = vmatpush3.bf16.msra.mxu1 %v4541_v61 }
  0x48   :  { %4211 = vmatprep.subr.bf16.mxu1 %v4543_v63 }
  0x49   :  { %4238 = vmatpush3.bf16.msra.mxu0 %v4546_v2 }
  0x4a   :  { %4239 = vmatprep.subr.bf16.mxu0 %v4548_v4 }
  0x4b   :  { %4212 = vmatpush3.bf16.msra.mxu1 %v4543_v63 }
  0x4c   :  { %4213 = vmatprep.subr.bf16.mxu1 %v4545_v1 }
  0x4d   :  { %4240 = vmatpush3.bf16.msra.mxu0 %v4548_v4 }
  0x4f   :  { %4214 = vmatpush3.bf16.msra.mxu1 %v4545_v1 }
  0x50   :  { %4215 = vmatprep.subr.bf16.mxu1 %v4547_v3 }
  0x53   :  { %4216 = vmatpush3.bf16.msra.mxu1 %v4547_v3 }
  0x54   :  { %4221 = vmatprep.subr.bf16.mxu1 %v4549_v5 }
 0x107   :  { %v3996_v12 = vpop.f32.mrb[0].mxu0 }
 0x108   :  { %v3997_v14 = vpop.f32.mrb[1].mxu0  ;;  %v4024_v15 = vpop.f32.mrb[0].mxu1 }
 0x109   :  { %v3998_v16 = vadd.f32 %v3997_v14, %v3996_v12  ;;  %v3999_v17 = vpop.f32.mrb[2].mxu0  ;;  %v4025_v18 = vpop.f32.mrb[1].mxu1 }
 0x10a   :  { %v4000_v20 = vpop.f32.mrb[3].mxu0  ;;  %v4026_v22 = vadd.f32 %v4025_v18, %v4024_v15  ;;  %v4027_v23 = vpop.f32.mrb[2].mxu1 }
 0x10b   :  { %v420_v21 = vadd.f32 %v3998_v16, %v190_v13  ;;  %v4001_v24 = vadd.f32 %v4000_v20, %v3999_v17  ;;  %v4028_v25 = vpop.f32.mrb[3].mxu1  ;;  %v3753_v17 = vld [vmem:[%s6024_s28] ss:$0 sm:$0xff] }
 0x10c   :  { %v4029_v28 = vadd.f32 %v4028_v25, %v4027_v23 }
 0x10d   :  { %v5120_v26 = vadd.f32 %v4026_v22, %v420_v21  ;;  %v423_v27 = vadd.f32 %v4001_v24, %v191_v19  ;;  %v3754_v21 = vld [vmem:[%s6025_s2] ss:$0 sm:$0xff] }
 0x10f   :  { %v5122_v29 = vadd.f32 %v4029_v28, %v423_v27  ;;  %v4002_v30 = vpop.f32.mrb[4].mxu0  ;;  %v487_v31 = vsel %vm486_vm0, %v5120_v26, 0.0 }
 0x110   :  { %v4003_v33 = vpop.f32.mrb[5].mxu0  ;;  %488 = vadd.xlane.f32.xlu0 %v487_v31  ;;  %v4030_v34 = vpop.f32.mrb[4].mxu1 }
 0x111   :  { %v4004_v35 = vadd.f32 %v4003_v33, %v4002_v30  ;;  %v4005_v36 = vpop.f32.mrb[6].mxu0  ;;  %v4031_v37 = vpop.f32.mrb[5].mxu1  ;;  %v490_v42 = vsel %vm486_vm0, %v5122_v29, 0.0  ;;  %v4550_v33 = vld [vmem:[%s6023_s30 + $0x8] sm:$0xff]  }
 0x112   :  { %v4006_v38 = vpop.f32.mrb[7].mxu0  ;;  %v4032_v40 = vadd.f32 %v4031_v37, %v4030_v34  ;;  %v4033_v41 = vpop.f32.mrb[6].mxu1  ;;  %v4551_v34 = vld [vmem:[%s6023_s30 + $0x10] sm:$0xff]   ;;  %v3755_v36 = vld [vmem:[%s6026_s6] ss:$0 sm:$0xff] }
 0x113   :  { %v428_v39 = vadd.f32 %v4004_v35, %v192_v32  ;;  %v4034_v43 = vpop.f32.mrb[7].mxu1  ;;  %v4552_v35 = vld [vmem:[%s6023_s30 + $0x18] sm:$0xff]  }
 0x114   :  { %491 = vadd.xlane.f32.xlu0 %v490_v42 }
 0x115   :  { %v5131_v44 = vadd.f32 %v4032_v40, %v428_v39  ;;  %v3769_v39 = vld [vmem:[%s5970_s12] ss:$0 sm:$0xff] }
 0x117   :  { %v494_v45 = vsel %vm493_vm1, %v5131_v44, 0.0 }
 0x118   :  { %495 = vadd.xlane.f32.xlu1 %v494_v45 }
 0x19d   :  { %v489_v46 = vpop.xlane.xlu0 %488 }
 0x19e   :  { %v498_v47 = vmul.f32 0.015625, %v489_v46 }
 0x1a0   :  { %v501_v48 = vsub.f32 %v5120_v26, %v498_v47 }
 0x1a1   :  { %v492_v49 = vpop.xlane.xlu0 %491 }
 0x1a2   :  { %v499_v50 = vmul.f32 0.015625, %v492_v49  ;;  %v504_v51 = vmul.f32 %v501_v48, %v501_v48 }
 0x1a4   :  { %v502_v52 = vsub.f32 %v5122_v29, %v499_v50  ;;  %v507_v53 = vsel %vm486_vm0, %v504_v51, 0.0 }
 0x1a5   :  { %v496_v54 = vpop.xlane.xlu1 %495  ;;  %508 = vadd.xlane.f32.xlu1 %v507_v53 }
 0x1a6   :  { %v500_v55 = vmul.f32 0.015625, %v496_v54  ;;  %v505_v56 = vmul.f32 %v502_v52, %v502_v52 }
 0x1a8   :  { %v503_v57 = vsub.f32 %v5131_v44, %v500_v55  ;;  %v510_v58 = vsel %vm486_vm0, %v505_v56, 0.0 }
 0x1a9   :  { %511 = vadd.xlane.f32.xlu0 %v510_v58  ;;  %v3762_v58 = vld [vmem:[%s5968_s10] ss:$0 sm:$0xff] }
 0x1aa   :  { %v506_v59 = vmul.f32 %v503_v57, %v503_v57 }
 0x1ac   :  { %v513_v60 = vsel %vm493_vm1, %v506_v59, 0.0 }
 0x1ad   :  { %514 = vadd.xlane.f32.xlu1 %v513_v60 }
 0x232   :  { %v509_v6 = vpop.xlane.xlu1 %508 }
 0x233   :  { %v516_v7 = vmul.f32 0.015625, %v509_v6 }
 0x235   :  { %v519_v8 = vadd.f32 1e-06, %v516_v7 }
 0x236   :  { %v512_v9 = vpop.xlane.xlu0 %511 }
 0x237   :  { %4629 = vrsqrt.f32 %v519_v8  ;;  %v517_v10 = vmul.f32 0.015625, %v512_v9 }
 0x239   :  { %v520_v11 = vadd.f32 1e-06, %v517_v10 }
 0x23a   :  { %v515_v12 = vpop.xlane.xlu1 %514 }
 0x23b   :  { %4631 = vrsqrt.f32 %v520_v11  ;;  %v518_v13 = vmul.f32 0.015625, %v515_v12 }
 0x23d   :  { %v521_v14 = vadd.f32 1e-06, %v518_v13 }
 0x23f   :  { %4633 = vrsqrt.f32 %v521_v14 }
 0x241   :  { %v4630_v15 = vpop.eup %4629 }
 0x242   :  { %v525_v16 = vmul.f32 %v4630_v15, %v501_v48  ;;  %v5245_v15 = vld [vmem:[%s6027_s0] sm:$0xff] }
 0x244   :  { %v532_v20 = vmul.f32 %v3753_v17, %v525_v16 }
 0x245   :  { %v4632_v18 = vpop.eup %4631 }
 0x246   :  { %v526_v19 = vmul.f32 %v4632_v18, %v502_v52  ;;  %v539_v25 = vadd.f32 %v3754_v21, %v532_v20 }
 0x248   :  { %v533_v22 = vmul.f32 %v3753_v17, %v526_v19  ;;  %v5255_v19 = vld [vmem:[%s6027_s0 + $0x8] sm:$0xff] }
 0x249   :  { %v4634_v23 = vpop.eup %4633 }
 0x24a   :  { %v527_v24 = vmul.f32 %v4634_v23, %v503_v57  ;;  %v540_v27 = vadd.f32 %v3754_v21, %v533_v22 }
 0x24c   :  { %v534_v28 = vmul.f32 %v3753_v17, %v527_v24  ;;  %v550_v30 = vpack.c.bf16 %v540_v27, %v539_v25  ;;  %v5250_v17 = vld [vmem:[%s6027_s0 + $0x10] sm:$0xf] }
 0x24e   :  { %v541_v31 = vadd.f32 %v3754_v21, %v534_v28  ;;  %4217 = vmatprep.mubr.msk.bf16.mxu1 %vm486_vm0, %v550_v30  ;;  %4241 = vmatprep.mubr.msk.bf16.mxu0 %vm486_vm0, %v550_v30 }
 0x250   :  { %v551_v32 = vpack.c.bf16 %v541_v31, %v541_v31 }
 0x252   :  { %4218 = vmatmul.mubr.msk.bf16.vlgmr.msra.gmra.mrb[8].mxu1 %vm486_vm0, %v551_v32  ;;  %4242 = vmatmul.mubr.msk.bf16.vlgmr.msra.gmra.mrb[8].mxu0 %vm486_vm0, %v551_v32 }
 0x253   :  { %4222 = vmatpush3.bf16.msra.mxu1 %v4549_v5  ;;  %4229 = vmatprep.mubr.msk.bf16.mxu1 %vm486_vm0, %v550_v30 }
 0x254   :  { %4223 = vmatprep.subr.bf16.mxu1 %v4550_v33 }
 0x257   :  { %4224 = vmatpush3.bf16.msra.mxu1 %v4550_v33 }
 0x258   :  { %4225 = vmatprep.subr.bf16.mxu1 %v4551_v34 }
 0x25b   :  { %4226 = vmatpush3.bf16.msra.mxu1 %v4551_v34 }
 0x25c   :  { %4227 = vmatprep.subr.bf16.mxu1 %v4552_v35 }
 0x25f   :  { %4228 = vmatpush3.bf16.msra.mxu1 %v4552_v35 }
 0x262   :  { %4230 = vmatmul.mubr.msk.bf16.vlgmr.msra.gmra.mrb[12].mxu1 %vm486_vm0, %v551_v32 }
 0x325   :  { %v4219_v37 = vpop.f32.mrb[8].mxu1  ;;  %v4243_v38 = vpop.f32.mrb[8].mxu0 }
 0x326   :  { %v621_v40 = vpop.f32.mrb[9].mxu1  ;;  %v794_v41 = vpop.f32.mrb[9].mxu0  ;;  %v803_v48 = vadd.f32 %v4243_v38, %v3769_v39  ;;  %v630_v63 = vadd.f32 %v4219_v37, %v3755_v36 }
 0x327   :  { %v622_v42 = vadd.f32 %v3755_v36, %v621_v40  ;;  %v4220_v43 = vpop.f32.mrb[10].mxu1  ;;  %v4244_v45 = vpop.f32.mrb[10].mxu0  ;;  %v795_v49 = vadd.f32 %v3769_v39, %v794_v41 }
 0x328   :  { %v624_v46 = vpop.f32.mrb[11].mxu1  ;;  %v797_v47 = vpop.f32.mrb[11].mxu0  ;;  %v5197_v55 = vpack.c.bf16 %v803_v48, %v803_v48  ;;  %v637_v5 = vmul.f32 0.25, %v630_v63 }
 0x329   :  { %v625_v50 = vadd.f32 %v3755_v36, %v624_v46  ;;  %v798_v51 = vadd.f32 %v3769_v39, %v797_v47  ;;  %v635_v52 = vmul.f32 0.25, %v622_v42 }
 0x32a   :  { %v920_v57 = vsel %vm918_vm3, %v5197_v55, 0  ;;  %v5228_v7 = vpack.c.bf16 %v637_v5, %v637_v5 }
 0x32b   :  { %v636_v53 = vmul.f32 0.25, %v625_v50  ;;  %v5195_v54 = vpack.c.bf16 %v798_v51, %v795_v49 }
 0x32d   :  { %v5199_v56 = vpack.c.bf16 %v636_v53, %v635_v52  ;;  %4253 = vmatprep.subr.bf16.mxu0 %v5195_v54 }
 0x32e   :  { %4254 = vmatpush3.bf16.msra.mxu0 %v5195_v54 }
 0x32f   :  { %4249 = vmatprep.mubr.msk.bf16.mxu1 %vm812_vm2, %v5199_v56  ;;  %4447 = vmatprep.subr.msk.bf16.mxu0 %vm918_vm3, %v5197_v55 }
 0x332   :  { %4256 = vmatpush3.bf16.msra.mxu0 %v920_v57 }
 0x335   :  { %v4231_v59 = vpop.f32.mrb[12].mxu1 }
 0x336   :  { %v718_v60 = vadd.f32 %v4231_v59, %v3762_v58  ;;  %v709_v61 = vpop.f32.mrb[13].mxu1 }
 0x337   :  { %v4232_v62 = vpop.f32.mrb[14].mxu1  ;;  %v710_v2 = vadd.f32 %v3762_v58, %v709_v61 }
 0x338   :  { %v5212_v0 = vpack.c.bf16 %v718_v60, %v718_v60  ;;  %v712_v1 = vpop.f32.mrb[15].mxu1 }
 0x339   :  { %v713_v3 = vadd.f32 %v3762_v58, %v712_v1 }
 0x33a   :  { %980 = vrot.lane.b32.xlu1 %v5212_v0, %s6004_s27  ;;  %v823_v8 = vsel %vm812_vm2, %v5212_v0, 0 }
 0x33b   :  { %v5216_v4 = vpack.c.bf16 %v713_v3, %v710_v2 }
 0x33d   :  { %978 = vrot.lane.b32.xlu0 %v5216_v4, %s6004_s27  ;;  %4445 = vmatprep.subr.msk.bf16.mxu1 %vm812_vm2, %v5216_v4  ;;  %v820_v6 = vsel %vm812_vm2, %v5216_v4, 0 }
 0x33e   :  { %4246 = vmatpush3.bf16.xpose.msra.mxu1 %v820_v6  ;;  %972 = vrot.lane.b32.xlu1 %v5199_v56, %s6004_s27 }
 0x33f   :  { %4446 = vmatprep.subr.msk.bf16.mxu1 %vm812_vm2, %v5212_v0 }
 0x342   :  { %974 = vrot.lane.b32.xlu1 %v5228_v7, %s6004_s27 }
 0x346   :  { %4248 = vmatpush3.bf16.xpose.msra.mxu1 %v823_v8 }
 0x34d   :  { %4250 = vmatmul.mubr.msk.bf16.vlgmr.msra.gmra.mrb[16].mxu1 %vm812_vm2, %v5228_v7 }
 0x3ac   :  { %v981_v9 = vpop.permute.xlu1 %980 }
 0x3ad   :  { %v992_v13 = vsel %vm812_vm2, %v981_v9, 0 }
 0x3af   :  { %v979_v10 = vpop.permute.xlu0 %978 }
 0x3b0   :  { %4448 = vmatprep.subr.msk.bf16.mxu1 %vm812_vm2, %v979_v10  ;;  %v973_v11 = vpop.permute.xlu1 %972  ;;  %v989_v12 = vsel %vm812_vm2, %v979_v10, 0 }
 0x3b1   :  { %4262 = vmatpush3.bf16.xpose.msra.mxu1 %v989_v12  ;;  %4265 = vmatprep.mubr.msk.bf16.mxu1 %vm812_vm2, %v973_v11 }
 0x3b2   :  { %4449 = vmatprep.subr.msk.bf16.mxu1 %vm812_vm2, %v981_v9 }
 0x3b4   :  { %v975_v14 = vpop.permute.xlu1 %974 }
 0x3b9   :  { %4264 = vmatpush3.bf16.xpose.msra.mxu1 %v992_v13 }
 0x3c0   :  { %4266 = vmatmul.mubr.msk.bf16.vlgmr.msra.gmra.mrb[20].mxu1 %vm812_vm2, %v975_v14 }
 0x420   :  { %v4251_v16 = vpop.f32.mrb[16].mxu1 }
 0x421   :  { %v859_v18 = vpop.f32.mrb[17].mxu1  ;;  %v868_v23 = vadd.f32 %v4251_v16, %v5250_v17 }
 0x422   :  { %v860_v20 = vadd.f32 %v859_v18, %v5245_v15  ;;  %v4252_v21 = vpop.f32.mrb[18].mxu1 }
 0x423   :  { %v862_v22 = vpop.f32.mrb[19].mxu1  ;;  %v881_v28 = vsel %vm880_vm5, %v868_v23, -inf }
 0x424   :  { %v863_v24 = vadd.f32 %v862_v22, %v5255_v19  ;;  %v874_v25 = vsel %vm873_vm4, %v860_v20, -inf }
 0x425   :  { %875 = vmax.xlane.f32.xlu0 %v874_v25 }
 0x426   :  { %v877_v27 = vsel %vm873_vm4, %v863_v24, -inf }
 0x427   :  { %878 = vmax.xlane.f32.xlu1 %v877_v27 }
 0x429   :  { %882 = vmax.xlane.f32.xlu0 %v881_v28 }
 0x493   :  { %v4267_v30 = vpop.f32.mrb[20].mxu1 }
 0x494   :  { %v1037_v31 = vadd.f32 %v4267_v30, %v5250_v17  ;;  %v1028_v32 = vpop.f32.mrb[21].mxu1 }
 0x495   :  { %v1029_v33 = vadd.f32 %v1028_v32, %v5245_v15  ;;  %v4268_v34 = vpop.f32.mrb[22].mxu1 }
 0x496   :  { %v1031_v35 = vpop.f32.mrb[23].mxu1  ;;  %v1048_v36 = vsel %vm880_vm5, %v1037_v31, -inf }
 0x497   :  { %v1032_v37 = vadd.f32 %v1031_v35, %v5255_v19  ;;  %1049 = vmax.xlane.f32.xlu1 %v1048_v36  ;;  %v1042_v38 = vsel %vm873_vm4, %v1029_v33, -inf }
 0x498   :  { %1043 = vmax.xlane.f32.xlu0 %v1042_v38 }
 0x499   :  { %v1045_v39 = vsel %vm873_vm4, %v1032_v37, -inf }
 0x49c   :  { %1046 = vmax.xlane.f32.xlu0 %v1045_v39 }
 0x4b2   :  { %v876_v40 = vpop.xlane.xlu0 %875 }
 0x4b3   :  { %v884_v42 = vsub.f32 %v860_v20, %v876_v40 }
 0x4b4   :  { %v879_v41 = vpop.xlane.xlu1 %878 }
 0x4b5   :  { %v885_v43 = vsub.f32 %v863_v24, %v879_v41  ;;  %v887_v48 = vmul.f32 1.442695, %v884_v42 }
 0x4b6   :  { %v883_v45 = vpop.xlane.xlu0 %882 }
 0x4b7   :  { %v889_v46 = vmul.f32 1.442695, %v885_v43  ;;  %v886_v47 = vsub.f32 %v868_v23, %v883_v45 }
 0x4b9   :  { %4635 = vpow2.f32 %v889_v46  ;;  %v891_v49 = vmul.f32 1.442695, %v886_v47 }
 0x4bb   :  { %4637 = vpow2.f32 %v891_v49 }
 0x4bc   :  { %4639 = vpow2.f32 %v887_v48 }
 0x4c3   :  { %v4636_v50 = vpop.eup %4635 }
 0x4c4   :  { %v896_v51 = vsel %vm873_vm4, %v4636_v50, 0.0 }
 0x4c5   :  { %v4638_v52 = vpop.eup %4637  ;;  %897 = vadd.xlane.f32.xlu1 %v896_v51 }
 0x4c6   :  { %v899_v53 = vsel %vm880_vm5, %v4638_v52, 0.0  ;;  %v4640_v57 = vpop.eup %4639 }
 0x4c7   :  { %900 = vadd.xlane.f32.xlu0 %v899_v53  ;;  %v893_v58 = vsel %vm873_vm4, %v4640_v57, 0.0 }
 0x4cb   :  { %894 = vadd.xlane.f32.xlu0 %v893_v58 }
 0x524   :  { %v1050_v59 = vpop.xlane.xlu1 %1049 }
 0x525   :  { %v1053_v60 = vsub.f32 %v1037_v31, %v1050_v59  ;;  %v1044_v61 = vpop.xlane.xlu0 %1043 }
 0x526   :  { %v1051_v62 = vsub.f32 %v1029_v33, %v1044_v61 }
 0x527   :  { %v1058_v63 = vmul.f32 1.442695, %v1053_v60 }
 0x528   :  { %v1054_v1 = vmul.f32 1.442695, %v1051_v62 }
 0x529   :  { %4641 = vpow2.f32 %v1058_v63  ;;  %v1047_v2 = vpop.xlane.xlu0 %1046 }
 0x52a   :  { %v1052_v3 = vsub.f32 %v1032_v37, %v1047_v2  ;;  %4643 = vpow2.f32 %v1054_v1 }
 0x52c   :  { %v1056_v5 = vmul.f32 1.442695, %v1052_v3 }
 0x52e   :  { %4645 = vpow2.f32 %v1056_v5 }
 0x533   :  { %v4642_v6 = vpop.eup %4641 }
 0x534   :  { %v1066_v8 = vsel %vm880_vm5, %v4642_v6, 0.0  ;;  %v4644_v9 = vpop.eup %4643 }
 0x535   :  { %1067 = vadd.xlane.f32.xlu1 %v1066_v8  ;;  %v1060_v11 = vsel %vm873_vm4, %v4644_v9, 0.0 }
 0x538   :  { %v4646_v10 = vpop.eup %4645 }
 0x539   :  { %1061 = vadd.xlane.f32.xlu1 %v1060_v11  ;;  %v1063_v12 = vsel %vm873_vm4, %v4646_v10, 0.0 }
 0x53a   :  { %1064 = vadd.xlane.f32.xlu0 %v1063_v12 }
 0x54a   :  { %1081 = vrot.lane.b32.xlu1 %v5197_v55, %s6004_s27 }
 0x54e   :  { %1145 = vrot.lane.b32.xlu1 %v5216_v4, %s6000_s1 }
 0x550   :  { %1079 = vrot.lane.b32.xlu0 %v5195_v54, %s6004_s27  ;;  %s6032_s27 = smov 32  }
 0x552   :  { %1147 = vrot.lane.b32.xlu1 %v5212_v0, %s6000_s1  ;;  %v898_v13 = vpop.xlane.xlu1 %897 }
 0x554   :  { %1141 = vrot.lane.b32.xlu0 %v5199_v56, %s6000_s1  ;;  %v901_v14 = vpop.xlane.xlu0 %900 }
 0x555   :  { %4647 = vrcp.f32 %v901_v14 }
 0x556   :  { %1143 = vrot.lane.b32.xlu1 %v5228_v7, %s6000_s1  ;;  %4649 = vrcp.f32 %v898_v13 }
 0x558   :  { %v895_v16 = vpop.xlane.xlu0 %894 }
 0x559   :  { %4651 = vrcp.f32 %v895_v16 }
 0x55f   :  { %v4648_v18 = vpop.eup %4647 }
 0x560   :  { %v4650_v20 = vpop.eup %4649  ;;  %v907_v22 = vmul.f32 %v4648_v18, %v4638_v52 }
 0x561   :  { %v905_v24 = vmul.f32 %v4650_v20, %v4636_v50 }
 0x562   :  { %v909_v27 = vpack.c.bf16 %v907_v22, %v907_v22 }
 0x563   :  { %v4652_v21 = vpop.eup %4651 }
 0x564   :  { %v903_v23 = vmul.f32 %v4652_v21, %v4640_v57 }
 0x566   :  { %v908_v25 = vpack.c.bf16 %v905_v24, %v903_v23 }
 0x568   :  { %4257 = vmatprep.mubr.msk.bf16.mxu0 %vm873_vm4, %v908_v25 }
 0x569   :  { %4258 = vmatmul.mubr.msk.bf16.vlgmr.msra.gmra.mrb[12].mxu0 %vm873_vm4, %v909_v27 }
 0x5c2   :  { %v1068_v28 = vpop.xlane.xlu1 %1067 }
 0x5c3   :  { %4653 = vrcp.f32 %v1068_v28 }
 0x5c6   :  { %v1062_v30 = vpop.xlane.xlu1 %1061 }
 0x5c7   :  { %4655 = vrcp.f32 %v1062_v30  ;;  %v1065_v31 = vpop.xlane.xlu0 %1064 }
 0x5c8   :  { %4657 = vrcp.f32 %v1065_v31 }
 0x5ca   :  { %v1082_v32 = vpop.permute.xlu1 %1081 }
 0x5cb   :  { %v1080_v33 = vpop.permute.xlu0 %1079  ;;  %v1091_v35 = vsel %vm918_vm3, %v1082_v32, 0 }
 0x5cc   :  { %4269 = vmatprep.subr.bf16.mxu0 %v1080_v33 }
 0x5cd   :  { %4270 = vmatpush3.bf16.msra.mxu0 %v1080_v33  ;;  %v4654_v34 = vpop.eup %4653 }
 0x5ce   :  { %4450 = vmatprep.subr.msk.bf16.mxu0 %vm918_vm3, %v1082_v32  ;;  %v1146_v37 = vpop.permute.xlu1 %1145  ;;  %v1074_v40 = vmul.f32 %v4654_v34, %v4642_v6 }
 0x5cf   :  { %v1142_v45 = vpop.permute.xlu0 %1141  ;;  %v1156_v46 = vsel %vm812_vm2, %v1146_v37, 0 }
 0x5d0   :  { %v1076_v43 = vpack.c.bf16 %v1074_v40, %v1074_v40 }
 0x5d1   :  { %v4656_v36 = vpop.eup %4655  ;;  %4272 = vmatpush3.bf16.msra.mxu0 %v1091_v35 }
 0x5d2   :  { %v4658_v38 = vpop.eup %4657  ;;  %4451 = vmatprep.subr.msk.bf16.mxu0 %vm812_vm2, %v1146_v37  ;;  %v1070_v39 = vmul.f32 %v4656_v36, %v4644_v9  ;;  %v1148_v47 = vpop.permute.xlu1 %1147 }
 0x5d3   :  { %v1072_v41 = vmul.f32 %v4658_v38, %v4646_v10  ;;  %v1159_v48 = vsel %vm812_vm2, %v1148_v47, 0 }
 0x5d5   :  { %v1075_v42 = vpack.c.bf16 %v1072_v41, %v1070_v39 }
 0x5d6   :  { %v1144_v49 = vpop.permute.xlu1 %1143 }
 0x5d7   :  { %4273 = vmatprep.mubr.msk.bf16.mxu0 %vm873_vm4, %v1075_v42 }
 0x5d8   :  { %4274 = vmatmul.mubr.msk.bf16.vlgmr.msra.gmra.mrb[16].mxu0 %vm873_vm4, %v1076_v43 }
 0x5d9   :  { %4281 = vmatprep.mubr.msk.bf16.mxu0 %vm812_vm2, %v1142_v45 }
 0x5da   :  { %4278 = vmatpush3.bf16.xpose.msra.mxu0 %v1156_v46 }
 0x5db   :  { %4452 = vmatprep.subr.msk.bf16.mxu0 %vm812_vm2, %v1148_v47 }
 0x5e2   :  { %4280 = vmatpush3.bf16.xpose.msra.mxu0 %v1159_v48 }
 0x5e9   :  { %4282 = vmatmul.mubr.msk.bf16.vlgmr.msra.gmra.mrb[20].mxu0 %vm812_vm2, %v1144_v49 }
 0x63c   :  { %v5299_v50 = vpop.f32.mrb[12].mxu0 }
 0x63d   :  { %v5301_v51 = vpop.f32.mrb[13].mxu0 }
 0x63e   :  { %v4260_v52 = vpop.f32.mrb[14].mxu0 }
 0x63f   :  { %v5303_v53 = vpop.f32.mrb[15].mxu0 }
 0x6ab   :  { %v5305_v57 = vpop.f32.mrb[16].mxu0 }
 0x6ac   :  { %v5307_v58 = vpop.f32.mrb[17].mxu0 }
 0x6ad   :  { %v4276_v59 = vpop.f32.mrb[18].mxu0 }
 0x6ae   :  { %v5309_v60 = vpop.f32.mrb[19].mxu0 }
 0x6af   :  { %v4479_v61 = vpack.i.bf16 %v5309_v60, %v5307_v58 }
 0x6bc   :  { %v4283_v62 = vpop.f32.mrb[20].mxu0 }
 0x6bd   :  { %v1195_v63 = vpop.f32.mrb[21].mxu0  ;;  %v1204_v5 = vadd.f32 %v4283_v62, %v5250_v17 }
 0x6be   :  { %v1196_v1 = vadd.f32 %v1195_v63, %v5245_v15  ;;  %v4284_v2 = vpop.f32.mrb[22].mxu0 }
 0x6bf   :  { %v1198_v3 = vpop.f32.mrb[23].mxu0  ;;  %v1215_v10 = vsel %vm880_vm5, %v1204_v5, -inf }
 0x6c0   :  { %v1199_v6 = vadd.f32 %v1198_v3, %v5255_v19  ;;  %v1209_v8 = vsel %vm873_vm4, %v1196_v1, -inf }
 0x6c1   :  { %1210 = vmax.xlane.f32.xlu0 %v1209_v8 }
 0x6c2   :  { %v1212_v9 = vsel %vm873_vm4, %v1199_v6, -inf }
 0x6c3   :  { %1213 = vmax.xlane.f32.xlu1 %v1212_v9 }
 0x6c5   :  { %1216 = vmax.xlane.f32.xlu0 %v1215_v10 }
 0x74e   :  { %v1211_v11 = vpop.xlane.xlu0 %1210 }
 0x74f   :  { %v1218_v12 = vsub.f32 %v1196_v1, %v1211_v11 }
 0x750   :  { %v1214_v13 = vpop.xlane.xlu1 %1213 }
 0x751   :  { %v1221_v14 = vmul.f32 1.442695, %v1218_v12  ;;  %v1219_v16 = vsub.f32 %v1199_v6, %v1214_v13 }
 0x752   :  { %v1217_v18 = vpop.xlane.xlu0 %1216 }
 0x753   :  { %4659 = vpow2.f32 %v1221_v14  ;;  %v1223_v20 = vmul.f32 1.442695, %v1219_v16  ;;  %v1220_v21 = vsub.f32 %v1204_v5, %v1217_v18 }
 0x755   :  { %4661 = vpow2.f32 %v1223_v20  ;;  %v1225_v22 = vmul.f32 1.442695, %v1220_v21 }
 0x757   :  { %4663 = vpow2.f32 %v1225_v22 }
 0x75d   :  { %v4660_v23 = vpop.eup %4659 }
 0x75e   :  { %v1227_v24 = vsel %vm873_vm4, %v4660_v23, 0.0 }
 0x75f   :  { %v4662_v25 = vpop.eup %4661  ;;  %1228 = vadd.xlane.f32.xlu0 %v1227_v24 }
 0x760   :  { %v1230_v28 = vsel %vm873_vm4, %v4662_v25, 0.0 }
 0x761   :  { %v4664_v27 = vpop.eup %4663 }
 0x762   :  { %v1233_v30 = vsel %vm880_vm5, %v4664_v27, 0.0 }
 0x763   :  { %1231 = vadd.xlane.f32.xlu0 %v1230_v28  ;;  %1234 = vadd.xlane.f32.xlu1 %v1233_v30 }
 0x774   :  { %1246 = vrot.lane.b32.xlu1 %v5197_v55, %s6000_s1 }
 0x778   :  { %1310 = vrot.lane.b32.xlu1 %v5216_v4, %s5998_s8 }
 0x779   :  { %1244 = vrot.lane.b32.xlu0 %v5195_v54, %s6000_s1 }
 0x77c   :  { %1312 = vrot.lane.b32.xlu1 %v5212_v0, %s5998_s8 }
 0x77d   :  { %1306 = vrot.lane.b32.xlu0 %v5199_v56, %s5998_s8 }
 0x780   :  { %1308 = vrot.lane.b32.xlu1 %v5228_v7, %s5998_s8 }
 0x7ec   :  { %v1229_v31 = vpop.xlane.xlu0 %1228 }
 0x7ed   :  { %4665 = vrcp.f32 %v1229_v31 }
 0x7f0   :  { %v1235_v32 = vpop.xlane.xlu1 %1234  ;;  %v1232_v33 = vpop.xlane.xlu0 %1231 }
 0x7f1   :  { %4667 = vrcp.f32 %v1235_v32 }
 0x7f2   :  { %4669 = vrcp.f32 %v1232_v33 }
 0x7f4   :  { %v1247_v34 = vpop.permute.xlu1 %1246  ;;  %v1245_v4 = vpop.permute.xlu0 %1244 }
 0x7f5   :  { %4285 = vmatprep.subr.bf16.mxu1 %v1245_v4  ;;  %v1256_v0 = vsel %vm918_vm3, %v1247_v34, 0 }
 0x7f6   :  { %4286 = vmatpush3.bf16.msra.mxu1 %v1245_v4 }
 0x7f7   :  { %4453 = vmatprep.subr.msk.bf16.mxu1 %vm918_vm3, %v1247_v34  ;;  %v4666_v35 = vpop.eup %4665 }
 0x7f8   :  { %v1311_v36 = vpop.permute.xlu1 %1310  ;;  %v1237_v38 = vmul.f32 %v4666_v35, %v4660_v23  ;;  %v1307_v43 = vpop.permute.xlu0 %1306  ;;  %v4553_v35 = vld [vmem:[%s5971_s13] sm:$0xff]  }
 0x7f9   :  { %v1321_v42 = vsel %vm812_vm2, %v1311_v36, 0 }
 0x7fa   :  { %4288 = vmatpush3.bf16.msra.mxu1 %v1256_v0 }
 0x7fb   :  { %v4668_v56 = vpop.eup %4667  ;;  %4454 = vmatprep.subr.msk.bf16.mxu1 %vm812_vm2, %v1311_v36  ;;  %v4554_v36 = vld [vmem:[%s5971_s13 + $0x8] sm:$0xff]  }
 0x7fc   :  { %v4670_v7 = vpop.eup %4669  ;;  %v1241_v37 = vmul.f32 %v4668_v56, %v4664_v27  ;;  %v1313_v45 = vpop.permute.xlu1 %1312  ;;  %v4555_v56 = vld [vmem:[%s5971_s13 + $0x10] sm:$0xff]  }
 0x7fd   :  { %v1239_v39 = vmul.f32 %v4670_v7, %v4662_v25  ;;  %v1324_v46 = vsel %vm812_vm2, %v1313_v45, 0  ;;  %v4556_v7 = vld [vmem:[%s5971_s13 + $0x18] sm:$0xff]  }
 0x7fe   :  { %v1243_v40 = vpack.c.bf16 %v1241_v37, %v1241_v37 }
 0x7ff   :  { %v1242_v41 = vpack.c.bf16 %v1239_v39, %v1237_v38 }
 0x800   :  { %v1309_v47 = vpop.permute.xlu1 %1308 }
 0x801   :  { %4289 = vmatprep.mubr.msk.bf16.mxu1 %vm873_vm4, %v1242_v41 }
 0x802   :  { %4290 = vmatmul.mubr.msk.bf16.vlgmr.msra.gmra.mrb[24].mxu1 %vm873_vm4, %v1243_v40 }
 0x803   :  { %4297 = vmatprep.mubr.msk.bf16.mxu1 %vm812_vm2, %v1307_v43  ;;  %4294 = vmatpush3.bf16.xpose.msra.mxu1 %v1321_v42 }
 0x804   :  { %4455 = vmatprep.subr.msk.bf16.mxu1 %vm812_vm2, %v1313_v45 }
 0x80b   :  { %4296 = vmatpush3.bf16.xpose.msra.mxu1 %v1324_v46 }
 0x812   :  { %4298 = vmatmul.mubr.msk.bf16.vlgmr.msra.gmra.mrb[28].mxu1 %vm812_vm2, %v1309_v47 }
 0x8d5   :  { %v4291_v48 = vpop.f32.mrb[24].mxu1 }
 0x8d6   :  { %v1292_v49 = vpop.f32.mrb[25].mxu1 }
 0x8d7   :  { %v4292_v52 = vpop.f32.mrb[26].mxu1 }
 0x8d8   :  { %v1295_v59 = vpop.f32.mrb[27].mxu1 }
 0x8d9   :  { %v4484_v62 = vpack.i.bf16 %v1295_v59, %v1292_v49 }
 0x8e5   :  { %v4299_v63 = vpop.f32.mrb[28].mxu1 }
 0x8e6   :  { %v1360_v1 = vpop.f32.mrb[29].mxu1  ;;  %v1369_v6 = vadd.f32 %v4299_v63, %v5250_v17 }
 0x8e7   :  { %v1361_v2 = vadd.f32 %v1360_v1, %v5245_v15  ;;  %v4300_v3 = vpop.f32.mrb[30].mxu1 }
 0x8e8   :  { %v1363_v5 = vpop.f32.mrb[31].mxu1  ;;  %v1380_v11 = vsel %vm880_vm5, %v1369_v6, -inf }
 0x8e9   :  { %v1364_v8 = vadd.f32 %v1363_v5, %v5255_v19  ;;  %v1374_v9 = vsel %vm873_vm4, %v1361_v2, -inf }
 0x8ea   :  { %1375 = vmax.xlane.f32.xlu0 %v1374_v9 }
 0x8eb   :  { %v1377_v10 = vsel %vm873_vm4, %v1364_v8, -inf }
 0x8ec   :  { %1378 = vmax.xlane.f32.xlu1 %v1377_v10 }
 0x8ee   :  { %1381 = vmax.xlane.f32.xlu0 %v1380_v11 }
 0x977   :  { %v1376_v12 = vpop.xlane.xlu0 %1375 }
 0x978   :  { %v1383_v13 = vsub.f32 %v1361_v2, %v1376_v12 }
 0x979   :  { %v1379_v14 = vpop.xlane.xlu1 %1378 }
 0x97a   :  { %v1386_v16 = vmul.f32 1.442695, %v1383_v13  ;;  %v1384_v15 = vsub.f32 %v1364_v8, %v1379_v14  ;;  %v3798_v13 = vld [vmem:[%s5972_s14] ss:$0 sm:$0xff] }
 0x97b   :  { %v1382_v18 = vpop.xlane.xlu0 %1381 }
 0x97c   :  { %4671 = vpow2.f32 %v1386_v16  ;;  %v1388_v20 = vmul.f32 1.442695, %v1384_v15  ;;  %v1385_v17 = vsub.f32 %v1369_v6, %v1382_v18 }
 0x97e   :  { %4673 = vpow2.f32 %v1388_v20  ;;  %v1390_v19 = vmul.f32 1.442695, %v1385_v17 }
 0x980   :  { %4675 = vpow2.f32 %v1390_v19 }
 0x986   :  { %v4672_v21 = vpop.eup %4671 }
 0x987   :  { %v1392_v22 = vsel %vm873_vm4, %v4672_v21, 0.0 }
 0x988   :  { %v4674_v23 = vpop.eup %4673  ;;  %1393 = vadd.xlane.f32.xlu0 %v1392_v22 }
 0x989   :  { %v1395_v25 = vsel %vm873_vm4, %v4674_v23, 0.0 }
 0x98a   :  { %v4676_v24 = vpop.eup %4675 }
 0x98b   :  { %v1398_v27 = vsel %vm880_vm5, %v4676_v24, 0.0 }
 0x98c   :  { %1396 = vadd.xlane.f32.xlu0 %v1395_v25  ;;  %1399 = vadd.xlane.f32.xlu1 %v1398_v27 }
 0x99d   :  { %1411 = vrot.lane.b32.xlu1 %v5197_v55, %s5998_s8 }
 0x9a1   :  { %4480 = vrot.lane.b32.xlu1 %v4479_v61, %s5996_s4 }
 0x9a2   :  { %1409 = vrot.lane.b32.xlu0 %v5195_v54, %s5998_s8 }
 0x9a5   :  { %1478 = vrot.lane.b32.xlu1 %v5305_v57, %s5996_s4 }
 0x9a6   :  { %4485 = vrot.lane.b32.xlu0 %v4484_v62, %s5994_s9 }
 0x9a9   :  { %1490 = vrot.lane.b32.xlu1 %v4291_v48, %s5994_s9 }
 0xa15   :  { %v1394_v28 = vpop.xlane.xlu0 %1393 }
 0xa16   :  { %4677 = vrcp.f32 %v1394_v28 }
 0xa19   :  { %v1400_v55 = vpop.xlane.xlu1 %1399  ;;  %v1397_v30 = vpop.xlane.xlu0 %1396 }
 0xa1a   :  { %4679 = vrcp.f32 %v1400_v55 }
 0xa1b   :  { %4681 = vrcp.f32 %v1397_v30 }
 0xa1d   :  { %v1410_v31 = vpop.permute.xlu0 %1409  ;;  %v1412_v58 = vpop.permute.xlu1 %1411 }
 0xa1e   :  { %4301 = vmatprep.subr.bf16.mxu0 %v1410_v31  ;;  %v1421_v54 = vsel %vm918_vm3, %v1412_v58, 0 }
 0xa1f   :  { %4302 = vmatpush3.bf16.msra.mxu0 %v1410_v31 }
 0xa20   :  { %4456 = vmatprep.subr.msk.bf16.mxu0 %vm918_vm3, %v1412_v58  ;;  %v4678_v57 = vpop.eup %4677 }
 0xa21   :  { %v1402_v33 = vmul.f32 %v4678_v57, %v4672_v21  ;;  %v4481_v42 = vpop.permute.xlu1 %4480  ;;  %v4486_v47 = vpop.permute.xlu0 %4485 }
 0xa22   :  { %v4483_v45 = vunpack.i.h.bf16 %v4481_v42  ;;  %v4482_v46 = vunpack.i.l.bf16 %v4481_v42  ;;  %v4488_v49 = vunpack.i.h.bf16 %v4486_v47  ;;  %v4487_v52 = vunpack.i.l.bf16 %v4486_v47 }
 0xa23   :  { %4304 = vmatpush3.bf16.msra.mxu0 %v1421_v54 }
 0xa24   :  { %v4680_v60 = vpop.eup %4679  ;;  %4309 = vmatprep.subr.bf16.mxu0 %v4553_v35  ;;  %v1508_v59 = vsel %vm812_vm2, %v5303_v53, %v4483_v45  ;;  %v1507_v62 = vsel %vm812_vm2, %v5301_v51, %v4482_v46 }
 0xa25   :  { %v4682_v61 = vpop.eup %4681  ;;  %v1406_v32 = vmul.f32 %v4680_v60, %v4676_v24  ;;  %v1479_v43 = vpop.permute.xlu1 %1478  ;;  %v1512_v8 = vsel %vm1510_vm6, %v1508_v59, %v4488_v49  ;;  %v1511_v9 = vsel %vm1510_vm6, %v1507_v62, %v4487_v52  ;;  %v3799_v59 = vld [vmem:[%s5973_s15] ss:$0 sm:$0xff] }
 0xa26   :  { %v1404_v34 = vmul.f32 %v4682_v61, %v4674_v23  ;;  %v1509_v1 = vsel %vm812_vm2, %v5299_v50, %v1479_v43 }
 0xa27   :  { %v1408_v4 = vpack.c.bf16 %v1406_v32, %v1406_v32 }
 0xa28   :  { %v1407_v0 = vpack.c.bf16 %v1404_v34, %v1402_v33  ;;  %v4559_v34 = vld [vmem:[%s5975_s17 + $0x4] ss:$8 sps:$4 sm:$0xff]  }
 0xa29   :  { %v1491_v48 = vpop.permute.xlu1 %1490  ;;  %1740 = vmatprep.subr.bf16.mxu1 %v4559_v34 }
 0xa2a   :  { %4305 = vmatprep.mubr.msk.bf16.mxu0 %vm873_vm4, %v1407_v0  ;;  %v1513_v3 = vsel %vm1510_vm6, %v1509_v1, %v1491_v48  ;;  %v4562_v0 = vld [vmem:[%s5975_s17 + $0x14] ss:$8 sps:$4 sm:$0xff]  }
 0xa2b   :  { %4306 = vmatmul.mubr.msk.bf16.vlgmr.msra.gmra.mrb[24].mxu0 %vm873_vm4, %v1408_v4  ;;  %v4557_v4 = vld [vmem:[%s5975_s17] ss:$8 sps:$4 sm:$0xff]  }
 0xa2c   :  { %4310 = vmatpush3.bf16.msra.mxu0 %v4553_v35  ;;  %1741 = vmatpush1.bf16.msra.mxu1 %v4557_v4  ;;  %v4560_v35 = vld [vmem:[%s5975_s17 + $0x10] ss:$8 sps:$4 sm:$0xff]  }
 0xa2d   :  { %4311 = vmatprep.subr.bf16.mxu0 %v4554_v36  ;;  %1742 = vmatprep.subr.bf16.mxu1 %v4562_v0 }
 0xa30   :  { %4312 = vmatpush3.bf16.msra.mxu0 %v4554_v36  ;;  %1743 = vmatpush1.bf16.msra.mxu1 %v4560_v35  ;;  %v4565_v36 = vld [vmem:[%s5975_s17 + $0x24] ss:$8 sps:$4 sm:$0xff]  }
 0xa31   :  { %4313 = vmatprep.subr.bf16.mxu0 %v4555_v56  ;;  %1744 = vmatprep.subr.bf16.mxu1 %v4565_v36 }
 0xa34   :  { %4314 = vmatpush3.bf16.msra.mxu0 %v4555_v56  ;;  %v4563_v56 = vld [vmem:[%s5975_s17 + $0x20] ss:$8 sps:$4 sm:$0xff]  }
 0xa35   :  { %4315 = vmatprep.subr.bf16.mxu0 %v4556_v7  ;;  %1745 = vmatpush1.bf16.msra.mxu1 %v4563_v56 }
 0xa38   :  { %4316 = vmatpush3.bf16.msra.mxu0 %v4556_v7  ;;  %v4566_v7 = vld [vmem:[%s5975_s17 + $0x30] ss:$8 sps:$4 sm:$0xff]  }
 0xafe   :  { %v4307_v37 = vpop.f32.mrb[24].mxu0 }
 0xaff   :  { %1502 = vrot.lane.b32.xlu1 %v4307_v37, %s6002_s29  ;;  %v1457_v38 = vpop.f32.mrb[25].mxu0  ;;  %v4568_v37 = vld [vmem:[%s5975_s17 + $0x34] ss:$8 sps:$4 sm:$0xff]  }
 0xb00   :  { %v4308_v39 = vpop.f32.mrb[26].mxu0  ;;  %1746 = vmatprep.subr.bf16.mxu1 %v4568_v37 }
 0xb01   :  { %v1460_v40 = vpop.f32.mrb[27].mxu0  ;;  %1747 = vmatpush1.bf16.msra.mxu1 %v4566_v7 }
 0xb02   :  { %v4489_v41 = vpack.i.bf16 %v1460_v40, %v1457_v38  ;;  %v4812_v38 = vmov 0  }
 0xb03   :  { %1772 = vmatprep.mubr.bf16.mxu1 %v4812_v38 }
 0xb04   :  { %4490 = vrot.lane.b32.xlu0 %v4489_v41, %s6002_s29 }
 0xb71   :  { %v1503_v63 = vpop.permute.xlu1 %1502 }
 0xb72   :  { %v1517_v53 = vsel %vm1514_vm7, %v1513_v3, %v1503_v63  ;;  %v3800_v3 = vld [vmem:[%s5974_s16] ss:$0 sm:$0xff] }
 0xb73   :  { %v1527_v12 = vpack.c.bf16 %v1517_v53, %v1517_v53 }
 0xb76   :  { %v4491_v2 = vpop.permute.xlu0 %4490 }
 0xb77   :  { %v4493_v5 = vunpack.i.h.bf16 %v4491_v2  ;;  %v4492_v6 = vunpack.i.l.bf16 %v4491_v2 }
 0xb79   :  { %v1515_v10 = vsel %vm1514_vm7, %v1511_v9, %v4492_v6  ;;  %v1516_v51 = vsel %vm1514_vm7, %v1512_v8, %v4493_v5 }
 0xb7a   :  { %v1526_v11 = vpack.c.bf16 %v1516_v51, %v1515_v10 }
 0xb7c   :  { %4317 = vmatprep.mubr.msk.bf16.mxu0 %vm486_vm0, %v1526_v11 }
 0xb7d   :  { %4318 = vmatmul.mubr.msk.bf16.vlgmr.msra.gmra.mrb[28].mxu0 %vm486_vm0, %v1527_v12  ;;  %v4569_v12 = vld [vmem:[%s5977_s19 + $0x40] sm:$0xff]  }
 0xb7e   :  { %4092 = vmatprep.subr.bf16.mxu0 %v4569_v12 }
 0xc50   :  { %v4319_v50 = vpop.f32.mrb[28].mxu0 }
 0xc51   :  { %v1592_v14 = vpop.f32.mrb[29].mxu0  ;;  %v1608_v16 = vadd.f32 %v4319_v50, %v5131_v44  ;;  %v4570_v50 = vld [vmem:[%s5977_s19] sm:$0xff]  }
 0xc52   :  { %v1606_v15 = vadd.f32 %v1592_v14, %v5120_v26  ;;  %v4320_v18 = vpop.f32.mrb[30].mxu0  ;;  %4093 = vmatpush3.bf16.msra.mxu0 %v4570_v50  ;;  %v4572_v14 = vld [vmem:[%s5977_s19 + $0x8] sm:$0xff]  }
 0xc53   :  { %v1595_v20 = vpop.f32.mrb[31].mxu0  ;;  %v5405_v21 = vadd.f32 %v3798_v13, %v1608_v16  ;;  %v4573_v16 = vld [vmem:[%s5977_s19 + $0x50] sm:$0xff]   ;;  %v4575_v18 = vld [vmem:[%s5977_s19 + $0x58] sm:$0xff]  }
 0xc54   :  { %v5402_v17 = vadd.f32 %v3798_v13, %v1606_v15  ;;  %v1607_v19 = vadd.f32 %v1595_v20, %v5122_v29  ;;  %v4574_v15 = vld [vmem:[%s5977_s19 + $0x10] sm:$0xff]   ;;  %v4576_v20 = vld [vmem:[%s5977_s19 + $0x18] sm:$0xff]  }
 0xc55   :  { %v1625_v26 = vsel %vm493_vm1, %v5405_v21, 0.0 }
 0xc56   :  { %v5407_v22 = vadd.f32 %v3798_v13, %v1607_v19  ;;  %v1619_v23 = vsel %vm486_vm0, %v5402_v17, 0.0  ;;  %v4571_v13 = vld [vmem:[%s5977_s19 + $0x48] sm:$0xff]   ;;  %v4577_v19 = vld [vmem:[%s5977_s19 + $0x60] sm:$0xff]  }
 0xc57   :  { %1620 = vadd.xlane.f32.xlu0 %v1619_v23  ;;  %4094 = vmatprep.subr.bf16.mxu0 %v4571_v13  ;;  %v4578_v23 = vld [vmem:[%s5977_s19 + $0x20] sm:$0xff]  }
 0xc58   :  { %v1622_v24 = vsel %vm486_vm0, %v5407_v22, 0.0  ;;  %4095 = vmatpush3.bf16.msra.mxu0 %v4572_v14 }
 0xc59   :  { %1623 = vadd.xlane.f32.xlu1 %v1622_v24  ;;  %4096 = vmatprep.subr.bf16.mxu0 %v4573_v16  ;;  %v4579_v24 = vld [vmem:[%s5977_s19 + $0x68] sm:$0xff]  }
 0xc5b   :  { %1626 = vadd.xlane.f32.xlu0 %v1625_v26  ;;  %v4580_v26 = vld [vmem:[%s5977_s19 + $0x28] sm:$0xff]  }
 0xc5c   :  { %4097 = vmatpush3.bf16.msra.mxu0 %v4574_v15 }
 0xc5d   :  { %4098 = vmatprep.subr.bf16.mxu0 %v4575_v18 }
 0xc60   :  { %4099 = vmatpush3.bf16.msra.mxu0 %v4576_v20 }
 0xc61   :  { %4100 = vmatprep.subr.bf16.mxu0 %v4577_v19 }
 0xc64   :  { %4101 = vmatpush3.bf16.msra.mxu0 %v4578_v23 }
 0xc65   :  { %4102 = vmatprep.subr.bf16.mxu0 %v4579_v24 }
 0xc68   :  { %4103 = vmatpush3.bf16.msra.mxu0 %v4580_v26 }
 0xce4   :  { %v1621_v44 = vpop.xlane.xlu0 %1620 }
 0xce5   :  { %v1628_v25 = vmul.f32 0.015625, %v1621_v44  ;;  %v4581_v44 = vld [vmem:[%s5977_s19 + $0x70] sm:$0xff]  }
 0xce6   :  { %v1624_v27 = vpop.xlane.xlu1 %1623  ;;  %4104 = vmatprep.subr.bf16.mxu0 %v4581_v44 }
 0xce7   :  { %v1631_v29 = vsub.f32 %v5402_v17, %v1628_v25  ;;  %v1629_v28 = vmul.f32 0.015625, %v1624_v27  ;;  %v4582_v25 = vld [vmem:[%s5977_s19 + $0x30] sm:$0xff]   ;;  %v4583_v27 = vld [vmem:[%s5977_s19 + $0x78] sm:$0xff]  }
 0xce8   :  { %v1627_v55 = vpop.xlane.xlu0 %1626  ;;  %4105 = vmatpush3.bf16.msra.mxu0 %v4582_v25 }
 0xce9   :  { %v1632_v30 = vsub.f32 %v5407_v22, %v1629_v28  ;;  %v1630_v31 = vmul.f32 0.015625, %v1627_v55  ;;  %v1634_v58 = vmul.f32 %v1631_v29, %v1631_v29  ;;  %4106 = vmatprep.subr.bf16.mxu0 %v4583_v27  ;;  %v1684_v28 = vlaneseq }
 0xceb   :  { %v1633_v54 = vsub.f32 %v5405_v21, %v1630_v31  ;;  %v1637_v57 = vsel %vm486_vm0, %v1634_v58, 0.0  ;;  %v1635_v60 = vmul.f32 %v1632_v30, %v1632_v30  ;;  %v5503_v55 = vshrl.u32 %v1684_v28, 7  ;;  %v1682_v31 = vld [vmem:[%s5976_s18] ss:$2 sm:$0x3] }
 0xcec   :  { %1638 = vadd.xlane.f32.xlu0 %v1637_v57 }
 0xced   :  { %v1636_v61 = vmul.f32 %v1633_v54, %v1633_v54  ;;  %v1640_v33 = vsel %vm486_vm0, %v1635_v60, 0.0  ;;  %v1690_v58 = vsub.s32 1, %v5503_v55 }
 0xcef   :  { %v1643_v32 = vsel %vm493_vm1, %v1636_v61, 0.0  ;;  %v1691_v57 = vrot.slane %v1682_v31, %v1690_v58 }
 0xcf0   :  { %1644 = vadd.xlane.f32.xlu1 %v1643_v32  ;;  %1641 = vadd.xlane.f32.xlu0 %v1640_v33 }
 0xd79   :  { %v1639_v39 = vpop.xlane.xlu0 %1638 }
 0xd7a   :  { %v1646_v40 = vmul.f32 0.015625, %v1639_v39 }
 0xd7c   :  { %v1649_v41 = vadd.f32 1e-06, %v1646_v40 }
 0xd7d   :  { %v1642_v42 = vpop.xlane.xlu0 %1641  ;;  %v1645_v43 = vpop.xlane.xlu1 %1644 }
 0xd7e   :  { %4683 = vrsqrt.f32 %v1649_v41  ;;  %v1647_v45 = vmul.f32 0.015625, %v1642_v42  ;;  %v1648_v46 = vmul.f32 0.015625, %v1645_v43 }
 0xd80   :  { %v1650_v47 = vadd.f32 1e-06, %v1647_v45  ;;  %v1651_v48 = vadd.f32 1e-06, %v1648_v46 }
 0xd82   :  { %4685 = vrsqrt.f32 %v1650_v47 }
 0xd83   :  { %4687 = vrsqrt.f32 %v1651_v48 }
 0xd88   :  { %v4684_v49 = vpop.eup %4683 }
 0xd89   :  { %v1655_v52 = vmul.f32 %v4684_v49, %v1631_v29  ;;  %v4584_v29 = vld [vmem:[%s5977_s19 + $0x38] sm:$0xff]  }
 0xd8a   :  { %4107 = vmatpush3.bf16.msra.mxu0 %v4584_v29 }
 0xd8b   :  { %v1662_v1 = vmul.f32 %v3799_v59, %v1655_v52 }
 0xd8c   :  { %v4686_v62 = vpop.eup %4685 }
 0xd8d   :  { %v4688_v63 = vpop.eup %4687  ;;  %v1656_v2 = vmul.f32 %v4686_v62, %v1632_v30  ;;  %v1669_v8 = vadd.f32 %v3800_v3, %v1662_v1  ;;  %v1686_v30 = vsub.s32 0, %v5503_v55 }
 0xd8e   :  { %v1657_v6 = vmul.f32 %v4688_v63, %v1633_v54 }
 0xd8f   :  { %v1663_v5 = vmul.f32 %v3799_v59, %v1656_v2  ;;  %v1687_v54 = vrot.slane %v1682_v31, %v1686_v30 }
 0xd90   :  { %v1664_v10 = vmul.f32 %v3799_v59, %v1657_v6 }
 0xd91   :  { %v1670_v9 = vadd.f32 %v3800_v3, %v1663_v5 }
 0xd92   :  { %v1671_v51 = vadd.f32 %v3800_v3, %v1664_v10 }
 0xd93   :  { %v1680_v53 = vpack.c.bf16 %v1670_v9, %v1669_v8 }
 0xd94   :  { %v1681_v11 = vpack.c.bf16 %v1671_v51, %v1671_v51 }
 0xd95   :  { %3809 = vmatmul.mubr.msk.bf16.vlgmr.msra.gmra.mrb[32].mxu1 %vm486_vm0, %v1680_v53 }
 0xd96   :  { %1782 = vmatprep.mubr.bf16.mxu1 %v4812_v38 }
 0xd9d   :  { %3810 = vmatmul.mubr.msk.bf16.gmra.mrb[36].mxu1 %vm486_vm0, %v1681_v11 }
 0xe68   :  { %v1774_v60 = vpop.f32.mrb[32].mxu1 }
 0xe69   :  { %v1775_v61 = vadd.f32 %v1774_v60, %v1687_v54  ;;  %v1776_v32 = vpop.f32.mrb[33].mxu1 }
 0xe6a   :  { %v1777_v33 = vadd.f32 %v1776_v32, %v1691_v57  ;;  %v1778_v34 = vpop.f32.mrb[34].mxu1 }
 0xe6b   :  { %v1791_v4 = vmul.f32 %v1775_v61, %v1775_v61  ;;  %v1779_v0 = vadd.f32 %v1778_v34, %v1687_v54  ;;  %v1780_v35 = vpop.f32.mrb[35].mxu1 }
 0xe6c   :  { %v1792_v36 = vmul.f32 %v1777_v33, %v1777_v33  ;;  %v1781_v56 = vadd.f32 %v1780_v35, %v1691_v57 }
 0xe6d   :  { %v1797_v7 = vmul.f32 %v1791_v4, %v1775_v61  ;;  %v1793_v37 = vmul.f32 %v1779_v0, %v1779_v0 }
 0xe6e   :  { %v1798_v39 = vmul.f32 %v1792_v36, %v1777_v33  ;;  %v1794_v40 = vmul.f32 %v1781_v56, %v1781_v56 }
 0xe6f   :  { %v1803_v41 = vmul.f32 0.044715, %v1797_v7  ;;  %v1799_v42 = vmul.f32 %v1793_v37, %v1779_v0 }
 0xe70   :  { %v1804_v43 = vmul.f32 0.044715, %v1798_v39  ;;  %v1800_v45 = vmul.f32 %v1794_v40, %v1781_v56  ;;  %v1784_v46 = vpop.f32.mrb[36].mxu1 }
 0xe71   :  { %v1809_v47 = vadd.f32 %v1803_v41, %v1775_v61  ;;  %v1805_v48 = vmul.f32 0.044715, %v1799_v42  ;;  %v1785_v49 = vadd.f32 %v1784_v46, %v1687_v54  ;;  %v1786_v52 = vpop.f32.mrb[37].mxu1 }
 0xe72   :  { %v1810_v59 = vadd.f32 %v1804_v43, %v1777_v33  ;;  %v1806_v62 = vmul.f32 0.044715, %v1800_v45  ;;  %v1787_v63 = vadd.f32 %v1786_v52, %v1691_v57  ;;  %v1788_v1 = vpop.f32.mrb[38].mxu1 }
 0xe73   :  { %v1815_v2 = vmul.f32 0.7978846, %v1809_v47  ;;  %v1811_v3 = vadd.f32 %v1805_v48, %v1779_v0  ;;  %v1795_v5 = vmul.f32 %v1785_v49, %v1785_v49  ;;  %v1789_v6 = vpop.f32.mrb[39].mxu1 }
 0xe74   :  { %v1816_v8 = vmul.f32 0.7978846, %v1810_v59  ;;  %v1812_v9 = vadd.f32 %v1806_v62, %v1781_v56  ;;  %v1796_v53 = vmul.f32 %v1787_v63, %v1787_v63 }
 0xe75   :  { %4689 = vtanh.f32 %v1815_v2  ;;  %v1817_v10 = vmul.f32 0.7978846, %v1811_v3  ;;  %v1801_v51 = vmul.f32 %v1795_v5, %v1785_v49 }
 0xe76   :  { %4691 = vtanh.f32 %v1816_v8  ;;  %v1818_v11 = vmul.f32 0.7978846, %v1812_v9  ;;  %v1802_v12 = vmul.f32 %v1796_v53, %v1787_v63 }
 0xe77   :  { %4693 = vtanh.f32 %v1817_v10  ;;  %v1807_v50 = vmul.f32 0.044715, %v1801_v51 }
 0xe78   :  { %4695 = vtanh.f32 %v1818_v11  ;;  %v1808_v13 = vmul.f32 0.044715, %v1802_v12 }
 0xe79   :  { %v1813_v14 = vadd.f32 %v1807_v50, %v1785_v49 }
 0xe7a   :  { %v1814_v16 = vadd.f32 %v1808_v13, %v1787_v63 }
 0xe7b   :  { %v1819_v15 = vmul.f32 0.7978846, %v1813_v14 }
 0xe7c   :  { %v1820_v18 = vmul.f32 0.7978846, %v1814_v16 }
 0xe7d   :  { %4697 = vtanh.f32 %v1819_v15 }
 0xe7e   :  { %4699 = vtanh.f32 %v1820_v18 }
 0xe7f   :  { %v4690_v20 = vpop.eup %4689 }
 0xe80   :  { %v4692_v19 = vpop.eup %4691  ;;  %v1827_v23 = vadd.f32 1.0, %v4690_v20 }
 0xe81   :  { %v4694_v24 = vpop.eup %4693  ;;  %v1828_v26 = vadd.f32 1.0, %v4692_v19 }
 0xe82   :  { %v4696_v44 = vpop.eup %4695  ;;  %v1833_v25 = vmul.f32 0.5, %v1827_v23  ;;  %v1829_v27 = vadd.f32 1.0, %v4694_v24 }
 0xe83   :  { %v1830_v29 = vadd.f32 1.0, %v4696_v44  ;;  %v1834_v28 = vmul.f32 0.5, %v1828_v26  ;;  %v4585_v26 = vld [vmem:[%s6022_s5 + $0x20] sm:$0xff]  }
 0xe84   :  { %v1835_v31 = vmul.f32 0.5, %v1829_v27  ;;  %v1839_v57 = vmul.f32 %v1833_v25, %v1775_v61  ;;  %v4586_v44 = vld [vmem:[%s5969_s11 + $0x20] sm:$0xff]   ;;  %4321 = vmatprep.subr.bf16.mxu1 %v4585_v26  ;;  %v4587_v25 = vld [vmem:[%s6022_s5 + $0x28] sm:$0xff]  }
 0xe85   :  { %v1836_v54 = vmul.f32 0.5, %v1830_v29  ;;  %v1840_v34 = vmul.f32 %v1834_v28, %v1777_v33  ;;  %4322 = vmatpush3.bf16.msra.mxu1 %v4585_v26  ;;  %4345 = vmatprep.subr.bf16.mxu0 %v4586_v44  ;;  %v4588_v27 = vld [vmem:[%s5969_s11 + $0x28] sm:$0xff]   ;;  %v4589_v29 = vld [vmem:[%s6022_s5 + $0x30] sm:$0xff]  }
 0xe86   :  { %v1841_v60 = vmul.f32 %v1835_v31, %v1779_v0  ;;  %4323 = vmatprep.subr.bf16.mxu1 %v4587_v25  ;;  %v4590_v28 = vld [vmem:[%s5969_s11 + $0x30] sm:$0xff]   ;;  %v4591_v31 = vld [vmem:[%s6022_s5 + $0x38] sm:$0xff]  }
 0xe87   :  { %v4698_v32 = vpop.eup %4697  ;;  %v1842_v4 = vmul.f32 %v1836_v54, %v1781_v56  ;;  %v3827_v56 = vld [vmem:[%s5978_s20] ss:$0 sm:$0xff]  ;;  %v4592_v54 = vld [vmem:[%s5969_s11 + $0x38] sm:$0xff]  }
 0xe88   :  { %v4700_v35 = vpop.eup %4699  ;;  %v1877_v36 = vpack.c.bf16 %v1841_v60, %v1839_v57  ;;  %v1831_v7 = vadd.f32 1.0, %v4698_v32  ;;  %v4593_v57 = vld [vmem:[%s6023_s30 + $0x20] sm:$0xff]  }
 0xe89   :  { %v1878_v37 = vpack.c.bf16 %v1842_v4, %v1840_v34  ;;  %v1832_v39 = vadd.f32 1.0, %v4700_v35  ;;  %4324 = vmatpush3.bf16.msra.mxu1 %v4587_v25 }
 0xe8a   :  { %v1837_v40 = vmul.f32 0.5, %v1831_v7  ;;  %4325 = vmatprep.subr.bf16.mxu1 %v4589_v29 }
 0xe8b   :  { %2009 = vmatprep.mubr.bf16.mxu0 %v1878_v37  ;;  %v1838_v41 = vmul.f32 0.5, %v1832_v39 }
 0xe8c   :  { %2010 = vmatmul.mubr.bf16.vlgmr.msra.gmra.mrb[32].mxu0 %v1877_v36  ;;  %v1843_v43 = vmul.f32 %v1837_v40, %v1785_v49 }
 0xe8d   :  { %v1844_v42 = vmul.f32 %v1838_v41, %v1787_v63  ;;  %4346 = vmatpush3.bf16.msra.mxu0 %v4586_v44  ;;  %4326 = vmatpush3.bf16.msra.mxu1 %v4589_v29  ;;  %v3828_v41 = vld [vmem:[%s6024_s28 + $0x1] ss:$0 sm:$0xff] }
 0xe8e   :  { %v1879_v46 = vpack.c.bf16 %v1843_v43, %v1843_v43  ;;  %4347 = vmatprep.subr.bf16.mxu0 %v4588_v27  ;;  %4327 = vmatprep.subr.bf16.mxu1 %v4591_v31  ;;  %v3853_v44 = vld [vmem:[%s5968_s10 + $0x1] ss:$0 sm:$0xff] }
 0xe8f   :  { %v1880_v45 = vpack.c.bf16 %v1844_v42, %v1844_v42 }
 0xe91   :  { %2017 = vmatprep.mubr.bf16.mxu0 %v1880_v45  ;;  %4348 = vmatpush3.bf16.msra.mxu0 %v4588_v27 }
 0xe92   :  { %4349 = vmatprep.subr.bf16.mxu0 %v4590_v28  ;;  %4328 = vmatpush3.bf16.msra.mxu1 %v4591_v31 }
 0xe93   :  { %4333 = vmatprep.subr.bf16.mxu1 %v4593_v57 }
 0xe94   :  { %2018 = vmatmul.mubr.bf16.gmra.mrb[36].mxu0 %v1879_v46 }
 0xe95   :  { %4350 = vmatpush3.bf16.msra.mxu0 %v4590_v28 }
 0xe96   :  { %4351 = vmatprep.subr.bf16.mxu0 %v4592_v54 }
 0xe99   :  { %4352 = vmatpush3.bf16.msra.mxu0 %v4592_v54 }
 0xf5f   :  { %v4108_v61 = vpop.f32.mrb[32].mxu0 }
 0xf60   :  { %v4109_v0 = vpop.f32.mrb[33].mxu0 }
 0xf61   :  { %v4110_v47 = vadd.f32 %v4109_v0, %v4108_v61  ;;  %v4111_v33 = vpop.f32.mrb[34].mxu0  ;;  %v3829_v61 = vld [vmem:[%s6025_s2 + $0x1] ss:$0 sm:$0xff]  ;;  %s6031_s2 = smov 16  }
 0xf62   :  { %v4112_v48 = vpop.f32.mrb[35].mxu0 }
 0xf63   :  { %v2025_v52 = vadd.f32 %v4110_v47, %v5402_v17  ;;  %v4113_v59 = vadd.f32 %v4112_v48, %v4111_v33 }
 0xf65   :  { %v5518_v62 = vadd.f32 %v3827_v56, %v2025_v52  ;;  %v2026_v49 = vadd.f32 %v4113_v59, %v5407_v22 }
 0xf67   :  { %v5521_v63 = vadd.f32 %v3827_v56, %v2026_v49  ;;  %v4114_v1 = vpop.f32.mrb[36].mxu0  ;;  %v2038_v2 = vsel %vm486_vm0, %v5518_v62, 0.0 }
 0xf68   :  { %2039 = vadd.xlane.f32.xlu0 %v2038_v2  ;;  %v4115_v3 = vpop.f32.mrb[37].mxu0  ;;  %v4594_v2 = vld [vmem:[%s6023_s30 + $0x28] sm:$0xff]  }
 0xf69   :  { %v4116_v5 = vadd.f32 %v4115_v3, %v4114_v1  ;;  %v4117_v6 = vpop.f32.mrb[38].mxu0  ;;  %v2041_v8 = vsel %vm486_vm0, %v5521_v63, 0.0  ;;  %v4595_v3 = vld [vmem:[%s6023_s30 + $0x30] sm:$0xff]  }
 0xf6a   :  { %2042 = vadd.xlane.f32.xlu1 %v2041_v8  ;;  %v4118_v17 = vpop.f32.mrb[39].mxu0  ;;  %v3838_v6 = vld [vmem:[%s6026_s6 + $0x1] ss:$0 sm:$0xff]  ;;  %s6028_s6 = smov 112  }
 0xf6b   :  { %v2027_v9 = vadd.f32 %v4116_v5, %v5405_v21  ;;  %v4596_v5 = vld [vmem:[%s6023_s30 + $0x38] sm:$0xff]  }
 0xf6d   :  { %v5528_v53 = vadd.f32 %v3827_v56, %v2027_v9  ;;  %v3868_v9 = vld [vmem:[%s5970_s12 + $0x1] ss:$0 sm:$0xff] }
 0xf6f   :  { %v2044_v22 = vsel %vm493_vm1, %v5528_v53, 0.0 }
 0xf70   :  { %2045 = vadd.xlane.f32.xlu0 %v2044_v22 }
 0xff5   :  { %v2040_v10 = vpop.xlane.xlu0 %2039 }
 0xff6   :  { %v2047_v51 = vmul.f32 0.015625, %v2040_v10 }
 0xff7   :  { %v2043_v11 = vpop.xlane.xlu1 %2042 }
 0xff8   :  { %v2050_v12 = vsub.f32 %v5518_v62, %v2047_v51  ;;  %v2048_v50 = vmul.f32 0.015625, %v2043_v11 }
 0xffa   :  { %v2051_v13 = vsub.f32 %v5521_v63, %v2048_v50  ;;  %v2053_v14 = vmul.f32 %v2050_v12, %v2050_v12 }
 0xffc   :  { %v2056_v16 = vsel %vm486_vm0, %v2053_v14, 0.0  ;;  %v2054_v15 = vmul.f32 %v2051_v13, %v2051_v13 }
 0xffd   :  { %2057 = vadd.xlane.f32.xlu1 %v2056_v16  ;;  %v2046_v21 = vpop.xlane.xlu0 %2045 }
 0xffe   :  { %v2049_v18 = vmul.f32 0.015625, %v2046_v21  ;;  %v2059_v20 = vsel %vm486_vm0, %v2054_v15, 0.0 }
 0xfff   :  { %2060 = vadd.xlane.f32.xlu0 %v2059_v20 }
0x1000   :  { %v2052_v19 = vsub.f32 %v5528_v53, %v2049_v18 }
0x1002   :  { %v2055_v23 = vmul.f32 %v2052_v19, %v2052_v19 }
0x1004   :  { %v2062_v24 = vsel %vm493_vm1, %v2055_v23, 0.0 }
0x1005   :  { %2063 = vadd.xlane.f32.xlu1 %v2062_v24 }
0x108a   :  { %v2058_v60 = vpop.xlane.xlu1 %2057 }
0x108b   :  { %v2065_v32 = vmul.f32 0.015625, %v2058_v60 }
0x108c   :  { %v2061_v34 = vpop.xlane.xlu0 %2060 }
0x108d   :  { %v2068_v4 = vadd.f32 1e-06, %v2065_v32  ;;  %v2066_v35 = vmul.f32 0.015625, %v2061_v34 }
0x108f   :  { %4701 = vrsqrt.f32 %v2068_v4  ;;  %v2069_v36 = vadd.f32 1e-06, %v2066_v35 }
0x1091   :  { %4703 = vrsqrt.f32 %v2069_v36 }
0x1092   :  { %v2064_v7 = vpop.xlane.xlu1 %2063 }
0x1093   :  { %v2067_v37 = vmul.f32 0.015625, %v2064_v7 }
0x1095   :  { %v2070_v39 = vadd.f32 1e-06, %v2067_v37 }
0x1097   :  { %4705 = vrsqrt.f32 %v2070_v39 }
0x1099   :  { %v4702_v40 = vpop.eup %4701 }
0x109a   :  { %v2074_v42 = vmul.f32 %v4702_v40, %v2050_v12 }
0x109b   :  { %v4704_v43 = vpop.eup %4703 }
0x109c   :  { %v2075_v45 = vmul.f32 %v4704_v43, %v2051_v13  ;;  %v2081_v46 = vmul.f32 %v3828_v41, %v2074_v42 }
0x109e   :  { %v2082_v0 = vmul.f32 %v3828_v41, %v2075_v45  ;;  %v2088_v47 = vadd.f32 %v3829_v61, %v2081_v46 }
0x10a0   :  { %v2089_v33 = vadd.f32 %v3829_v61, %v2082_v0 }
0x10a1   :  { %v4706_v56 = vpop.eup %4705 }
0x10a2   :  { %v2076_v48 = vmul.f32 %v4706_v56, %v2052_v19  ;;  %v2100_v52 = vpack.c.bf16 %v2089_v33, %v2088_v47  ;;  %v5648_v56 = vld [vmem:[%s6027_s0 + $0x10] sm:$0xf] }
0x10a4   :  { %v2083_v59 = vmul.f32 %v3828_v41, %v2076_v48  ;;  %4329 = vmatprep.mubr.msk.bf16.mxu1 %vm486_vm0, %v2100_v52  ;;  %4353 = vmatprep.mubr.msk.bf16.mxu0 %vm486_vm0, %v2100_v52 }
0x10a6   :  { %v2090_v49 = vadd.f32 %v3829_v61, %v2083_v59  ;;  %v5642_v61 = vld [vmem:[%s6027_s0] sm:$0xff] }
0x10a8   :  { %v2101_v1 = vpack.c.bf16 %v2090_v49, %v2090_v49 }
0x10aa   :  { %4330 = vmatmul.mubr.msk.bf16.vlgmr.msra.gmra.mrb[40].mxu1 %vm486_vm0, %v2101_v1  ;;  %4354 = vmatmul.mubr.msk.bf16.vlgmr.msra.gmra.mrb[40].mxu0 %vm486_vm0, %v2101_v1 }
0x10ab   :  { %4334 = vmatpush3.bf16.msra.mxu1 %v4593_v57  ;;  %4341 = vmatprep.mubr.msk.bf16.mxu1 %vm486_vm0, %v2100_v52  ;;  %v5654_v52 = vld [vmem:[%s6027_s0 + $0x8] sm:$0xff]  ;;  %s6029_s0 = smov 96  }
0x10ac   :  { %4335 = vmatprep.subr.bf16.mxu1 %v4594_v2 }
0x10af   :  { %4336 = vmatpush3.bf16.msra.mxu1 %v4594_v2 }
0x10b0   :  { %4337 = vmatprep.subr.bf16.mxu1 %v4595_v3 }
0x10b3   :  { %4338 = vmatpush3.bf16.msra.mxu1 %v4595_v3 }
0x10b4   :  { %4339 = vmatprep.subr.bf16.mxu1 %v4596_v5 }
0x10b7   :  { %4340 = vmatpush3.bf16.msra.mxu1 %v4596_v5 }
0x10ba   :  { %4342 = vmatmul.mubr.msk.bf16.vlgmr.msra.gmra.mrb[44].mxu1 %vm486_vm0, %v2101_v1 }
0x117d   :  { %v4331_v8 = vpop.f32.mrb[40].mxu1  ;;  %v4355_v17 = vpop.f32.mrb[40].mxu0 }
0x117e   :  { %v2171_v22 = vpop.f32.mrb[41].mxu1  ;;  %v2346_v10 = vpop.f32.mrb[41].mxu0  ;;  %v2355_v14 = vadd.f32 %v4355_v17, %v3868_v9  ;;  %v2180_v31 = vadd.f32 %v4331_v8, %v3838_v6 }
0x117f   :  { %v2172_v51 = vadd.f32 %v3838_v6, %v2171_v22  ;;  %v4332_v11 = vpop.f32.mrb[42].mxu1  ;;  %v4356_v12 = vpop.f32.mrb[42].mxu0  ;;  %v2347_v16 = vadd.f32 %v3868_v9, %v2346_v10 }
0x1180   :  { %v2174_v50 = vpop.f32.mrb[43].mxu1  ;;  %v2349_v13 = vpop.f32.mrb[43].mxu0  ;;  %v5594_v23 = vpack.c.bf16 %v2355_v14, %v2355_v14  ;;  %v2187_v4 = vmul.f32 0.25, %v2180_v31 }
0x1181   :  { %v2175_v15 = vadd.f32 %v3838_v6, %v2174_v50  ;;  %v2350_v21 = vadd.f32 %v3868_v9, %v2349_v13  ;;  %v2185_v18 = vmul.f32 0.25, %v2172_v51 }
0x1182   :  { %v2468_v26 = vsel %vm918_vm3, %v5594_v23, 0  ;;  %v5625_v36 = vpack.c.bf16 %v2187_v4, %v2187_v4 }
0x1183   :  { %v2186_v20 = vmul.f32 0.25, %v2175_v15  ;;  %v5592_v19 = vpack.c.bf16 %v2350_v21, %v2347_v16 }
0x1185   :  { %v5596_v24 = vpack.c.bf16 %v2186_v20, %v2185_v18  ;;  %4365 = vmatprep.subr.bf16.mxu0 %v5592_v19 }
0x1186   :  { %4366 = vmatpush3.bf16.msra.mxu0 %v5592_v19 }
0x1187   :  { %4361 = vmatprep.mubr.msk.bf16.mxu1 %vm812_vm2, %v5596_v24  ;;  %4459 = vmatprep.subr.msk.bf16.mxu0 %vm918_vm3, %v5594_v23 }
0x118a   :  { %4368 = vmatpush3.bf16.msra.mxu0 %v2468_v26 }
0x118d   :  { %v4343_v25 = vpop.f32.mrb[44].mxu1 }
0x118e   :  { %v2269_v27 = vadd.f32 %v4343_v25, %v3853_v44  ;;  %v2260_v29 = vpop.f32.mrb[45].mxu1 }
0x118f   :  { %v4344_v28 = vpop.f32.mrb[46].mxu1  ;;  %v2261_v60 = vadd.f32 %v3853_v44, %v2260_v29 }
0x1190   :  { %v5609_v54 = vpack.c.bf16 %v2269_v27, %v2269_v27  ;;  %v2263_v57 = vpop.f32.mrb[47].mxu1 }
0x1191   :  { %v2264_v32 = vadd.f32 %v3853_v44, %v2263_v57 }
0x1192   :  { %2528 = vrot.lane.b32.xlu1 %v5609_v54, %s6028_s6  ;;  %v2374_v7 = vsel %vm812_vm2, %v5609_v54, 0 }
0x1193   :  { %v5613_v34 = vpack.c.bf16 %v2264_v32, %v2261_v60 }
0x1195   :  { %2526 = vrot.lane.b32.xlu0 %v5613_v34, %s6028_s6  ;;  %4457 = vmatprep.subr.msk.bf16.mxu1 %vm812_vm2, %v5613_v34  ;;  %v2371_v35 = vsel %vm812_vm2, %v5613_v34, 0 }
0x1196   :  { %4358 = vmatpush3.bf16.xpose.msra.mxu1 %v2371_v35  ;;  %2520 = vrot.lane.b32.xlu1 %v5596_v24, %s6028_s6 }
0x1197   :  { %4458 = vmatprep.subr.msk.bf16.mxu1 %vm812_vm2, %v5609_v54 }
0x119a   :  { %2522 = vrot.lane.b32.xlu1 %v5625_v36, %s6028_s6 }
0x119e   :  { %4360 = vmatpush3.bf16.xpose.msra.mxu1 %v2374_v7 }
0x11a5   :  { %4362 = vmatmul.mubr.msk.bf16.vlgmr.msra.gmra.mrb[48].mxu1 %vm812_vm2, %v5625_v36 }
0x1204   :  { %v2529_v37 = vpop.permute.xlu1 %2528 }
0x1205   :  { %v2540_v42 = vsel %vm812_vm2, %v2529_v37, 0 }
0x1207   :  { %v2527_v39 = vpop.permute.xlu0 %2526 }
0x1208   :  { %v2537_v40 = vsel %vm812_vm2, %v2527_v39, 0  ;;  %4460 = vmatprep.subr.msk.bf16.mxu1 %vm812_vm2, %v2527_v39  ;;  %v2521_v41 = vpop.permute.xlu1 %2520 }
0x1209   :  { %4374 = vmatpush3.bf16.xpose.msra.mxu1 %v2537_v40  ;;  %4377 = vmatprep.mubr.msk.bf16.mxu1 %vm812_vm2, %v2521_v41 }
0x120a   :  { %4461 = vmatprep.subr.msk.bf16.mxu1 %vm812_vm2, %v2529_v37 }
0x120c   :  { %v2523_v43 = vpop.permute.xlu1 %2522 }
0x1211   :  { %4376 = vmatpush3.bf16.xpose.msra.mxu1 %v2540_v42 }
0x1218   :  { %4378 = vmatmul.mubr.msk.bf16.vlgmr.msra.gmra.mrb[52].mxu1 %vm812_vm2, %v2523_v43 }
0x1278   :  { %v4363_v45 = vpop.f32.mrb[48].mxu1 }
0x1279   :  { %v2410_v46 = vpop.f32.mrb[49].mxu1  ;;  %v2419_v48 = vadd.f32 %v5648_v56, %v4363_v45 }
0x127a   :  { %v2411_v0 = vadd.f32 %v5642_v61, %v2410_v46  ;;  %v4364_v47 = vpop.f32.mrb[50].mxu1 }
0x127b   :  { %v2413_v33 = vpop.f32.mrb[51].mxu1  ;;  %v2430_v2 = vsel %vm880_vm5, %v2419_v48, -inf }
0x127c   :  { %v2414_v59 = vadd.f32 %v5654_v52, %v2413_v33  ;;  %v2424_v49 = vsel %vm873_vm4, %v2411_v0, -inf }
0x127d   :  { %2425 = vmax.xlane.f32.xlu0 %v2424_v49 }
0x127e   :  { %v2427_v1 = vsel %vm873_vm4, %v2414_v59, -inf }
0x127f   :  { %2428 = vmax.xlane.f32.xlu1 %v2427_v1 }
0x1281   :  { %2431 = vmax.xlane.f32.xlu0 %v2430_v2 }
0x12eb   :  { %v4379_v3 = vpop.f32.mrb[52].mxu1 }
0x12ec   :  { %v2585_v5 = vadd.f32 %v5648_v56, %v4379_v3  ;;  %v2576_v6 = vpop.f32.mrb[53].mxu1 }
0x12ed   :  { %v2577_v8 = vadd.f32 %v5642_v61, %v2576_v6  ;;  %v4380_v17 = vpop.f32.mrb[54].mxu1 }
0x12ee   :  { %v2579_v9 = vpop.f32.mrb[55].mxu1  ;;  %v2596_v22 = vsel %vm880_vm5, %v2585_v5, -inf }
0x12ef   :  { %v2580_v10 = vadd.f32 %v5654_v52, %v2579_v9  ;;  %2597 = vmax.xlane.f32.xlu1 %v2596_v22  ;;  %v2590_v51 = vsel %vm873_vm4, %v2577_v8, -inf }
0x12f0   :  { %2591 = vmax.xlane.f32.xlu0 %v2590_v51 }
0x12f1   :  { %v2593_v11 = vsel %vm873_vm4, %v2580_v10, -inf }
0x12f4   :  { %2594 = vmax.xlane.f32.xlu0 %v2593_v11 }
0x130a   :  { %v2426_v12 = vpop.xlane.xlu0 %2425 }
0x130b   :  { %v2433_v13 = vsub.f32 %v2411_v0, %v2426_v12 }
0x130c   :  { %v2429_v50 = vpop.xlane.xlu1 %2428 }
0x130d   :  { %v2434_v14 = vsub.f32 %v2414_v59, %v2429_v50  ;;  %v2436_v18 = vmul.f32 1.442695, %v2433_v13 }
0x130e   :  { %v2432_v16 = vpop.xlane.xlu0 %2431 }
0x130f   :  { %v2438_v15 = vmul.f32 1.442695, %v2434_v14  ;;  %v2435_v21 = vsub.f32 %v2419_v48, %v2432_v16 }
0x1311   :  { %4707 = vpow2.f32 %v2438_v15  ;;  %v2440_v20 = vmul.f32 1.442695, %v2435_v21 }
0x1313   :  { %4709 = vpow2.f32 %v2440_v20 }
0x1314   :  { %4711 = vpow2.f32 %v2436_v18 }
0x131b   :  { %v4708_v26 = vpop.eup %4707 }
0x131c   :  { %v2445_v44 = vsel %vm873_vm4, %v4708_v26, 0.0 }
0x131d   :  { %v4710_v25 = vpop.eup %4709  ;;  %2446 = vadd.xlane.f32.xlu1 %v2445_v44 }
0x131e   :  { %v2448_v27 = vsel %vm880_vm5, %v4710_v25, 0.0  ;;  %v4712_v29 = vpop.eup %4711 }
0x131f   :  { %2449 = vadd.xlane.f32.xlu0 %v2448_v27  ;;  %v2442_v28 = vsel %vm873_vm4, %v4712_v29, 0.0 }
0x1323   :  { %2443 = vadd.xlane.f32.xlu0 %v2442_v28 }
0x137c   :  { %v2598_v31 = vpop.xlane.xlu1 %2597 }
0x137d   :  { %v2601_v57 = vsub.f32 %v2585_v5, %v2598_v31  ;;  %v2592_v60 = vpop.xlane.xlu0 %2591 }
0x137e   :  { %v2599_v32 = vsub.f32 %v2577_v8, %v2592_v60 }
0x137f   :  { %v2606_v4 = vmul.f32 1.442695, %v2601_v57 }
0x1380   :  { %v2602_v35 = vmul.f32 1.442695, %v2599_v32 }
0x1381   :  { %4713 = vpow2.f32 %v2606_v4  ;;  %v2595_v7 = vpop.xlane.xlu0 %2594 }
0x1382   :  { %v2600_v37 = vsub.f32 %v2580_v10, %v2595_v7  ;;  %4715 = vpow2.f32 %v2602_v35 }
0x1384   :  { %v2604_v39 = vmul.f32 1.442695, %v2600_v37 }
0x1386   :  { %4717 = vpow2.f32 %v2604_v39 }
0x138b   :  { %v4714_v40 = vpop.eup %4713 }
0x138c   :  { %v2614_v41 = vsel %vm880_vm5, %v4714_v40, 0.0  ;;  %v4716_v42 = vpop.eup %4715 }
0x138d   :  { %2615 = vadd.xlane.f32.xlu1 %v2614_v41  ;;  %v2608_v45 = vsel %vm873_vm4, %v4716_v42, 0.0 }
0x1390   :  { %v4718_v43 = vpop.eup %4717 }
0x1391   :  { %2609 = vadd.xlane.f32.xlu1 %v2608_v45  ;;  %v2611_v46 = vsel %vm873_vm4, %v4718_v43, 0.0 }
0x1392   :  { %2612 = vadd.xlane.f32.xlu0 %v2611_v46 }
0x13a2   :  { %2629 = vrot.lane.b32.xlu1 %v5594_v23, %s6028_s6 }
0x13a6   :  { %2693 = vrot.lane.b32.xlu1 %v5613_v34, %s6029_s0 }
0x13a8   :  { %2627 = vrot.lane.b32.xlu0 %v5592_v19, %s6028_s6  ;;  %s6033_s6 = smov 48  }
0x13aa   :  { %2695 = vrot.lane.b32.xlu1 %v5609_v54, %s6029_s0  ;;  %v2447_v0 = vpop.xlane.xlu1 %2446 }
0x13ac   :  { %2689 = vrot.lane.b32.xlu0 %v5596_v24, %s6029_s0  ;;  %v2450_v47 = vpop.xlane.xlu0 %2449 }
0x13ad   :  { %4719 = vrcp.f32 %v2450_v47 }
0x13ae   :  { %2691 = vrot.lane.b32.xlu1 %v5625_v36, %s6029_s0  ;;  %4721 = vrcp.f32 %v2447_v0 }
0x13b0   :  { %v2444_v33 = vpop.xlane.xlu0 %2443 }
0x13b1   :  { %4723 = vrcp.f32 %v2444_v33 }
0x13b7   :  { %v4720_v48 = vpop.eup %4719 }
0x13b8   :  { %v4722_v59 = vpop.eup %4721  ;;  %v2456_v1 = vmul.f32 %v4720_v48, %v4710_v25 }
0x13b9   :  { %v2454_v3 = vmul.f32 %v4722_v59, %v4708_v26 }
0x13ba   :  { %v2458_v6 = vpack.c.bf16 %v2456_v1, %v2456_v1 }
0x13bb   :  { %v4724_v49 = vpop.eup %4723 }
0x13bc   :  { %v2452_v2 = vmul.f32 %v4724_v49, %v4712_v29 }
0x13be   :  { %v2457_v5 = vpack.c.bf16 %v2454_v3, %v2452_v2 }
0x13c0   :  { %4369 = vmatprep.mubr.msk.bf16.mxu0 %vm873_vm4, %v2457_v5 }
0x13c1   :  { %4370 = vmatmul.mubr.msk.bf16.vlgmr.msra.gmra.mrb[44].mxu0 %vm873_vm4, %v2458_v6 }
0x141a   :  { %v2616_v8 = vpop.xlane.xlu1 %2615 }
0x141b   :  { %4725 = vrcp.f32 %v2616_v8 }
0x141e   :  { %v2610_v17 = vpop.xlane.xlu1 %2609 }
0x141f   :  { %4727 = vrcp.f32 %v2610_v17  ;;  %v2613_v9 = vpop.xlane.xlu0 %2612 }
0x1420   :  { %4729 = vrcp.f32 %v2613_v9 }
0x1422   :  { %v2630_v22 = vpop.permute.xlu1 %2629 }
0x1423   :  { %v2628_v10 = vpop.permute.xlu0 %2627  ;;  %v2639_v11 = vsel %vm918_vm3, %v2630_v22, 0 }
0x1424   :  { %4381 = vmatprep.subr.bf16.mxu0 %v2628_v10 }
0x1425   :  { %4382 = vmatpush3.bf16.msra.mxu0 %v2628_v10  ;;  %v4726_v51 = vpop.eup %4725 }
0x1426   :  { %4462 = vmatprep.subr.msk.bf16.mxu0 %vm918_vm3, %v2630_v22  ;;  %v2694_v50 = vpop.permute.xlu1 %2693  ;;  %v2622_v14 = vmul.f32 %v4726_v51, %v4714_v40 }
0x1427   :  { %v2690_v20 = vpop.permute.xlu0 %2689  ;;  %v2704_v26 = vsel %vm812_vm2, %v2694_v50, 0 }
0x1428   :  { %v2624_v18 = vpack.c.bf16 %v2622_v14, %v2622_v14 }
0x1429   :  { %v4728_v12 = vpop.eup %4727  ;;  %4384 = vmatpush3.bf16.msra.mxu0 %v2639_v11 }
0x142a   :  { %v4730_v13 = vpop.eup %4729  ;;  %4463 = vmatprep.subr.msk.bf16.mxu0 %vm812_vm2, %v2694_v50  ;;  %v2618_v16 = vmul.f32 %v4728_v12, %v4716_v42  ;;  %v2696_v44 = vpop.permute.xlu1 %2695 }
0x142b   :  { %v2620_v15 = vmul.f32 %v4730_v13, %v4718_v43  ;;  %v2707_v25 = vsel %vm812_vm2, %v2696_v44, 0 }
0x142d   :  { %v2623_v21 = vpack.c.bf16 %v2620_v15, %v2618_v16 }
0x142e   :  { %v2692_v27 = vpop.permute.xlu1 %2691 }
0x142f   :  { %4385 = vmatprep.mubr.msk.bf16.mxu0 %vm873_vm4, %v2623_v21 }
0x1430   :  { %4386 = vmatmul.mubr.msk.bf16.vlgmr.msra.gmra.mrb[48].mxu0 %vm873_vm4, %v2624_v18 }
0x1431   :  { %4393 = vmatprep.mubr.msk.bf16.mxu0 %vm812_vm2, %v2690_v20 }
0x1432   :  { %4390 = vmatpush3.bf16.xpose.msra.mxu0 %v2704_v26 }
0x1433   :  { %4464 = vmatprep.subr.msk.bf16.mxu0 %vm812_vm2, %v2696_v44 }
0x143a   :  { %4392 = vmatpush3.bf16.xpose.msra.mxu0 %v2707_v25 }
0x1441   :  { %4394 = vmatmul.mubr.msk.bf16.vlgmr.msra.gmra.mrb[52].mxu0 %vm812_vm2, %v2692_v27 }
0x1494   :  { %v5696_v29 = vpop.f32.mrb[44].mxu0 }
0x1495   :  { %v5698_v28 = vpop.f32.mrb[45].mxu0 }
0x1496   :  { %v4372_v31 = vpop.f32.mrb[46].mxu0 }
0x1497   :  { %v5700_v57 = vpop.f32.mrb[47].mxu0 }
0x1503   :  { %v5702_v60 = vpop.f32.mrb[48].mxu0 }
0x1504   :  { %v5704_v32 = vpop.f32.mrb[49].mxu0 }
0x1505   :  { %v4388_v4 = vpop.f32.mrb[50].mxu0 }
0x1506   :  { %v5706_v35 = vpop.f32.mrb[51].mxu0 }
0x1507   :  { %v4494_v7 = vpack.i.bf16 %v5706_v35, %v5704_v32 }
0x1514   :  { %v4395_v37 = vpop.f32.mrb[52].mxu0 }
0x1515   :  { %v2743_v39 = vpop.f32.mrb[53].mxu0  ;;  %v2752_v43 = vadd.f32 %v5648_v56, %v4395_v37 }
0x1516   :  { %v2744_v40 = vadd.f32 %v5642_v61, %v2743_v39  ;;  %v4396_v41 = vpop.f32.mrb[54].mxu0 }
0x1517   :  { %v2746_v42 = vpop.f32.mrb[55].mxu0  ;;  %v2763_v47 = vsel %vm880_vm5, %v2752_v43, -inf }
0x1518   :  { %v2747_v45 = vadd.f32 %v5654_v52, %v2746_v42  ;;  %v2757_v46 = vsel %vm873_vm4, %v2744_v40, -inf }
0x1519   :  { %2758 = vmax.xlane.f32.xlu0 %v2757_v46 }
0x151a   :  { %v2760_v0 = vsel %vm873_vm4, %v2747_v45, -inf }
0x151b   :  { %2761 = vmax.xlane.f32.xlu1 %v2760_v0 }
0x151d   :  { %2764 = vmax.xlane.f32.xlu0 %v2763_v47 }
0x15a6   :  { %v2759_v33 = vpop.xlane.xlu0 %2758 }
0x15a7   :  { %v2766_v48 = vsub.f32 %v2744_v40, %v2759_v33 }
0x15a8   :  { %v2762_v59 = vpop.xlane.xlu1 %2761 }
0x15a9   :  { %v2769_v49 = vmul.f32 1.442695, %v2766_v48  ;;  %v2767_v1 = vsub.f32 %v2747_v45, %v2762_v59 }
0x15aa   :  { %v2765_v2 = vpop.xlane.xlu0 %2764 }
0x15ab   :  { %4731 = vpow2.f32 %v2769_v49  ;;  %v2771_v3 = vmul.f32 1.442695, %v2767_v1  ;;  %v2768_v5 = vsub.f32 %v2752_v43, %v2765_v2 }
0x15ad   :  { %4733 = vpow2.f32 %v2771_v3  ;;  %v2773_v6 = vmul.f32 1.442695, %v2768_v5 }
0x15af   :  { %4735 = vpow2.f32 %v2773_v6 }
0x15b5   :  { %v4732_v8 = vpop.eup %4731 }
0x15b6   :  { %v2775_v17 = vsel %vm873_vm4, %v4732_v8, 0.0 }
0x15b7   :  { %v4734_v9 = vpop.eup %4733  ;;  %2776 = vadd.xlane.f32.xlu0 %v2775_v17 }
0x15b8   :  { %v2778_v10 = vsel %vm873_vm4, %v4734_v9, 0.0 }
0x15b9   :  { %v4736_v22 = vpop.eup %4735 }
0x15ba   :  { %v2781_v51 = vsel %vm880_vm5, %v4736_v22, 0.0 }
0x15bb   :  { %2779 = vadd.xlane.f32.xlu0 %v2778_v10  ;;  %2782 = vadd.xlane.f32.xlu1 %v2781_v51 }
0x15cc   :  { %2794 = vrot.lane.b32.xlu1 %v5594_v23, %s6029_s0 }
0x15d0   :  { %2858 = vrot.lane.b32.xlu1 %v5613_v34, %s6030_s25 }
0x15d1   :  { %2792 = vrot.lane.b32.xlu0 %v5592_v19, %s6029_s0 }
0x15d4   :  { %2860 = vrot.lane.b32.xlu1 %v5609_v54, %s6030_s25 }
0x15d5   :  { %2854 = vrot.lane.b32.xlu0 %v5596_v24, %s6030_s25 }
0x15d8   :  { %2856 = vrot.lane.b32.xlu1 %v5625_v36, %s6030_s25 }
0x1644   :  { %v2777_v11 = vpop.xlane.xlu0 %2776 }
0x1645   :  { %4737 = vrcp.f32 %v2777_v11 }
0x1648   :  { %v2783_v12 = vpop.xlane.xlu1 %2782  ;;  %v2780_v50 = vpop.xlane.xlu0 %2779 }
0x1649   :  { %4739 = vrcp.f32 %v2783_v12 }
0x164a   :  { %4741 = vrcp.f32 %v2780_v50 }
0x164c   :  { %v2795_v13 = vpop.permute.xlu1 %2794  ;;  %v2793_v34 = vpop.permute.xlu0 %2792 }
0x164d   :  { %4397 = vmatprep.subr.bf16.mxu1 %v2793_v34  ;;  %v2804_v54 = vsel %vm918_vm3, %v2795_v13, 0 }
0x164e   :  { %4398 = vmatpush3.bf16.msra.mxu1 %v2793_v34 }
0x164f   :  { %4465 = vmatprep.subr.msk.bf16.mxu1 %vm918_vm3, %v2795_v13  ;;  %v4738_v14 = vpop.eup %4737 }
0x1650   :  { %v2859_v16 = vpop.permute.xlu1 %2858  ;;  %v2785_v21 = vmul.f32 %v4738_v14, %v4732_v8  ;;  %v2855_v25 = vpop.permute.xlu0 %2854 }
0x1651   :  { %v2869_v44 = vsel %vm812_vm2, %v2859_v16, 0 }
0x1652   :  { %4400 = vmatpush3.bf16.msra.mxu1 %v2804_v54 }
0x1653   :  { %v4740_v24 = vpop.eup %4739  ;;  %4466 = vmatprep.subr.msk.bf16.mxu1 %vm812_vm2, %v2859_v16 }
0x1654   :  { %v4742_v36 = vpop.eup %4741  ;;  %v2789_v15 = vmul.f32 %v4740_v24, %v4736_v22  ;;  %v2861_v27 = vpop.permute.xlu1 %2860 }
0x1655   :  { %v2787_v18 = vmul.f32 %v4742_v36, %v4734_v9  ;;  %v2872_v31 = vsel %vm812_vm2, %v2861_v27, 0 }
0x1656   :  { %v2791_v20 = vpack.c.bf16 %v2789_v15, %v2789_v15  ;;  %v4597_v15 = vld [vmem:[%s5971_s13 + $0x20] sm:$0xff]  }
0x1657   :  { %v2790_v26 = vpack.c.bf16 %v2787_v18, %v2785_v21  ;;  %v4598_v21 = vld [vmem:[%s5971_s13 + $0x28] sm:$0xff]   ;;  %v4599_v18 = vld [vmem:[%s5971_s13 + $0x30] sm:$0xff]  }
0x1658   :  { %v2857_v4 = vpop.permute.xlu1 %2856 }
0x1659   :  { %4401 = vmatprep.mubr.msk.bf16.mxu1 %vm873_vm4, %v2790_v26 }
0x165a   :  { %4402 = vmatmul.mubr.msk.bf16.vlgmr.msra.gmra.mrb[56].mxu1 %vm873_vm4, %v2791_v20  ;;  %v4600_v20 = vld [vmem:[%s5971_s13 + $0x38] sm:$0xff]  }
0x165b   :  { %4409 = vmatprep.mubr.msk.bf16.mxu1 %vm812_vm2, %v2855_v25  ;;  %4406 = vmatpush3.bf16.xpose.msra.mxu1 %v2869_v44 }
0x165c   :  { %4467 = vmatprep.subr.msk.bf16.mxu1 %vm812_vm2, %v2861_v27 }
0x1663   :  { %4408 = vmatpush3.bf16.xpose.msra.mxu1 %v2872_v31 }
0x166a   :  { %4410 = vmatmul.mubr.msk.bf16.vlgmr.msra.gmra.mrb[60].mxu1 %vm812_vm2, %v2857_v4 }
0x166b   :  { %3321 = vmatprep.mubr.bf16.mxu1 %v4812_v38 }
0x172d   :  { %v4403_v37 = vpop.f32.mrb[56].mxu1 }
0x172e   :  { %v2840_v39 = vpop.f32.mrb[57].mxu1 }
0x172f   :  { %v4404_v40 = vpop.f32.mrb[58].mxu1 }
0x1730   :  { %v2843_v41 = vpop.f32.mrb[59].mxu1 }
0x1731   :  { %v4499_v42 = vpack.i.bf16 %v2843_v41, %v2840_v39 }
0x173d   :  { %v4411_v43 = vpop.f32.mrb[60].mxu1 }
0x173e   :  { %v2908_v45 = vpop.f32.mrb[61].mxu1  ;;  %v2917_v33 = vadd.f32 %v5648_v56, %v4411_v43 }
0x173f   :  { %v2909_v46 = vadd.f32 %v5642_v61, %v2908_v45  ;;  %v4412_v0 = vpop.f32.mrb[62].mxu1 }
0x1740   :  { %v2911_v47 = vpop.f32.mrb[63].mxu1  ;;  %v2928_v1 = vsel %vm880_vm5, %v2917_v33, -inf }
0x1741   :  { %v2912_v48 = vadd.f32 %v5654_v52, %v2911_v47  ;;  %v2922_v59 = vsel %vm873_vm4, %v2909_v46, -inf }
0x1742   :  { %2923 = vmax.xlane.f32.xlu0 %v2922_v59 }
0x1743   :  { %v2925_v49 = vsel %vm873_vm4, %v2912_v48, -inf }
0x1744   :  { %2926 = vmax.xlane.f32.xlu1 %v2925_v49 }
0x1746   :  { %2929 = vmax.xlane.f32.xlu0 %v2928_v1 }
0x17cf   :  { %v2924_v2 = vpop.xlane.xlu0 %2923 }
0x17d0   :  { %v2931_v3 = vsub.f32 %v2909_v46, %v2924_v2 }
0x17d1   :  { %v2927_v5 = vpop.xlane.xlu1 %2926 }
0x17d2   :  { %v2934_v6 = vmul.f32 1.442695, %v2931_v3  ;;  %v2932_v61 = vsub.f32 %v2912_v48, %v2927_v5 }
0x17d3   :  { %v2930_v8 = vpop.xlane.xlu0 %2929 }
0x17d4   :  { %4743 = vpow2.f32 %v2934_v6  ;;  %v2936_v17 = vmul.f32 1.442695, %v2932_v61  ;;  %v2933_v56 = vsub.f32 %v2917_v33, %v2930_v8  ;;  %v3905_v8 = vld [vmem:[%s5972_s14 + $0x1] ss:$0 sm:$0xff] }
0x17d6   :  { %4745 = vpow2.f32 %v2936_v17  ;;  %v2938_v52 = vmul.f32 1.442695, %v2933_v56 }
0x17d8   :  { %4747 = vpow2.f32 %v2938_v52 }
0x17de   :  { %v4744_v9 = vpop.eup %4743 }
0x17df   :  { %v2940_v22 = vsel %vm873_vm4, %v4744_v9, 0.0 }
0x17e0   :  { %v4746_v10 = vpop.eup %4745  ;;  %2941 = vadd.xlane.f32.xlu0 %v2940_v22 }
0x17e1   :  { %v2943_v11 = vsel %vm873_vm4, %v4746_v10, 0.0 }
0x17e2   :  { %v4748_v51 = vpop.eup %4747 }
0x17e3   :  { %v2946_v12 = vsel %vm880_vm5, %v4748_v51, 0.0 }
0x17e4   :  { %2944 = vadd.xlane.f32.xlu0 %v2943_v11  ;;  %2947 = vadd.xlane.f32.xlu1 %v2946_v12 }
0x17f5   :  { %2959 = vrot.lane.b32.xlu1 %v5594_v23, %s6030_s25 }
0x17f9   :  { %4495 = vrot.lane.b32.xlu1 %v4494_v7, %s6031_s2 }
0x17fa   :  { %2957 = vrot.lane.b32.xlu0 %v5592_v19, %s6030_s25 }
0x17fd   :  { %3026 = vrot.lane.b32.xlu1 %v5702_v60, %s6031_s2 }
0x17fe   :  { %4500 = vrot.lane.b32.xlu0 %v4499_v42, %s6032_s27 }
0x1801   :  { %3038 = vrot.lane.b32.xlu1 %v4403_v37, %s6032_s27 }
0x186d   :  { %v2942_v50 = vpop.xlane.xlu0 %2941 }
0x186e   :  { %4749 = vrcp.f32 %v2942_v50 }
0x1871   :  { %v2948_v13 = vpop.xlane.xlu1 %2947  ;;  %v2945_v34 = vpop.xlane.xlu0 %2944 }
0x1872   :  { %4751 = vrcp.f32 %v2948_v13 }
0x1873   :  { %4753 = vrcp.f32 %v2945_v34 }
0x1875   :  { %v2958_v23 = vpop.permute.xlu0 %2957  ;;  %v2960_v32 = vpop.permute.xlu1 %2959 }
0x1876   :  { %4413 = vmatprep.subr.bf16.mxu0 %v2958_v23  ;;  %v2969_v19 = vsel %vm918_vm3, %v2960_v32, 0 }
0x1877   :  { %4414 = vmatpush3.bf16.msra.mxu0 %v2958_v23 }
0x1878   :  { %4468 = vmatprep.subr.msk.bf16.mxu0 %vm918_vm3, %v2960_v32  ;;  %v4750_v35 = vpop.eup %4749 }
0x1879   :  { %v2950_v14 = vmul.f32 %v4750_v35, %v4744_v9  ;;  %v4496_v4 = vpop.permute.xlu1 %4495  ;;  %v4501_v41 = vpop.permute.xlu0 %4500 }
0x187a   :  { %v4498_v39 = vunpack.i.h.bf16 %v4496_v4  ;;  %v4497_v40 = vunpack.i.l.bf16 %v4496_v4  ;;  %v4503_v43 = vunpack.i.h.bf16 %v4501_v41  ;;  %v4502_v45 = vunpack.i.l.bf16 %v4501_v41 }
0x187b   :  { %4416 = vmatpush3.bf16.msra.mxu0 %v2969_v19 }
0x187c   :  { %v4752_v60 = vpop.eup %4751  ;;  %4421 = vmatprep.subr.bf16.mxu0 %v4597_v15  ;;  %v3056_v46 = vsel %vm812_vm2, %v5700_v57, %v4498_v39  ;;  %v3055_v0 = vsel %vm812_vm2, %v5698_v28, %v4497_v40 }
0x187d   :  { %v4754_v7 = vpop.eup %4753  ;;  %v2954_v54 = vmul.f32 %v4752_v60, %v4748_v51  ;;  %v3027_v37 = vpop.permute.xlu1 %3026  ;;  %v3059_v2 = vsel %vm1510_vm6, %v3056_v46, %v4503_v43  ;;  %v3058_v3 = vsel %vm1510_vm6, %v3055_v0, %v4502_v45  ;;  %v3906_v46 = vld [vmem:[%s5973_s15 + $0x1] ss:$0 sm:$0xff] }
0x187e   :  { %v2952_v16 = vmul.f32 %v4754_v7, %v4746_v10  ;;  %v3057_v33 = vsel %vm812_vm2, %v5696_v29, %v3027_v37 }
0x187f   :  { %v2956_v24 = vpack.c.bf16 %v2954_v54, %v2954_v54 }
0x1880   :  { %v2955_v36 = vpack.c.bf16 %v2952_v16, %v2950_v14  ;;  %v4603_v14 = vld [vmem:[%s5975_s17 + $0x44] ss:$8 sps:$4 sm:$0xff]   ;;  %v4601_v16 = vld [vmem:[%s5975_s17 + $0x40] ss:$8 sps:$4 sm:$0xff]  }
0x1881   :  { %v3039_v42 = vpop.permute.xlu1 %3038  ;;  %3289 = vmatprep.subr.bf16.mxu1 %v4603_v14 }
0x1882   :  { %4417 = vmatprep.mubr.msk.bf16.mxu0 %vm873_vm4, %v2955_v36  ;;  %v3060_v59 = vsel %vm1510_vm6, %v3057_v33, %v3039_v42  ;;  %3290 = vmatpush1.bf16.msra.mxu1 %v4601_v16  ;;  %v4604_v36 = vld [vmem:[%s5975_s17 + $0x50] ss:$8 sps:$4 sm:$0xff]  }
0x1883   :  { %4418 = vmatmul.mubr.msk.bf16.vlgmr.msra.gmra.mrb[56].mxu0 %vm873_vm4, %v2956_v24  ;;  %v4606_v24 = vld [vmem:[%s5975_s17 + $0x54] ss:$8 sps:$4 sm:$0xff]  }
0x1884   :  { %4422 = vmatpush3.bf16.msra.mxu0 %v4597_v15  ;;  %3291 = vmatprep.subr.bf16.mxu1 %v4606_v24  ;;  %v4609_v15 = vld [vmem:[%s5975_s17 + $0x64] ss:$8 sps:$4 sm:$0xff]  }
0x1885   :  { %4423 = vmatprep.subr.bf16.mxu0 %v4598_v21 }
0x1886   :  { %3292 = vmatpush1.bf16.msra.mxu1 %v4604_v36 }
0x1887   :  { %3293 = vmatprep.subr.bf16.mxu1 %v4609_v15 }
0x1888   :  { %4424 = vmatpush3.bf16.msra.mxu0 %v4598_v21  ;;  %v4607_v21 = vld [vmem:[%s5975_s17 + $0x60] ss:$8 sps:$4 sm:$0xff]  }
0x1889   :  { %4425 = vmatprep.subr.bf16.mxu0 %v4599_v18 }
0x188a   :  { %3294 = vmatpush1.bf16.msra.mxu1 %v4607_v21 }
0x188c   :  { %4426 = vmatpush3.bf16.msra.mxu0 %v4599_v18  ;;  %v4610_v18 = vld [vmem:[%s5975_s17 + $0x70] ss:$8 sps:$4 sm:$0xff]  }
0x188d   :  { %4427 = vmatprep.subr.bf16.mxu0 %v4600_v20 }
0x1890   :  { %4428 = vmatpush3.bf16.msra.mxu0 %v4600_v20  ;;  %v4612_v20 = vld [vmem:[%s5975_s17 + $0x74] ss:$8 sps:$4 sm:$0xff]  }
0x1891   :  { %3295 = vmatprep.subr.bf16.mxu1 %v4612_v20 }
0x1892   :  { %3296 = vmatpush1.bf16.msra.mxu1 %v4610_v18 }
0x1956   :  { %v4419_v26 = vpop.f32.mrb[56].mxu0 }
0x1957   :  { %3050 = vrot.lane.b32.xlu1 %v4419_v26, %s6033_s6  ;;  %v3005_v44 = vpop.f32.mrb[57].mxu0 }
0x1958   :  { %v4420_v25 = vpop.f32.mrb[58].mxu0 }
0x1959   :  { %v3008_v27 = vpop.f32.mrb[59].mxu0 }
0x195a   :  { %v4504_v31 = vpack.i.bf16 %v3008_v27, %v3005_v44 }
0x195c   :  { %4505 = vrot.lane.b32.xlu0 %v4504_v31, %s6033_s6 }
0x19c9   :  { %v3051_v47 = vpop.permute.xlu1 %3050 }
0x19ca   :  { %v3063_v5 = vsel %vm1514_vm7, %v3060_v59, %v3051_v47 }
0x19cb   :  { %v3074_v61 = vpack.c.bf16 %v3063_v5, %v3063_v5  ;;  %v4614_v5 = vld [vmem:[%s5977_s19 + $0x80] sm:$0xff]  }
0x19ce   :  { %v4506_v48 = vpop.permute.xlu0 %4505 }
0x19cf   :  { %v4508_v49 = vunpack.i.h.bf16 %v4506_v48  ;;  %v4507_v1 = vunpack.i.l.bf16 %v4506_v48  ;;  %v3907_v48 = vld [vmem:[%s5974_s16 + $0x1] ss:$0 sm:$0xff] }
0x19d1   :  { %v3061_v57 = vsel %vm1514_vm7, %v3058_v3, %v4507_v1  ;;  %v3062_v6 = vsel %vm1514_vm7, %v3059_v2, %v4508_v49  ;;  %v4613_v3 = vld [vmem:[%s5977_s19 + $0xc0] sm:$0xff]  }
0x19d2   :  { %v3073_v28 = vpack.c.bf16 %v3062_v6, %v3061_v57  ;;  %4176 = vmatprep.subr.bf16.mxu0 %v4613_v3  ;;  %v4615_v57 = vld [vmem:[%s5977_s19 + $0xc8] sm:$0xff]  }
0x19d3   :  { %v4616_v6 = vld [vmem:[%s5977_s19 + $0x88] sm:$0xff]  }
0x19d4   :  { %4429 = vmatprep.mubr.msk.bf16.mxu0 %vm486_vm0, %v3073_v28  ;;  %v4618_v28 = vld [vmem:[%s5977_s19 + $0x90] sm:$0xff]  }
0x19d5   :  { %4430 = vmatmul.mubr.msk.bf16.vlgmr.msra.gmra.mrb[60].mxu0 %vm486_vm0, %v3074_v61  ;;  %v4619_v61 = vld [vmem:[%s5977_s19 + $0xd8] sm:$0xff]  }
0x19d6   :  { %4177 = vmatpush3.bf16.msra.mxu0 %v4614_v5 }
0x19d7   :  { %4178 = vmatprep.subr.bf16.mxu0 %v4615_v57 }
0x19da   :  { %4179 = vmatpush3.bf16.msra.mxu0 %v4616_v6 }
0x1aa8   :  { %v4431_v29 = vpop.f32.mrb[60].mxu0 }
0x1aa9   :  { %v3155_v17 = vadd.f32 %v4431_v29, %v5528_v53  ;;  %v3139_v56 = vpop.f32.mrb[61].mxu0  ;;  %v4620_v29 = vld [vmem:[%s5977_s19 + $0x98] sm:$0xff]  }
0x1aaa   :  { %v3153_v52 = vadd.f32 %v3139_v56, %v5518_v62  ;;  %v4432_v9 = vpop.f32.mrb[62].mxu0  ;;  %v4623_v56 = vld [vmem:[%s5977_s19 + $0xe8] sm:$0xff]  }
0x1aab   :  { %v3163_v22 = vadd.f32 %v3905_v8, %v3155_v17  ;;  %v3142_v10 = vpop.f32.mrb[63].mxu0  ;;  %v4622_v17 = vld [vmem:[%s5977_s19 + $0xa0] sm:$0xff]   ;;  %v4625_v9 = vld [vmem:[%s5977_s19 + $0xf0] sm:$0xff]  }
0x1aac   :  { %v5800_v51 = vadd.f32 %v3905_v8, %v3153_v52  ;;  %v3154_v11 = vadd.f32 %v3142_v10, %v5521_v63  ;;  %v4624_v52 = vld [vmem:[%s5977_s19 + $0xa8] sm:$0xff]   ;;  %v4627_v10 = vld [vmem:[%s5977_s19 + $0xf8] sm:$0xff]  }
0x1aad   :  { %v3172_v54 = vsel %vm493_vm1, %v3163_v22, 0.0 }
0x1aae   :  { %v5803_v12 = vadd.f32 %v3905_v8, %v3154_v11  ;;  %v3166_v50 = vsel %vm486_vm0, %v5800_v51, 0.0  ;;  %v4621_v8 = vld [vmem:[%s5977_s19 + $0xe0] sm:$0xff]   ;;  %v4628_v11 = vld [vmem:[%s5977_s19 + $0xb8] sm:$0xff]  }
0x1aaf   :  { %3167 = vadd.xlane.f32.xlu0 %v3166_v50 }
0x1ab0   :  { %v3169_v13 = vsel %vm486_vm0, %v5803_v12, 0.0 }
0x1ab1   :  { %3170 = vadd.xlane.f32.xlu1 %v3169_v13 }
0x1b3c   :  { %v3168_v53 = vpop.xlane.xlu0 %3167 }
0x1b3d   :  { %v3175_v34 = vmul.f32 0.015625, %v3168_v53 }
0x1b3e   :  { %v3171_v62 = vpop.xlane.xlu1 %3170 }
0x1b3f   :  { %v3178_v23 = vsub.f32 %v5800_v51, %v3175_v34  ;;  %v3176_v32 = vmul.f32 0.015625, %v3171_v62 }
0x1b41   :  { %v3179_v19 = vsub.f32 %v5803_v12, %v3176_v32  ;;  %v3181_v35 = vmul.f32 %v3178_v23, %v3178_v23 }
0x1b43   :  { %v3184_v63 = vsel %vm486_vm0, %v3181_v35, 0.0  ;;  %v3182_v60 = vmul.f32 %v3179_v19, %v3179_v19  ;;  %v3916_v35 = vld [vmem:[%s5976_s18 + $0x1] ss:$2 sm:$0x3] }
0x1b44   :  { %3185 = vadd.xlane.f32.xlu0 %v3184_v63  ;;  %v3236_v63 = vrot.slane %v3916_v35, %v1686_v30 }
0x1b45   :  { %v3187_v7 = vsel %vm486_vm0, %v3182_v60, 0.0  ;;  %v3240_v60 = vrot.slane %v3916_v35, %v1690_v58 }
0x1b48   :  { %3188 = vadd.xlane.f32.xlu0 %v3187_v7 }
0x1b4c   :  { %3173 = vadd.xlane.f32.xlu0 %v3172_v54 }
0x1bd1   :  { %v3186_v26 = vpop.xlane.xlu0 %3185 }
0x1bd2   :  { %v3193_v44 = vmul.f32 0.015625, %v3186_v26 }
0x1bd4   :  { %v3196_v25 = vadd.f32 1e-06, %v3193_v44 }
0x1bd5   :  { %v3189_v27 = vpop.xlane.xlu0 %3188 }
0x1bd6   :  { %4755 = vrsqrt.f32 %v3196_v25  ;;  %v3194_v31 = vmul.f32 0.015625, %v3189_v27 }
0x1bd8   :  { %v3197_v4 = vadd.f32 1e-06, %v3194_v31 }
0x1bd9   :  { %v3174_v37 = vpop.xlane.xlu0 %3173 }
0x1bda   :  { %4757 = vrsqrt.f32 %v3197_v4  ;;  %v3177_v39 = vmul.f32 0.015625, %v3174_v37 }
0x1bdc   :  { %v3180_v40 = vsub.f32 %v3163_v22, %v3177_v39  ;;  %v4626_v22 = vld [vmem:[%s5977_s19 + $0xb0] sm:$0xff]  }
0x1bde   :  { %v3183_v41 = vmul.f32 %v3180_v40, %v3180_v40 }
0x1be0   :  { %v4756_v42 = vpop.eup %4755  ;;  %v3190_v43 = vsel %vm493_vm1, %v3183_v41, 0.0 }
0x1be1   :  { %v3202_v45 = vmul.f32 %v4756_v42, %v3178_v23  ;;  %3191 = vadd.xlane.f32.xlu1 %v3190_v43 }
0x1be3   :  { %v3209_v47 = vmul.f32 %v3906_v46, %v3202_v45 }
0x1be4   :  { %v4758_v0 = vpop.eup %4757 }
0x1be5   :  { %v3203_v33 = vmul.f32 %v4758_v0, %v3179_v19  ;;  %v3216_v49 = vadd.f32 %v3907_v48, %v3209_v47 }
0x1be7   :  { %v3210_v59 = vmul.f32 %v3906_v46, %v3203_v33 }
0x1be9   :  { %v3217_v1 = vadd.f32 %v3907_v48, %v3210_v59 }
0x1beb   :  { %v3228_v2 = vpack.c.bf16 %v3217_v1, %v3216_v49 }
0x1bed   :  { %3925 = vmatmul.mubr.msk.bf16.vlgmr.msra.gmra.mrb[64].mxu1 %vm486_vm0, %v3228_v2 }
0x1bee   :  { %3331 = vmatprep.mubr.bf16.mxu1 %v4812_v38  ;;  %v4617_v38 = vld [vmem:[%s5977_s19 + $0xd0] sm:$0xff]  }
0x1bef   :  { %4180 = vmatprep.subr.bf16.mxu0 %v4617_v38 }
0x1bf0   :  { %4181 = vmatpush3.bf16.msra.mxu0 %v4618_v28 }
0x1bf1   :  { %4182 = vmatprep.subr.bf16.mxu0 %v4619_v61 }
0x1bf4   :  { %4183 = vmatpush3.bf16.msra.mxu0 %v4620_v29 }
0x1bf5   :  { %4184 = vmatprep.subr.bf16.mxu0 %v4621_v8 }
0x1bf8   :  { %4185 = vmatpush3.bf16.msra.mxu0 %v4622_v17 }
0x1bf9   :  { %4186 = vmatprep.subr.bf16.mxu0 %v4623_v56 }
0x1bfc   :  { %4187 = vmatpush3.bf16.msra.mxu0 %v4624_v52 }
0x1bfd   :  { %4188 = vmatprep.subr.bf16.mxu0 %v4625_v9 }
0x1c00   :  { %4189 = vmatpush3.bf16.msra.mxu0 %v4626_v22 }
0x1c01   :  { %4190 = vmatprep.subr.bf16.mxu0 %v4627_v10 }
0x1c04   :  { %4191 = vmatpush3.bf16.msra.mxu0 %v4628_v11 }
0x1c6e   :  { %v3192_v50 = vpop.xlane.xlu1 %3191 }
0x1c6f   :  { %v3195_v13 = vmul.f32 0.015625, %v3192_v50 }
0x1c71   :  { %v3198_v53 = vadd.f32 1e-06, %v3195_v13 }
0x1c73   :  { %4759 = vrsqrt.f32 %v3198_v53 }
0x1c7d   :  { %v4760_v34 = vpop.eup %4759 }
0x1c7e   :  { %v3204_v62 = vmul.f32 %v4760_v34, %v3180_v40 }
0x1c80   :  { %v3211_v23 = vmul.f32 %v3906_v46, %v3204_v62 }
0x1c82   :  { %v3218_v32 = vadd.f32 %v3907_v48, %v3211_v23 }
0x1c84   :  { %v3229_v19 = vpack.c.bf16 %v3218_v32, %v3218_v32 }
0x1c86   :  { %3926 = vmatmul.mubr.msk.bf16.gmra.mrb[68].mxu1 %vm486_vm0, %v3229_v19 }
0x1cc0   :  { %v3323_v7 = vpop.f32.mrb[64].mxu1 }
0x1cc1   :  { %v3324_v54 = vadd.f32 %v3323_v7, %v3236_v63  ;;  %v3325_v14 = vpop.f32.mrb[65].mxu1 }
0x1cc2   :  { %v3326_v16 = vadd.f32 %v3325_v14, %v3240_v60  ;;  %v3327_v24 = vpop.f32.mrb[66].mxu1 }
0x1cc3   :  { %v3340_v36 = vmul.f32 %v3324_v54, %v3324_v54  ;;  %v3328_v15 = vadd.f32 %v3327_v24, %v3236_v63  ;;  %v3329_v21 = vpop.f32.mrb[67].mxu1 }
0x1cc4   :  { %v3341_v18 = vmul.f32 %v3326_v16, %v3326_v16  ;;  %v3330_v20 = vadd.f32 %v3329_v21, %v3240_v60 }
0x1cc5   :  { %v3346_v26 = vmul.f32 %v3340_v36, %v3324_v54  ;;  %v3342_v44 = vmul.f32 %v3328_v15, %v3328_v15 }
0x1cc6   :  { %v3347_v25 = vmul.f32 %v3341_v18, %v3326_v16  ;;  %v3343_v27 = vmul.f32 %v3330_v20, %v3330_v20 }
0x1cc7   :  { %v3352_v31 = vmul.f32 0.044715, %v3346_v26  ;;  %v3348_v4 = vmul.f32 %v3342_v44, %v3328_v15 }
0x1cc8   :  { %v3353_v30 = vmul.f32 0.044715, %v3347_v25  ;;  %v3349_v37 = vmul.f32 %v3343_v27, %v3330_v20 }
0x1cc9   :  { %v3358_v55 = vadd.f32 %v3352_v31, %v3324_v54  ;;  %v3354_v58 = vmul.f32 0.044715, %v3348_v4  ;;  %v3975_v31 = vld [vmem:[%s5978_s20 + $0x1] ss:$0 sm:$0xff] }
0x1cca   :  { %v3359_v39 = vadd.f32 %v3353_v30, %v3326_v16  ;;  %v3355_v40 = vmul.f32 0.044715, %v3349_v37 }
0x1ccb   :  { %v3364_v41 = vmul.f32 0.7978846, %v3358_v55  ;;  %v3360_v42 = vadd.f32 %v3354_v58, %v3328_v15 }
0x1ccc   :  { %v3365_v43 = vmul.f32 0.7978846, %v3359_v39  ;;  %v3361_v45 = vadd.f32 %v3355_v40, %v3330_v20 }
0x1ccd   :  { %4761 = vtanh.f32 %v3364_v41  ;;  %v3366_v46 = vmul.f32 0.7978846, %v3360_v42 }
0x1cce   :  { %4763 = vtanh.f32 %v3365_v43  ;;  %v3367_v0 = vmul.f32 0.7978846, %v3361_v45 }
0x1ccf   :  { %4765 = vtanh.f32 %v3366_v46 }
0x1cd0   :  { %4767 = vtanh.f32 %v3367_v0 }
0x1cd7   :  { %v4762_v47 = vpop.eup %4761 }
0x1cd8   :  { %v4764_v33 = vpop.eup %4763  ;;  %v3376_v48 = vadd.f32 1.0, %v4762_v47 }
0x1cd9   :  { %v4766_v59 = vpop.eup %4765  ;;  %v3377_v49 = vadd.f32 1.0, %v4764_v33 }
0x1cda   :  { %v4768_v1 = vpop.eup %4767  ;;  %v3382_v2 = vmul.f32 0.5, %v3376_v48  ;;  %v3378_v3 = vadd.f32 1.0, %v4766_v59 }
0x1cdb   :  { %v3379_v5 = vadd.f32 1.0, %v4768_v1  ;;  %v3383_v57 = vmul.f32 0.5, %v3377_v49 }
0x1cdc   :  { %v3384_v6 = vmul.f32 0.5, %v3378_v3  ;;  %v3388_v28 = vmul.f32 %v3382_v2, %v3324_v54 }
0x1cdd   :  { %v3385_v38 = vmul.f32 0.5, %v3379_v5  ;;  %v3389_v29 = vmul.f32 %v3383_v57, %v3326_v16 }
0x1cde   :  { %v3390_v61 = vmul.f32 %v3384_v6, %v3328_v15 }
0x1cdf   :  { %v3391_v8 = vmul.f32 %v3385_v38, %v3330_v20 }
0x1ce0   :  { %v3427_v17 = vpack.c.bf16 %v3390_v61, %v3388_v28  ;;  %v3641_v28 = vld [vmem:[%s5981_s23] sm:$0xff]  ;;  %v3642_v61 = vld [vmem:[%s5981_s23 + $0x8] sm:$0xff] }
0x1ce1   :  { %v3428_v56 = vpack.c.bf16 %v3391_v8, %v3389_v29  ;;  %v3650_v29 = vpack.c.bf16 %v3642_v61, %v3641_v28  ;;  %v4813_v8 = vmov 0.0  }
0x1ce2   :  { %4433 = vmatprep.subr.bf16.mxu1 %v4813_v8  ;;  %4441 = vmatprep.mubr.msk.bf16.mxu1 %vm4814_vm10, %v4813_v8 }
0x1ce3   :  { %3559 = vmatprep.mubr.bf16.mxu0 %v3428_v56  ;;  %4434 = vmatpush3.bf16.msra.mxu1 %v3650_v29  ;;  %v3644_v56 = vld [vmem:[%s5981_s23 + $0x18] sm:$0xff] }
0x1ce4   :  { %3560 = vmatmul.mubr.bf16.vlgmr.msra.gmra.mrb[64].mxu0 %v3427_v17  ;;  %4435 = vmatprep.subr.bf16.mxu1 %v4813_v8  ;;  %v3643_v17 = vld [vmem:[%s5981_s23 + $0x10] sm:$0xff] }
0x1d59   :  { %v3333_v52 = vpop.f32.mrb[68].mxu1 }
0x1d5a   :  { %v3334_v9 = vadd.f32 %v3333_v52, %v3236_v63  ;;  %v3335_v22 = vpop.f32.mrb[69].mxu1  ;;  %v3651_v52 = vpack.c.bf16 %v3644_v56, %v3643_v17 }
0x1d5b   :  { %v3336_v10 = vadd.f32 %v3335_v22, %v3240_v60  ;;  %v3337_v11 = vpop.f32.mrb[70].mxu1  ;;  %v3646_v22 = vld [vmem:[%s5981_s23 + $0x28] sm:$0xff] }
0x1d5c   :  { %v3344_v50 = vmul.f32 %v3334_v9, %v3334_v9  ;;  %v3338_v13 = vpop.f32.mrb[71].mxu1  ;;  %4436 = vmatpush3.bf16.msra.mxu1 %v3651_v52  ;;  %v3647_v11 = vld [vmem:[%s5981_s23 + $0x30] sm:$0xff] }
0x1d5d   :  { %v3345_v53 = vmul.f32 %v3336_v10, %v3336_v10  ;;  %4437 = vmatprep.subr.bf16.mxu1 %v4813_v8 }
0x1d5e   :  { %v3350_v34 = vmul.f32 %v3344_v50, %v3334_v9  ;;  %v3648_v50 = vld [vmem:[%s5981_s23 + $0x38] sm:$0xff] }
0x1d5f   :  { %v3351_v62 = vmul.f32 %v3345_v53, %v3336_v10  ;;  %v3653_v13 = vpack.c.bf16 %v3648_v50, %v3647_v11 }
0x1d60   :  { %v3356_v23 = vmul.f32 0.044715, %v3350_v34 }
0x1d61   :  { %v3357_v32 = vmul.f32 0.044715, %v3351_v62 }
0x1d62   :  { %v3362_v19 = vadd.f32 %v3356_v23, %v3334_v9 }
0x1d63   :  { %v3363_v35 = vadd.f32 %v3357_v32, %v3336_v10 }
0x1d64   :  { %v3368_v7 = vmul.f32 0.7978846, %v3362_v19 }
0x1d65   :  { %v3369_v54 = vmul.f32 0.7978846, %v3363_v35 }
0x1d66   :  { %4769 = vtanh.f32 %v3368_v7  ;;  %v3976_v7 = vld [vmem:[%s5979_s21] ss:$0 sm:$0xff]  ;;  %s4815_s21 = smov [#allocation2]  }
0x1d67   :  { %4771 = vtanh.f32 %v3369_v54 }
0x1d70   :  { %v4770_v14 = vpop.eup %4769 }
0x1d71   :  { %v4772_v16 = vpop.eup %4771  ;;  %v3380_v24 = vadd.f32 1.0, %v4770_v14 }
0x1d72   :  { %v3381_v63 = vadd.f32 1.0, %v4772_v16  ;;  %v3977_v16 = vld [vmem:[%s5980_s22] ss:$0 sm:$0xff]  ;;  %s3713_s22 = sshll.u32 %s4815_s21, 4  ;;  %s3714_s22 = int_to_ptr.vmem [resolvable:$true] %s3713_s22 }
0x1d73   :  { %v3386_v36 = vmul.f32 0.5, %v3380_v24  ;;  %s4782_s5 = scalar_lea.vmem %s3714_s22, 32  ;;  %p4787_p1 = scmp.lt.s32.totalorder %s3714_s22, %s3714_s22 }
0x1d74   :  { %v3387_v60 = vmul.f32 0.5, %v3381_v63  ;;  %p4783_p0 = scmp.ne.s32.totalorder %s3714_s22, %s4782_s5  ;;  %p4788_p2 = scmp.lt.s32.totalorder %s4782_s5, %s4782_s5 }
0x1d75   :  { %v3392_v15 = vmul.f32 %v3386_v36, %v3334_v9  ;;  %v3645_v9 = vld [vmem:[%s5981_s23 + $0x20] sm:$0xff] }
0x1d76   :  { %v3393_v21 = vmul.f32 %v3387_v60, %v3336_v10  ;;  %v3652_v10 = vpack.c.bf16 %v3646_v22, %v3645_v9  ;;  %p4789_p3 = por %p4788_p2, %p4787_p1 }
0x1d77   :  { %v3429_v20 = vpack.c.bf16 %v3392_v15, %v3392_v15 }
0x1d78   :  { %v3430_v18 = vpack.c.bf16 %v3393_v21, %v3393_v21  ;;  %4438 = vmatpush3.bf16.msra.mxu1 %v3652_v10  ;;  %p4790_p4 = pnand %p4789_p3, %p4783_p0 }
0x1d79   :  { %4439 = vmatprep.subr.bf16.mxu1 %v4813_v8 }
0x1d7a   :  { %3567 = vmatprep.mubr.bf16.mxu0 %v3430_v18 }
0x1d7b   :  { %3568 = vmatmul.mubr.bf16.gmra.mrb[68].mxu0 %v3429_v20 }
0x1d7c   :  { %4440 = vmatpush3.bf16.msra.mxu1 %v3653_v13 }
0x1db7   :  { %v4192_v26 = vpop.f32.mrb[64].mxu0 }
0x1db8   :  { %v4193_v44 = vpop.f32.mrb[65].mxu0 }
0x1db9   :  { %v4194_v25 = vadd.f32 %v4193_v44, %v4192_v26  ;;  %v4195_v27 = vpop.f32.mrb[66].mxu0  ;;  %v3978_v26 = vld [vmem:[%s5982_s24] ss:$0 sm:$0xff] }
0x1dba   :  { %v4196_v4 = vpop.f32.mrb[67].mxu0 }
0x1dbb   :  { %v3574_v30 = vadd.f32 %v4194_v25, %v5800_v51  ;;  %v4197_v37 = vadd.f32 %v4196_v4, %v4195_v27 }
0x1dbd   :  { %v3581_v55 = vadd.f32 %v3975_v31, %v3574_v30  ;;  %v3575_v58 = vadd.f32 %v4197_v37, %v5803_v12 }
0x1dbf   :  { %v3582_v39 = vadd.f32 %v3975_v31, %v3575_v58  ;;  %v3589_v40 = vrot.slane %v3581_v55, 1 }
0x1dc1   :  { %v3584_v41 = vrot.slane %v3582_v39, 1  ;;  %v3591_v42 = vrot.slane %v3582_v39, 2 }
0x1dc3   :  { %v3587_v43 = vsel %vm3586_vm8, %v3581_v55, %v3584_v41  ;;  %v3593_v45 = vsel %vm3586_vm8, %v3589_v40, %v3591_v42 }
0x1dc4   :  { %v3597_v46 = vsel %vm3596_vm9, %v3587_v43, 0.0  ;;  %v3624_v0 = vsel %vm3596_vm9, %v3593_v45, 0.0 }
0x1dc5   :  { %3598 = vadd.xlane.f32.xlu0 %v3597_v46  ;;  %3625 = vadd.xlane.f32.xlu1 %v3624_v0 }
0x1e4e   :  { %v4198_v47 = vpop.f32.mrb[68].mxu0 }
0x1e4f   :  { %v4199_v51 = vpop.f32.mrb[69].mxu0 }
0x1e50   :  { %v4201_v33 = vpop.f32.mrb[70].mxu0 }
0x1e51   :  { %v4202_v48 = vpop.f32.mrb[71].mxu0 }
0x1e52   :  { %v3626_v59 = vpop.xlane.xlu1 %3625  ;;  %v3599_v12 = vpop.xlane.xlu0 %3598 }
0x1e53   :  { %v3627_v49 = vmul.f32 0.015625, %v3626_v59  ;;  %v3600_v1 = vmul.f32 0.015625, %v3599_v12 }
0x1e55   :  { %v3628_v2 = vsub.f32 %v3593_v45, %v3627_v49  ;;  %v3601_v3 = vsub.f32 %v3587_v43, %v3600_v1 }
0x1e57   :  { %v3629_v5 = vmul.f32 %v3628_v2, %v3628_v2  ;;  %v3602_v57 = vmul.f32 %v3601_v3, %v3601_v3 }
0x1e59   :  { %v3630_v6 = vsel %vm3596_vm9, %v3629_v5, 0.0  ;;  %v3603_v38 = vsel %vm3596_vm9, %v3602_v57, 0.0 }
0x1e5a   :  { %3631 = vadd.xlane.f32.xlu1 %v3630_v6  ;;  %3604 = vadd.xlane.f32.xlu0 %v3603_v38 }
0x1ee7   :  { %v3632_v53 = vpop.xlane.xlu1 %3631  ;;  %v3605_v34 = vpop.xlane.xlu0 %3604 }
0x1ee8   :  { %v3633_v62 = vmul.f32 0.015625, %v3632_v53  ;;  %v3606_v23 = vmul.f32 0.015625, %v3605_v34 }
0x1eea   :  { %v3634_v32 = vadd.f32 1e-06, %v3633_v62  ;;  %v3607_v19 = vadd.f32 1e-06, %v3606_v23 }
0x1eec   :  { %4773 = vrsqrt.f32 %v3634_v32 }
0x1eed   :  { %4775 = vrsqrt.f32 %v3607_v19 }
0x1ef6   :  { %v4774_v35 = vpop.eup %4773 }
0x1ef7   :  { %v4776_v54 = vpop.eup %4775  ;;  %v3636_v14 = vmul.f32 %v4774_v35, %v3628_v2 }
0x1ef8   :  { %v3609_v24 = vmul.f32 %v4776_v54, %v3601_v3 }
0x1ef9   :  { %v3637_v63 = vmul.f32 %v3976_v7, %v3636_v14 }
0x1efa   :  { %v3616_v36 = vmul.f32 %v3976_v7, %v3609_v24 }
0x1efb   :  { %v3638_v60 = vadd.f32 %v3977_v16, %v3637_v63 }
0x1efc   :  { %v3623_v15 = vadd.f32 %v3977_v16, %v3616_v36 }
0x1efe   :  { %v3639_v21 = vadd.f32 %v3638_v60, %v3623_v15 }
0x1f00   :  { %v3640_v18 = vmul.f32 0.5, %v3639_v21 }
0x1f02   :  { %v3649_v20 = vpack.c.bf16 %v3640_v18, %v3640_v18 }
0x1f04   :  { %4442 = vmatmul.mubr.msk.bf16.vlgmr.msra.gmra.mrb[72].mxu1 %vm486_vm0, %v3649_v20 }
0x1fd7   :  { %v3698_v44 = vpop.f32.mrb[72].mxu1 }
0x1fd8   :  { %v3699_v25 = vadd.f32 %v3978_v26, %v3698_v44  ;;  %v4443_v27 = vpop.f32.mrb[73].mxu1 }
0x1fd9   :  { %v3701_v31 = vpop.f32.mrb[74].mxu1 }
0x1fda   :  { %4777 = vtanh.f32 %v3699_v25  ;;  %v4444_v4 = vpop.f32.mrb[75].mxu1 }
0x1fe4   :  { %v4778_v30 = vpop.eup %4777 }
0x1fe5   :  { %3706 = vst.msk [vmem:[#allocation2] sm:$0x3] %vm3705_vm11, %v4778_v30 }
0x1fe6   :  { %4793 = shalt.err (!%p4790_p4)
}
0x1fe7   :  { %s6034_s1 = sld [smem:[#allocation15_spill]] }
0x1fed   :  { %s4794_s28 = scalar_lea.hbm %s6034_s1, 32 }
0x1fee   :  { %p4795_p5 = scmp.ne.s32.totalorder %s6034_s1, %s4794_s28  ;;  %p4798_p6 = scmp.lt.u32.totalorder %s4794_s28, %s6034_s1 }
0x1ff0   :  { %p4800_p7 = pnand %p4798_p6, %p4795_p5 }
0x1ff2   :  { %4803 = shalt.err (!%p4800_p7)
}
0x1ff3   :  { %3716 = dma.vmem_to_hbm [thread:$0]  %s3714_s22, 32, %s6034_s1, [#allocation3]  }
0x1ff4   :  { %4804 = dma.done.wait [#allocation3], 32  }
0x1ff5   :  { %4805 = vsyncadd [#allocation3], 4294967264 }
0x1ff6   :  { %3720 = vsyncpa [#allocation3], 1 }

</bundles_post_ra>
